<compile_context>
chip_gen: v5e
topology: v5e:2x2
jax: 0.10.0
libtpu: 0.0.40
codegen_flags: <defaults>
</compile_context>

<pallas_src>
import functools

import jax
import jax.numpy as jnp
from jax.experimental import pallas as pl
from jax.experimental.pallas import tpu as pltpu


def _spatial_attention_kernel(w_ref, pix_ref, x_ref, o_ref, *,
                              ksize, height, width, channels, c_chunk,
                              use_fori):
    k = ksize
    pad = (k - 1) // 2
    bt, _, hwp = x_ref.shape
    f32 = jnp.float32

    # ---- channel sum / max: elementwise chunk accumulation, single XLU reduce ----
    cc = min(c_chunk, channels)
    n_full = channels // cc
    rem = channels - n_full * cc

    def load(c0, n):
        return x_ref[:, c0:c0 + n, :].astype(f32)            # (bt, n, hwp)

    sum_c = load(0, cc)                                       # (bt, cc, hwp)
    max_c = sum_c
    if n_full > 1:
        if use_fori:
            def body(i, carry):
                s, m = carry
                c0 = pl.multiple_of(i * cc, cc)
                blk = x_ref[:, pl.ds(c0, cc), :].astype(f32)
                return s + blk, jnp.maximum(m, blk)
            sum_c, max_c = jax.lax.fori_loop(1, n_full, body, (sum_c, max_c),
                                             unroll=4)
        else:
            for i in range(1, n_full):
                blk = load(i * cc, cc)
                sum_c = sum_c + blk
                max_c = jnp.maximum(max_c, blk)
    sum_acc = jnp.sum(sum_c, axis=1)                          # (bt, hwp)
    max_acc = jnp.max(max_c, axis=1)                          # (bt, hwp)
    if rem:
        blk = load(n_full * cc, rem)
        sum_acc = sum_acc + jnp.sum(blk, axis=1)
        max_acc = jnp.maximum(max_acc, jnp.max(blk, axis=1))

    avg = sum_acc * (1.0 / channels)                          # (bt, hwp)
    mx = max_acc                                              # (bt, hwp)

    # ---- k x k "same" conv over the 2-channel (avg, max) map --------------------
    # Boundary masks come from precomputed per-pixel row/col indices; padded
    # lanes carry an out-of-range sentinel so they are always masked.  Wrapped
    # lanes from the rotation only ever land on masked positions.
    row = pix_ref[0:1, :]                                     # (1, hwp) int32
    col = pix_ref[1:2, :]                                     # (1, hwp) int32
    row_ok = [jnp.logical_and(row >= pad - di,
                              row < height + pad - di).astype(f32)
              for di in range(k)]
    col_ok = [jnp.logical_and(col >= pad - dj,
                              col < width + pad - dj).astype(f32)
              for dj in range(k)]

    acc = jnp.zeros((bt, hwp), f32)
    for di in range(k):
        for dj in range(k):
            s = (di - pad) * width + (dj - pad)               # flat source offset
            sh = (-s) % hwp                                   # np.roll-style shift
            if sh == 0:
                avg_sh, max_sh = avg, mx
            else:
                avg_sh = pltpu.roll(avg, sh, 1)
                max_sh = pltpu.roll(mx, sh, 1)
            w_avg = w_ref[di * k + dj]                        # in-channel 0 (avg)
            w_max = w_ref[k * k + di * k + dj]                # in-channel 1 (max)
            mask = row_ok[di] * col_ok[dj]                    # (1, hwp) {0,1} float
            acc = acc + mask * (w_avg * avg_sh + w_max * max_sh)

    att = jax.nn.sigmoid(acc)                                 # (bt, hwp) f32

    # ---- out = x * att, streamed over channel chunks; broadcast hoisted ---------
    att_b = jnp.broadcast_to(att[:, None, :], (bt, cc, hwp))  # materialize once

    if use_fori:
        def obody(i, carry):
            c0 = pl.multiple_of(i * cc, cc)
            o_ref[:, pl.ds(c0, cc), :] = (
                x_ref[:, pl.ds(c0, cc), :] * att_b).astype(o_ref.dtype)
            return carry
        jax.lax.fori_loop(0, n_full, obody, 0, unroll=4)
    else:
        for i in range(n_full):
            c0 = i * cc
            o_ref[:, c0:c0 + cc, :] = (
                x_ref[:, c0:c0 + cc, :] * att_b).astype(o_ref.dtype)
    if rem:
        c0 = n_full * cc
        o_ref[:, c0:c0 + rem, :] = (
            x_ref[:, c0:c0 + rem, :] * att_b[:, :rem, :]).astype(o_ref.dtype)


def spatial_attention(x, weight, ksize):
    """x: (B, C, H, W); weight: (1, 2, k, k) — Conv2d(2, 1, k, bias=False)."""
    assert ksize in (3, 5, 7)
    B, C, H, W = x.shape
    hw = H * W
    hw_pad = ((hw + 127) // 128) * 128                  # lane-dense, unmasked stores

    itemsize = jnp.dtype(x.dtype).itemsize
    c_chunk = max(8, 32 // itemsize)                    # 8 f32 / 16 bf16 / 32 int8

    x_flat = x.reshape(B, C, hw)
    if hw_pad != hw:
        x_flat = jnp.pad(x_flat, ((0, 0), (0, 0), (0, hw_pad - hw)))

    w_flat = weight.reshape(-1).astype(jnp.float32)     # (2*k*k,) -> SMEM scalars

    lin = jnp.arange(hw_pad, dtype=jnp.int32)
    sentinel = max(H, W) + ksize                        # always-masked padded lanes
    row = jnp.where(lin < hw, lin // W, sentinel)
    col = jnp.where(lin < hw, lin % W, sentinel)
    pix = jnp.stack([row, col], axis=0)                 # (2, hw_pad)

    # ---- generation-aware tiling ---------------------------------------------
    try:
        vmem_cap = int(pltpu.get_tpu_info().vmem_capacity_bytes)
    except Exception:
        vmem_cap = 64 << 20                             # conservative (v7x per-TC)
    vmem_budget = int(vmem_cap * 0.85)                  # headroom for compiler scratch
    # ~10 MiB blocks on 64-MiB parts (v7x), ~20 MiB on 128-MiB parts (v5e/v6e).
    block_target = (20 << 20) if vmem_cap > (96 << 20) else (10 << 20)
    block_cap = max(1 << 20, (vmem_budget - (8 << 20)) // 4)   # in+out, double-buffered
    block_target = min(block_target, block_cap)

    bytes_per_batch = C * hw_pad * itemsize
    bt = max(1, min(B, block_target // max(bytes_per_batch, 1)))
    if B >= 2:
        bt = max(1, min(bt, B // 2))                    # >= 2 grid steps (megacore/dual TC)
    # TODO(synk): when bt == 1 and bytes_per_batch > block_cap, split into a
    # two-pass pipeline (channel-grid attention map + fully-parallel multiply)
    # or add a spatial tile axis with a (k-1)//2 halo.

    n_blocks = -(-B // bt)                              # cdiv; pad B, never shrink bt
    b_pad = n_blocks * bt
    if b_pad != B:
        x_flat = jnp.pad(x_flat, ((0, b_pad - B), (0, 0), (0, 0)))

    blk_bytes = bt * bytes_per_batch
    vmem_limit = int(min(vmem_budget, max(32 << 20, 4 * blk_bytes + (8 << 20))))

    use_fori = (C // min(c_chunk, C)) >= 16             # avoid huge unroll at large C

    kernel = functools.partial(_spatial_attention_kernel,
                               ksize=ksize, height=H, width=W, channels=C,
                               c_chunk=c_chunk, use_fori=use_fori)

    out_flat = pl.pallas_call(
        kernel,
        out_shape=jax.ShapeDtypeStruct((b_pad, C, hw_pad), x.dtype),
        grid=(n_blocks,),
        in_specs=[
            pl.BlockSpec(memory_space=pltpu.MemorySpace.SMEM),   # conv weights
            pl.BlockSpec((2, hw_pad), lambda b: (0, 0)),         # row/col indices
            pl.BlockSpec((bt, C, hw_pad), lambda b: (b, 0, 0)),  # x batch tile
        ],
        out_specs=pl.BlockSpec((bt, C, hw_pad), lambda b: (b, 0, 0)),
        compiler_params=pltpu.CompilerParams(
            dimension_semantics=("parallel",),
            vmem_limit_bytes=vmem_limit,
        ),
    )(w_flat, pix, x_flat)

    return out_flat[:B, :, :hw].reshape(B, C, H, W)


if __name__ == "__main__":
    key = jax.random.PRNGKey(0)
    kx, kw = jax.random.split(key)

    B, C, H, W = 2, 4, 16, 16
    ksize = 7                                             # must be in (3, 5, 7)

    x = jax.random.normal(kx, (B, C, H, W), dtype=jnp.float32)

    # Deterministic Conv2d(2, 1, k, bias=False) weight init (kaiming-uniform-like bound).
    fan_in = 2 * ksize * ksize
    bound = 1.0 / (fan_in ** 0.5)
    weight = jax.random.uniform(kw, (1, 2, ksize, ksize), jnp.float32, -bound, bound)

    out = jax.block_until_ready(spatial_attention(x, weight, ksize))

    # Pure-JAX reference for correctness check.
    pad = (ksize - 1) // 2
    avg = jnp.mean(x, axis=1, keepdims=True)
    mx = jnp.max(x, axis=1, keepdims=True)
    cat = jnp.concatenate([avg, mx], axis=1)
    conv = jax.lax.conv_general_dilated(
        cat, weight, (1, 1), [(pad, pad), (pad, pad)],
        dimension_numbers=("NCHW", "OIHW", "NCHW"))
    ref = x * jax.nn.sigmoid(conv)

    assert out.shape == x.shape and out.dtype == x.dtype
    assert jnp.allclose(out, ref, atol=1e-5, rtol=1e-5), float(jnp.max(jnp.abs(out - ref)))
    print("KERNEL_OK")
</pallas_src>

<mosaic_0001>
module attributes {stable_mosaic.version = 11 : i64} {
  func.func @_spatial_attention_kernel(%arg0: i32, %arg1: memref<98xf32, #tpu.memory_space<smem>>, %arg2: memref<2x256xi32, #tpu.memory_space<vmem>>, %arg3: memref<1x4x256xf32, #tpu.memory_space<vmem>>, %arg4: memref<1x4x256xf32, #tpu.memory_space<vmem>>) attributes {dimension_semantics = [#tpu.dimension_semantics<parallel>], iteration_bounds = array<i64: 2>, scalar_prefetch = 0 : i64, scratch_operands = 0 : i64, tpu.core_type = #tpu.core_type<tc>, window_params = [{transform_indices = @transform_0, window_bounds = array<i64: 98>}, {pipeline_mode = #tpu.pipeline_mode<synchronous>, transform_indices = @transform_1, window_bounds = array<i64: 2, 256>}, {transform_indices = @transform_2, window_bounds = array<i64: 1, 4, 256>}, {transform_indices = @transform_3, window_bounds = array<i64: 1, 4, 256>}]} {
    %c0 = arith.constant 0 : index
    %c0_0 = arith.constant 0 : index
    %c0_1 = arith.constant 0 : index
    %0 = vector.load %arg3[%c0, %c0_0, %c0_1] : memref<1x4x256xf32, #tpu.memory_space<vmem>>, vector<1x4x256xf32>
    %cst = arith.constant dense<0.000000e+00> : vector<1x256xf32>
    %1 = vector.multi_reduction <add>, %0, %cst [1] : vector<1x4x256xf32> to vector<1x256xf32>
    %cst_2 = arith.constant dense<0xFF800000> : vector<1x256xf32>
    %2 = vector.multi_reduction <maximumf>, %0, %cst_2 [1] : vector<1x4x256xf32> to vector<1x256xf32>
    %cst_3 = arith.constant 2.500000e-01 : f32
    %3 = vector.broadcast %cst_3 : f32 to vector<1x256xf32>
    %4 = arith.mulf %1, %3 : vector<1x256xf32>
    %c0_4 = arith.constant 0 : index
    %c0_5 = arith.constant 0 : index
    %5 = vector.load %arg2[%c0_4, %c0_5] : memref<2x256xi32, #tpu.memory_space<vmem>>, vector<1x256xi32>
    %c1 = arith.constant 1 : index
    %c0_6 = arith.constant 0 : index
    %6 = vector.load %arg2[%c1, %c0_6] : memref<2x256xi32, #tpu.memory_space<vmem>>, vector<1x256xi32>
    %c3_i32 = arith.constant 3 : i32
    %7 = vector.broadcast %c3_i32 : i32 to vector<1x256xi32>
    %8 = arith.cmpi sge, %5, %7 : vector<1x256xi32>
    %c19_i32 = arith.constant 19 : i32
    %9 = vector.broadcast %c19_i32 : i32 to vector<1x256xi32>
    %10 = arith.cmpi slt, %5, %9 : vector<1x256xi32>
    %11 = arith.andi %8, %10 : vector<1x256xi1>
    %12 = arith.extui %11 : vector<1x256xi1> to vector<1x256xi32>
    %13 = arith.sitofp %12 : vector<1x256xi32> to vector<1x256xf32>
    %c2_i32 = arith.constant 2 : i32
    %14 = vector.broadcast %c2_i32 : i32 to vector<1x256xi32>
    %15 = arith.cmpi sge, %5, %14 : vector<1x256xi32>
    %c18_i32 = arith.constant 18 : i32
    %16 = vector.broadcast %c18_i32 : i32 to vector<1x256xi32>
    %17 = arith.cmpi slt, %5, %16 : vector<1x256xi32>
    %18 = arith.andi %15, %17 : vector<1x256xi1>
    %19 = arith.extui %18 : vector<1x256xi1> to vector<1x256xi32>
    %20 = arith.sitofp %19 : vector<1x256xi32> to vector<1x256xf32>
    %c1_i32 = arith.constant 1 : i32
    %21 = vector.broadcast %c1_i32 : i32 to vector<1x256xi32>
    %22 = arith.cmpi sge, %5, %21 : vector<1x256xi32>
    %c17_i32 = arith.constant 17 : i32
    %23 = vector.broadcast %c17_i32 : i32 to vector<1x256xi32>
    %24 = arith.cmpi slt, %5, %23 : vector<1x256xi32>
    %25 = arith.andi %22, %24 : vector<1x256xi1>
    %26 = arith.extui %25 : vector<1x256xi1> to vector<1x256xi32>
    %27 = arith.sitofp %26 : vector<1x256xi32> to vector<1x256xf32>
    %c0_i32 = arith.constant 0 : i32
    %28 = vector.broadcast %c0_i32 : i32 to vector<1x256xi32>
    %29 = arith.cmpi sge, %5, %28 : vector<1x256xi32>
    %c16_i32 = arith.constant 16 : i32
    %30 = vector.broadcast %c16_i32 : i32 to vector<1x256xi32>
    %31 = arith.cmpi slt, %5, %30 : vector<1x256xi32>
    %32 = arith.andi %29, %31 : vector<1x256xi1>
    %33 = arith.extui %32 : vector<1x256xi1> to vector<1x256xi32>
    %34 = arith.sitofp %33 : vector<1x256xi32> to vector<1x256xf32>
    %c-1_i32 = arith.constant -1 : i32
    %35 = vector.broadcast %c-1_i32 : i32 to vector<1x256xi32>
    %36 = arith.cmpi sge, %5, %35 : vector<1x256xi32>
    %c15_i32 = arith.constant 15 : i32
    %37 = vector.broadcast %c15_i32 : i32 to vector<1x256xi32>
    %38 = arith.cmpi slt, %5, %37 : vector<1x256xi32>
    %39 = arith.andi %36, %38 : vector<1x256xi1>
    %40 = arith.extui %39 : vector<1x256xi1> to vector<1x256xi32>
    %41 = arith.sitofp %40 : vector<1x256xi32> to vector<1x256xf32>
    %c-2_i32 = arith.constant -2 : i32
    %42 = vector.broadcast %c-2_i32 : i32 to vector<1x256xi32>
    %43 = arith.cmpi sge, %5, %42 : vector<1x256xi32>
    %c14_i32 = arith.constant 14 : i32
    %44 = vector.broadcast %c14_i32 : i32 to vector<1x256xi32>
    %45 = arith.cmpi slt, %5, %44 : vector<1x256xi32>
    %46 = arith.andi %43, %45 : vector<1x256xi1>
    %47 = arith.extui %46 : vector<1x256xi1> to vector<1x256xi32>
    %48 = arith.sitofp %47 : vector<1x256xi32> to vector<1x256xf32>
    %c-3_i32 = arith.constant -3 : i32
    %49 = vector.broadcast %c-3_i32 : i32 to vector<1x256xi32>
    %50 = arith.cmpi sge, %5, %49 : vector<1x256xi32>
    %c13_i32 = arith.constant 13 : i32
    %51 = vector.broadcast %c13_i32 : i32 to vector<1x256xi32>
    %52 = arith.cmpi slt, %5, %51 : vector<1x256xi32>
    %53 = arith.andi %50, %52 : vector<1x256xi1>
    %54 = arith.extui %53 : vector<1x256xi1> to vector<1x256xi32>
    %55 = arith.sitofp %54 : vector<1x256xi32> to vector<1x256xf32>
    %c3_i32_7 = arith.constant 3 : i32
    %56 = vector.broadcast %c3_i32_7 : i32 to vector<1x256xi32>
    %57 = arith.cmpi sge, %6, %56 : vector<1x256xi32>
    %c19_i32_8 = arith.constant 19 : i32
    %58 = vector.broadcast %c19_i32_8 : i32 to vector<1x256xi32>
    %59 = arith.cmpi slt, %6, %58 : vector<1x256xi32>
    %60 = arith.andi %57, %59 : vector<1x256xi1>
    %61 = arith.extui %60 : vector<1x256xi1> to vector<1x256xi32>
    %62 = arith.sitofp %61 : vector<1x256xi32> to vector<1x256xf32>
    %c2_i32_9 = arith.constant 2 : i32
    %63 = vector.broadcast %c2_i32_9 : i32 to vector<1x256xi32>
    %64 = arith.cmpi sge, %6, %63 : vector<1x256xi32>
    %c18_i32_10 = arith.constant 18 : i32
    %65 = vector.broadcast %c18_i32_10 : i32 to vector<1x256xi32>
    %66 = arith.cmpi slt, %6, %65 : vector<1x256xi32>
    %67 = arith.andi %64, %66 : vector<1x256xi1>
    %68 = arith.extui %67 : vector<1x256xi1> to vector<1x256xi32>
    %69 = arith.sitofp %68 : vector<1x256xi32> to vector<1x256xf32>
    %c1_i32_11 = arith.constant 1 : i32
    %70 = vector.broadcast %c1_i32_11 : i32 to vector<1x256xi32>
    %71 = arith.cmpi sge, %6, %70 : vector<1x256xi32>
    %c17_i32_12 = arith.constant 17 : i32
    %72 = vector.broadcast %c17_i32_12 : i32 to vector<1x256xi32>
    %73 = arith.cmpi slt, %6, %72 : vector<1x256xi32>
    %74 = arith.andi %71, %73 : vector<1x256xi1>
    %75 = arith.extui %74 : vector<1x256xi1> to vector<1x256xi32>
    %76 = arith.sitofp %75 : vector<1x256xi32> to vector<1x256xf32>
    %c0_i32_13 = arith.constant 0 : i32
    %77 = vector.broadcast %c0_i32_13 : i32 to vector<1x256xi32>
    %78 = arith.cmpi sge, %6, %77 : vector<1x256xi32>
    %c16_i32_14 = arith.constant 16 : i32
    %79 = vector.broadcast %c16_i32_14 : i32 to vector<1x256xi32>
    %80 = arith.cmpi slt, %6, %79 : vector<1x256xi32>
    %81 = arith.andi %78, %80 : vector<1x256xi1>
    %82 = arith.extui %81 : vector<1x256xi1> to vector<1x256xi32>
    %83 = arith.sitofp %82 : vector<1x256xi32> to vector<1x256xf32>
    %c-1_i32_15 = arith.constant -1 : i32
    %84 = vector.broadcast %c-1_i32_15 : i32 to vector<1x256xi32>
    %85 = arith.cmpi sge, %6, %84 : vector<1x256xi32>
    %c15_i32_16 = arith.constant 15 : i32
    %86 = vector.broadcast %c15_i32_16 : i32 to vector<1x256xi32>
    %87 = arith.cmpi slt, %6, %86 : vector<1x256xi32>
    %88 = arith.andi %85, %87 : vector<1x256xi1>
    %89 = arith.extui %88 : vector<1x256xi1> to vector<1x256xi32>
    %90 = arith.sitofp %89 : vector<1x256xi32> to vector<1x256xf32>
    %c-2_i32_17 = arith.constant -2 : i32
    %91 = vector.broadcast %c-2_i32_17 : i32 to vector<1x256xi32>
    %92 = arith.cmpi sge, %6, %91 : vector<1x256xi32>
    %c14_i32_18 = arith.constant 14 : i32
    %93 = vector.broadcast %c14_i32_18 : i32 to vector<1x256xi32>
    %94 = arith.cmpi slt, %6, %93 : vector<1x256xi32>
    %95 = arith.andi %92, %94 : vector<1x256xi1>
    %96 = arith.extui %95 : vector<1x256xi1> to vector<1x256xi32>
    %97 = arith.sitofp %96 : vector<1x256xi32> to vector<1x256xf32>
    %c-3_i32_19 = arith.constant -3 : i32
    %98 = vector.broadcast %c-3_i32_19 : i32 to vector<1x256xi32>
    %99 = arith.cmpi sge, %6, %98 : vector<1x256xi32>
    %c13_i32_20 = arith.constant 13 : i32
    %100 = vector.broadcast %c13_i32_20 : i32 to vector<1x256xi32>
    %101 = arith.cmpi slt, %6, %100 : vector<1x256xi32>
    %102 = arith.andi %99, %101 : vector<1x256xi1>
    %103 = arith.extui %102 : vector<1x256xi1> to vector<1x256xi32>
    %104 = arith.sitofp %103 : vector<1x256xi32> to vector<1x256xf32>
    %cst_21 = arith.constant 0.000000e+00 : f32
    %105 = vector.broadcast %cst_21 : f32 to vector<1x256xf32>
    %c51_i32 = arith.constant 51 : i32
    %106 = tpu.dynamic_rotate %4 by %c51_i32 dim 1 : vector<1x256xf32>, i32 -> vector<1x256xf32>
    %c51_i32_22 = arith.constant 51 : i32
    %107 = tpu.dynamic_rotate %2 by %c51_i32_22 dim 1 : vector<1x256xf32>, i32 -> vector<1x256xf32>
    %c0_23 = arith.constant 0 : index
    %108 = memref.load %arg1[%c0_23] : memref<98xf32, #tpu.memory_space<smem>>
    %c49 = arith.constant 49 : index
    %109 = memref.load %arg1[%c49] : memref<98xf32, #tpu.memory_space<smem>>
    %110 = arith.mulf %13, %62 : vector<1x256xf32>
    %111 = vector.broadcast %108 : f32 to vector<1x256xf32>
    %112 = arith.mulf %111, %106 : vector<1x256xf32>
    %113 = vector.broadcast %109 : f32 to vector<1x256xf32>
    %114 = arith.mulf %113, %107 : vector<1x256xf32>
    %115 = arith.addf %112, %114 : vector<1x256xf32>
    %116 = arith.mulf %110, %115 : vector<1x256xf32>
    %117 = arith.addf %105, %116 : vector<1x256xf32>
    %c50_i32 = arith.constant 50 : i32
    %118 = tpu.dynamic_rotate %4 by %c50_i32 dim 1 : vector<1x256xf32>, i32 -> vector<1x256xf32>
    %c50_i32_24 = arith.constant 50 : i32
    %119 = tpu.dynamic_rotate %2 by %c50_i32_24 dim 1 : vector<1x256xf32>, i32 -> vector<1x256xf32>
    %c1_25 = arith.constant 1 : index
    %120 = memref.load %arg1[%c1_25] : memref<98xf32, #tpu.memory_space<smem>>
    %c50 = arith.constant 50 : index
    %121 = memref.load %arg1[%c50] : memref<98xf32, #tpu.memory_space<smem>>
    %122 = arith.mulf %13, %69 : vector<1x256xf32>
    %123 = vector.broadcast %120 : f32 to vector<1x256xf32>
    %124 = arith.mulf %123, %118 : vector<1x256xf32>
    %125 = vector.broadcast %121 : f32 to vector<1x256xf32>
    %126 = arith.mulf %125, %119 : vector<1x256xf32>
    %127 = arith.addf %124, %126 : vector<1x256xf32>
    %128 = arith.mulf %122, %127 : vector<1x256xf32>
    %129 = arith.addf %117, %128 : vector<1x256xf32>
    %c49_i32 = arith.constant 49 : i32
    %130 = tpu.dynamic_rotate %4 by %c49_i32 dim 1 : vector<1x256xf32>, i32 -> vector<1x256xf32>
    %c49_i32_26 = arith.constant 49 : i32
    %131 = tpu.dynamic_rotate %2 by %c49_i32_26 dim 1 : vector<1x256xf32>, i32 -> vector<1x256xf32>
    %c2 = arith.constant 2 : index
    %132 = memref.load %arg1[%c2] : memref<98xf32, #tpu.memory_space<smem>>
    %c51 = arith.constant 51 : index
    %133 = memref.load %arg1[%c51] : memref<98xf32, #tpu.memory_space<smem>>
    %134 = arith.mulf %13, %76 : vector<1x256xf32>
    %135 = vector.broadcast %132 : f32 to vector<1x256xf32>
    %136 = arith.mulf %135, %130 : vector<1x256xf32>
    %137 = vector.broadcast %133 : f32 to vector<1x256xf32>
    %138 = arith.mulf %137, %131 : vector<1x256xf32>
    %139 = arith.addf %136, %138 : vector<1x256xf32>
    %140 = arith.mulf %134, %139 : vector<1x256xf32>
    %141 = arith.addf %129, %140 : vector<1x256xf32>
    %c48_i32 = arith.constant 48 : i32
    %142 = tpu.dynamic_rotate %4 by %c48_i32 dim 1 : vector<1x256xf32>, i32 -> vector<1x256xf32>
    %c48_i32_27 = arith.constant 48 : i32
    %143 = tpu.dynamic_rotate %2 by %c48_i32_27 dim 1 : vector<1x256xf32>, i32 -> vector<1x256xf32>
    %c3 = arith.constant 3 : index
    %144 = memref.load %arg1[%c3] : memref<98xf32, #tpu.memory_space<smem>>
    %c52 = arith.constant 52 : index
    %145 = memref.load %arg1[%c52] : memref<98xf32, #tpu.memory_space<smem>>
    %146 = arith.mulf %13, %83 : vector<1x256xf32>
    %147 = vector.broadcast %144 : f32 to vector<1x256xf32>
    %148 = arith.mulf %147, %142 : vector<1x256xf32>
    %149 = vector.broadcast %145 : f32 to vector<1x256xf32>
    %150 = arith.mulf %149, %143 : vector<1x256xf32>
    %151 = arith.addf %148, %150 : vector<1x256xf32>
    %152 = arith.mulf %146, %151 : vector<1x256xf32>
    %153 = arith.addf %141, %152 : vector<1x256xf32>
    %c47_i32 = arith.constant 47 : i32
    %154 = tpu.dynamic_rotate %4 by %c47_i32 dim 1 : vector<1x256xf32>, i32 -> vector<1x256xf32>
    %c47_i32_28 = arith.constant 47 : i32
    %155 = tpu.dynamic_rotate %2 by %c47_i32_28 dim 1 : vector<1x256xf32>, i32 -> vector<1x256xf32>
    %c4 = arith.constant 4 : index
    %156 = memref.load %arg1[%c4] : memref<98xf32, #tpu.memory_space<smem>>
    %c53 = arith.constant 53 : index
    %157 = memref.load %arg1[%c53] : memref<98xf32, #tpu.memory_space<smem>>
    %158 = arith.mulf %13, %90 : vector<1x256xf32>
    %159 = vector.broadcast %156 : f32 to vector<1x256xf32>
    %160 = arith.mulf %159, %154 : vector<1x256xf32>
    %161 = vector.broadcast %157 : f32 to vector<1x256xf32>
    %162 = arith.mulf %161, %155 : vector<1x256xf32>
    %163 = arith.addf %160, %162 : vector<1x256xf32>
    %164 = arith.mulf %158, %163 : vector<1x256xf32>
    %165 = arith.addf %153, %164 : vector<1x256xf32>
    %c46_i32 = arith.constant 46 : i32
    %166 = tpu.dynamic_rotate %4 by %c46_i32 dim 1 : vector<1x256xf32>, i32 -> vector<1x256xf32>
    %c46_i32_29 = arith.constant 46 : i32
    %167 = tpu.dynamic_rotate %2 by %c46_i32_29 dim 1 : vector<1x256xf32>, i32 -> vector<1x256xf32>
    %c5 = arith.constant 5 : index
    %168 = memref.load %arg1[%c5] : memref<98xf32, #tpu.memory_space<smem>>
    %c54 = arith.constant 54 : index
    %169 = memref.load %arg1[%c54] : memref<98xf32, #tpu.memory_space<smem>>
    %170 = arith.mulf %13, %97 : vector<1x256xf32>
    %171 = vector.broadcast %168 : f32 to vector<1x256xf32>
    %172 = arith.mulf %171, %166 : vector<1x256xf32>
    %173 = vector.broadcast %169 : f32 to vector<1x256xf32>
    %174 = arith.mulf %173, %167 : vector<1x256xf32>
    %175 = arith.addf %172, %174 : vector<1x256xf32>
    %176 = arith.mulf %170, %175 : vector<1x256xf32>
    %177 = arith.addf %165, %176 : vector<1x256xf32>
    %c45_i32 = arith.constant 45 : i32
    %178 = tpu.dynamic_rotate %4 by %c45_i32 dim 1 : vector<1x256xf32>, i32 -> vector<1x256xf32>
    %c45_i32_30 = arith.constant 45 : i32
    %179 = tpu.dynamic_rotate %2 by %c45_i32_30 dim 1 : vector<1x256xf32>, i32 -> vector<1x256xf32>
    %c6 = arith.constant 6 : index
    %180 = memref.load %arg1[%c6] : memref<98xf32, #tpu.memory_space<smem>>
    %c55 = arith.constant 55 : index
    %181 = memref.load %arg1[%c55] : memref<98xf32, #tpu.memory_space<smem>>
    %182 = arith.mulf %13, %104 : vector<1x256xf32>
    %183 = vector.broadcast %180 : f32 to vector<1x256xf32>
    %184 = arith.mulf %183, %178 : vector<1x256xf32>
    %185 = vector.broadcast %181 : f32 to vector<1x256xf32>
    %186 = arith.mulf %185, %179 : vector<1x256xf32>
    %187 = arith.addf %184, %186 : vector<1x256xf32>
    %188 = arith.mulf %182, %187 : vector<1x256xf32>
    %189 = arith.addf %177, %188 : vector<1x256xf32>
    %c35_i32 = arith.constant 35 : i32
    %190 = tpu.dynamic_rotate %4 by %c35_i32 dim 1 : vector<1x256xf32>, i32 -> vector<1x256xf32>
    %c35_i32_31 = arith.constant 35 : i32
    %191 = tpu.dynamic_rotate %2 by %c35_i32_31 dim 1 : vector<1x256xf32>, i32 -> vector<1x256xf32>
    %c7 = arith.constant 7 : index
    %192 = memref.load %arg1[%c7] : memref<98xf32, #tpu.memory_space<smem>>
    %c56 = arith.constant 56 : index
    %193 = memref.load %arg1[%c56] : memref<98xf32, #tpu.memory_space<smem>>
    %194 = arith.mulf %20, %62 : vector<1x256xf32>
    %195 = vector.broadcast %192 : f32 to vector<1x256xf32>
    %196 = arith.mulf %195, %190 : vector<1x256xf32>
    %197 = vector.broadcast %193 : f32 to vector<1x256xf32>
    %198 = arith.mulf %197, %191 : vector<1x256xf32>
    %199 = arith.addf %196, %198 : vector<1x256xf32>
    %200 = arith.mulf %194, %199 : vector<1x256xf32>
    %201 = arith.addf %189, %200 : vector<1x256xf32>
    %c34_i32 = arith.constant 34 : i32
    %202 = tpu.dynamic_rotate %4 by %c34_i32 dim 1 : vector<1x256xf32>, i32 -> vector<1x256xf32>
    %c34_i32_32 = arith.constant 34 : i32
    %203 = tpu.dynamic_rotate %2 by %c34_i32_32 dim 1 : vector<1x256xf32>, i32 -> vector<1x256xf32>
    %c8 = arith.constant 8 : index
    %204 = memref.load %arg1[%c8] : memref<98xf32, #tpu.memory_space<smem>>
    %c57 = arith.constant 57 : index
    %205 = memref.load %arg1[%c57] : memref<98xf32, #tpu.memory_space<smem>>
    %206 = arith.mulf %20, %69 : vector<1x256xf32>
    %207 = vector.broadcast %204 : f32 to vector<1x256xf32>
    %208 = arith.mulf %207, %202 : vector<1x256xf32>
    %209 = vector.broadcast %205 : f32 to vector<1x256xf32>
    %210 = arith.mulf %209, %203 : vector<1x256xf32>
    %211 = arith.addf %208, %210 : vector<1x256xf32>
    %212 = arith.mulf %206, %211 : vector<1x256xf32>
    %213 = arith.addf %201, %212 : vector<1x256xf32>
    %c33_i32 = arith.constant 33 : i32
    %214 = tpu.dynamic_rotate %4 by %c33_i32 dim 1 : vector<1x256xf32>, i32 -> vector<1x256xf32>
    %c33_i32_33 = arith.constant 33 : i32
    %215 = tpu.dynamic_rotate %2 by %c33_i32_33 dim 1 : vector<1x256xf32>, i32 -> vector<1x256xf32>
    %c9 = arith.constant 9 : index
    %216 = memref.load %arg1[%c9] : memref<98xf32, #tpu.memory_space<smem>>
    %c58 = arith.constant 58 : index
    %217 = memref.load %arg1[%c58] : memref<98xf32, #tpu.memory_space<smem>>
    %218 = arith.mulf %20, %76 : vector<1x256xf32>
    %219 = vector.broadcast %216 : f32 to vector<1x256xf32>
    %220 = arith.mulf %219, %214 : vector<1x256xf32>
    %221 = vector.broadcast %217 : f32 to vector<1x256xf32>
    %222 = arith.mulf %221, %215 : vector<1x256xf32>
    %223 = arith.addf %220, %222 : vector<1x256xf32>
    %224 = arith.mulf %218, %223 : vector<1x256xf32>
    %225 = arith.addf %213, %224 : vector<1x256xf32>
    %c32_i32 = arith.constant 32 : i32
    %226 = tpu.dynamic_rotate %4 by %c32_i32 dim 1 : vector<1x256xf32>, i32 -> vector<1x256xf32>
    %c32_i32_34 = arith.constant 32 : i32
    %227 = tpu.dynamic_rotate %2 by %c32_i32_34 dim 1 : vector<1x256xf32>, i32 -> vector<1x256xf32>
    %c10 = arith.constant 10 : index
    %228 = memref.load %arg1[%c10] : memref<98xf32, #tpu.memory_space<smem>>
    %c59 = arith.constant 59 : index
    %229 = memref.load %arg1[%c59] : memref<98xf32, #tpu.memory_space<smem>>
    %230 = arith.mulf %20, %83 : vector<1x256xf32>
    %231 = vector.broadcast %228 : f32 to vector<1x256xf32>
    %232 = arith.mulf %231, %226 : vector<1x256xf32>
    %233 = vector.broadcast %229 : f32 to vector<1x256xf32>
    %234 = arith.mulf %233, %227 : vector<1x256xf32>
    %235 = arith.addf %232, %234 : vector<1x256xf32>
    %236 = arith.mulf %230, %235 : vector<1x256xf32>
    %237 = arith.addf %225, %236 : vector<1x256xf32>
    %c31_i32 = arith.constant 31 : i32
    %238 = tpu.dynamic_rotate %4 by %c31_i32 dim 1 : vector<1x256xf32>, i32 -> vector<1x256xf32>
    %c31_i32_35 = arith.constant 31 : i32
    %239 = tpu.dynamic_rotate %2 by %c31_i32_35 dim 1 : vector<1x256xf32>, i32 -> vector<1x256xf32>
    %c11 = arith.constant 11 : index
    %240 = memref.load %arg1[%c11] : memref<98xf32, #tpu.memory_space<smem>>
    %c60 = arith.constant 60 : index
    %241 = memref.load %arg1[%c60] : memref<98xf32, #tpu.memory_space<smem>>
    %242 = arith.mulf %20, %90 : vector<1x256xf32>
    %243 = vector.broadcast %240 : f32 to vector<1x256xf32>
    %244 = arith.mulf %243, %238 : vector<1x256xf32>
    %245 = vector.broadcast %241 : f32 to vector<1x256xf32>
    %246 = arith.mulf %245, %239 : vector<1x256xf32>
    %247 = arith.addf %244, %246 : vector<1x256xf32>
    %248 = arith.mulf %242, %247 : vector<1x256xf32>
    %249 = arith.addf %237, %248 : vector<1x256xf32>
    %c30_i32 = arith.constant 30 : i32
    %250 = tpu.dynamic_rotate %4 by %c30_i32 dim 1 : vector<1x256xf32>, i32 -> vector<1x256xf32>
    %c30_i32_36 = arith.constant 30 : i32
    %251 = tpu.dynamic_rotate %2 by %c30_i32_36 dim 1 : vector<1x256xf32>, i32 -> vector<1x256xf32>
    %c12 = arith.constant 12 : index
    %252 = memref.load %arg1[%c12] : memref<98xf32, #tpu.memory_space<smem>>
    %c61 = arith.constant 61 : index
    %253 = memref.load %arg1[%c61] : memref<98xf32, #tpu.memory_space<smem>>
    %254 = arith.mulf %20, %97 : vector<1x256xf32>
    %255 = vector.broadcast %252 : f32 to vector<1x256xf32>
    %256 = arith.mulf %255, %250 : vector<1x256xf32>
    %257 = vector.broadcast %253 : f32 to vector<1x256xf32>
    %258 = arith.mulf %257, %251 : vector<1x256xf32>
    %259 = arith.addf %256, %258 : vector<1x256xf32>
    %260 = arith.mulf %254, %259 : vector<1x256xf32>
    %261 = arith.addf %249, %260 : vector<1x256xf32>
    %c29_i32 = arith.constant 29 : i32
    %262 = tpu.dynamic_rotate %4 by %c29_i32 dim 1 : vector<1x256xf32>, i32 -> vector<1x256xf32>
    %c29_i32_37 = arith.constant 29 : i32
    %263 = tpu.dynamic_rotate %2 by %c29_i32_37 dim 1 : vector<1x256xf32>, i32 -> vector<1x256xf32>
    %c13 = arith.constant 13 : index
    %264 = memref.load %arg1[%c13] : memref<98xf32, #tpu.memory_space<smem>>
    %c62 = arith.constant 62 : index
    %265 = memref.load %arg1[%c62] : memref<98xf32, #tpu.memory_space<smem>>
    %266 = arith.mulf %20, %104 : vector<1x256xf32>
    %267 = vector.broadcast %264 : f32 to vector<1x256xf32>
    %268 = arith.mulf %267, %262 : vector<1x256xf32>
    %269 = vector.broadcast %265 : f32 to vector<1x256xf32>
    %270 = arith.mulf %269, %263 : vector<1x256xf32>
    %271 = arith.addf %268, %270 : vector<1x256xf32>
    %272 = arith.mulf %266, %271 : vector<1x256xf32>
    %273 = arith.addf %261, %272 : vector<1x256xf32>
    %c19_i32_38 = arith.constant 19 : i32
    %274 = tpu.dynamic_rotate %4 by %c19_i32_38 dim 1 : vector<1x256xf32>, i32 -> vector<1x256xf32>
    %c19_i32_39 = arith.constant 19 : i32
    %275 = tpu.dynamic_rotate %2 by %c19_i32_39 dim 1 : vector<1x256xf32>, i32 -> vector<1x256xf32>
    %c14 = arith.constant 14 : index
    %276 = memref.load %arg1[%c14] : memref<98xf32, #tpu.memory_space<smem>>
    %c63 = arith.constant 63 : index
    %277 = memref.load %arg1[%c63] : memref<98xf32, #tpu.memory_space<smem>>
    %278 = arith.mulf %27, %62 : vector<1x256xf32>
    %279 = vector.broadcast %276 : f32 to vector<1x256xf32>
    %280 = arith.mulf %279, %274 : vector<1x256xf32>
    %281 = vector.broadcast %277 : f32 to vector<1x256xf32>
    %282 = arith.mulf %281, %275 : vector<1x256xf32>
    %283 = arith.addf %280, %282 : vector<1x256xf32>
    %284 = arith.mulf %278, %283 : vector<1x256xf32>
    %285 = arith.addf %273, %284 : vector<1x256xf32>
    %c18_i32_40 = arith.constant 18 : i32
    %286 = tpu.dynamic_rotate %4 by %c18_i32_40 dim 1 : vector<1x256xf32>, i32 -> vector<1x256xf32>
    %c18_i32_41 = arith.constant 18 : i32
    %287 = tpu.dynamic_rotate %2 by %c18_i32_41 dim 1 : vector<1x256xf32>, i32 -> vector<1x256xf32>
    %c15 = arith.constant 15 : index
    %288 = memref.load %arg1[%c15] : memref<98xf32, #tpu.memory_space<smem>>
    %c64 = arith.constant 64 : index
    %289 = memref.load %arg1[%c64] : memref<98xf32, #tpu.memory_space<smem>>
    %290 = arith.mulf %27, %69 : vector<1x256xf32>
    %291 = vector.broadcast %288 : f32 to vector<1x256xf32>
    %292 = arith.mulf %291, %286 : vector<1x256xf32>
    %293 = vector.broadcast %289 : f32 to vector<1x256xf32>
    %294 = arith.mulf %293, %287 : vector<1x256xf32>
    %295 = arith.addf %292, %294 : vector<1x256xf32>
    %296 = arith.mulf %290, %295 : vector<1x256xf32>
    %297 = arith.addf %285, %296 : vector<1x256xf32>
    %c17_i32_42 = arith.constant 17 : i32
    %298 = tpu.dynamic_rotate %4 by %c17_i32_42 dim 1 : vector<1x256xf32>, i32 -> vector<1x256xf32>
    %c17_i32_43 = arith.constant 17 : i32
    %299 = tpu.dynamic_rotate %2 by %c17_i32_43 dim 1 : vector<1x256xf32>, i32 -> vector<1x256xf32>
    %c16 = arith.constant 16 : index
    %300 = memref.load %arg1[%c16] : memref<98xf32, #tpu.memory_space<smem>>
    %c65 = arith.constant 65 : index
    %301 = memref.load %arg1[%c65] : memref<98xf32, #tpu.memory_space<smem>>
    %302 = arith.mulf %27, %76 : vector<1x256xf32>
    %303 = vector.broadcast %300 : f32 to vector<1x256xf32>
    %304 = arith.mulf %303, %298 : vector<1x256xf32>
    %305 = vector.broadcast %301 : f32 to vector<1x256xf32>
    %306 = arith.mulf %305, %299 : vector<1x256xf32>
    %307 = arith.addf %304, %306 : vector<1x256xf32>
    %308 = arith.mulf %302, %307 : vector<1x256xf32>
    %309 = arith.addf %297, %308 : vector<1x256xf32>
    %c16_i32_44 = arith.constant 16 : i32
    %310 = tpu.dynamic_rotate %4 by %c16_i32_44 dim 1 : vector<1x256xf32>, i32 -> vector<1x256xf32>
    %c16_i32_45 = arith.constant 16 : i32
    %311 = tpu.dynamic_rotate %2 by %c16_i32_45 dim 1 : vector<1x256xf32>, i32 -> vector<1x256xf32>
    %c17 = arith.constant 17 : index
    %312 = memref.load %arg1[%c17] : memref<98xf32, #tpu.memory_space<smem>>
    %c66 = arith.constant 66 : index
    %313 = memref.load %arg1[%c66] : memref<98xf32, #tpu.memory_space<smem>>
    %314 = arith.mulf %27, %83 : vector<1x256xf32>
    %315 = vector.broadcast %312 : f32 to vector<1x256xf32>
    %316 = arith.mulf %315, %310 : vector<1x256xf32>
    %317 = vector.broadcast %313 : f32 to vector<1x256xf32>
    %318 = arith.mulf %317, %311 : vector<1x256xf32>
    %319 = arith.addf %316, %318 : vector<1x256xf32>
    %320 = arith.mulf %314, %319 : vector<1x256xf32>
    %321 = arith.addf %309, %320 : vector<1x256xf32>
    %c15_i32_46 = arith.constant 15 : i32
    %322 = tpu.dynamic_rotate %4 by %c15_i32_46 dim 1 : vector<1x256xf32>, i32 -> vector<1x256xf32>
    %c15_i32_47 = arith.constant 15 : i32
    %323 = tpu.dynamic_rotate %2 by %c15_i32_47 dim 1 : vector<1x256xf32>, i32 -> vector<1x256xf32>
    %c18 = arith.constant 18 : index
    %324 = memref.load %arg1[%c18] : memref<98xf32, #tpu.memory_space<smem>>
    %c67 = arith.constant 67 : index
    %325 = memref.load %arg1[%c67] : memref<98xf32, #tpu.memory_space<smem>>
    %326 = arith.mulf %27, %90 : vector<1x256xf32>
    %327 = vector.broadcast %324 : f32 to vector<1x256xf32>
    %328 = arith.mulf %327, %322 : vector<1x256xf32>
    %329 = vector.broadcast %325 : f32 to vector<1x256xf32>
    %330 = arith.mulf %329, %323 : vector<1x256xf32>
    %331 = arith.addf %328, %330 : vector<1x256xf32>
    %332 = arith.mulf %326, %331 : vector<1x256xf32>
    %333 = arith.addf %321, %332 : vector<1x256xf32>
    %c14_i32_48 = arith.constant 14 : i32
    %334 = tpu.dynamic_rotate %4 by %c14_i32_48 dim 1 : vector<1x256xf32>, i32 -> vector<1x256xf32>
    %c14_i32_49 = arith.constant 14 : i32
    %335 = tpu.dynamic_rotate %2 by %c14_i32_49 dim 1 : vector<1x256xf32>, i32 -> vector<1x256xf32>
    %c19 = arith.constant 19 : index
    %336 = memref.load %arg1[%c19] : memref<98xf32, #tpu.memory_space<smem>>
    %c68 = arith.constant 68 : index
    %337 = memref.load %arg1[%c68] : memref<98xf32, #tpu.memory_space<smem>>
    %338 = arith.mulf %27, %97 : vector<1x256xf32>
    %339 = vector.broadcast %336 : f32 to vector<1x256xf32>
    %340 = arith.mulf %339, %334 : vector<1x256xf32>
    %341 = vector.broadcast %337 : f32 to vector<1x256xf32>
    %342 = arith.mulf %341, %335 : vector<1x256xf32>
    %343 = arith.addf %340, %342 : vector<1x256xf32>
    %344 = arith.mulf %338, %343 : vector<1x256xf32>
    %345 = arith.addf %333, %344 : vector<1x256xf32>
    %c13_i32_50 = arith.constant 13 : i32
    %346 = tpu.dynamic_rotate %4 by %c13_i32_50 dim 1 : vector<1x256xf32>, i32 -> vector<1x256xf32>
    %c13_i32_51 = arith.constant 13 : i32
    %347 = tpu.dynamic_rotate %2 by %c13_i32_51 dim 1 : vector<1x256xf32>, i32 -> vector<1x256xf32>
    %c20 = arith.constant 20 : index
    %348 = memref.load %arg1[%c20] : memref<98xf32, #tpu.memory_space<smem>>
    %c69 = arith.constant 69 : index
    %349 = memref.load %arg1[%c69] : memref<98xf32, #tpu.memory_space<smem>>
    %350 = arith.mulf %27, %104 : vector<1x256xf32>
    %351 = vector.broadcast %348 : f32 to vector<1x256xf32>
    %352 = arith.mulf %351, %346 : vector<1x256xf32>
    %353 = vector.broadcast %349 : f32 to vector<1x256xf32>
    %354 = arith.mulf %353, %347 : vector<1x256xf32>
    %355 = arith.addf %352, %354 : vector<1x256xf32>
    %356 = arith.mulf %350, %355 : vector<1x256xf32>
    %357 = arith.addf %345, %356 : vector<1x256xf32>
    %c3_i32_52 = arith.constant 3 : i32
    %358 = tpu.dynamic_rotate %4 by %c3_i32_52 dim 1 : vector<1x256xf32>, i32 -> vector<1x256xf32>
    %c3_i32_53 = arith.constant 3 : i32
    %359 = tpu.dynamic_rotate %2 by %c3_i32_53 dim 1 : vector<1x256xf32>, i32 -> vector<1x256xf32>
    %c21 = arith.constant 21 : index
    %360 = memref.load %arg1[%c21] : memref<98xf32, #tpu.memory_space<smem>>
    %c70 = arith.constant 70 : index
    %361 = memref.load %arg1[%c70] : memref<98xf32, #tpu.memory_space<smem>>
    %362 = arith.mulf %34, %62 : vector<1x256xf32>
    %363 = vector.broadcast %360 : f32 to vector<1x256xf32>
    %364 = arith.mulf %363, %358 : vector<1x256xf32>
    %365 = vector.broadcast %361 : f32 to vector<1x256xf32>
    %366 = arith.mulf %365, %359 : vector<1x256xf32>
    %367 = arith.addf %364, %366 : vector<1x256xf32>
    %368 = arith.mulf %362, %367 : vector<1x256xf32>
    %369 = arith.addf %357, %368 : vector<1x256xf32>
    %c2_i32_54 = arith.constant 2 : i32
    %370 = tpu.dynamic_rotate %4 by %c2_i32_54 dim 1 : vector<1x256xf32>, i32 -> vector<1x256xf32>
    %c2_i32_55 = arith.constant 2 : i32
    %371 = tpu.dynamic_rotate %2 by %c2_i32_55 dim 1 : vector<1x256xf32>, i32 -> vector<1x256xf32>
    %c22 = arith.constant 22 : index
    %372 = memref.load %arg1[%c22] : memref<98xf32, #tpu.memory_space<smem>>
    %c71 = arith.constant 71 : index
    %373 = memref.load %arg1[%c71] : memref<98xf32, #tpu.memory_space<smem>>
    %374 = arith.mulf %34, %69 : vector<1x256xf32>
    %375 = vector.broadcast %372 : f32 to vector<1x256xf32>
    %376 = arith.mulf %375, %370 : vector<1x256xf32>
    %377 = vector.broadcast %373 : f32 to vector<1x256xf32>
    %378 = arith.mulf %377, %371 : vector<1x256xf32>
    %379 = arith.addf %376, %378 : vector<1x256xf32>
    %380 = arith.mulf %374, %379 : vector<1x256xf32>
    %381 = arith.addf %369, %380 : vector<1x256xf32>
    %c1_i32_56 = arith.constant 1 : i32
    %382 = tpu.dynamic_rotate %4 by %c1_i32_56 dim 1 : vector<1x256xf32>, i32 -> vector<1x256xf32>
    %c1_i32_57 = arith.constant 1 : i32
    %383 = tpu.dynamic_rotate %2 by %c1_i32_57 dim 1 : vector<1x256xf32>, i32 -> vector<1x256xf32>
    %c23 = arith.constant 23 : index
    %384 = memref.load %arg1[%c23] : memref<98xf32, #tpu.memory_space<smem>>
    %c72 = arith.constant 72 : index
    %385 = memref.load %arg1[%c72] : memref<98xf32, #tpu.memory_space<smem>>
    %386 = arith.mulf %34, %76 : vector<1x256xf32>
    %387 = vector.broadcast %384 : f32 to vector<1x256xf32>
    %388 = arith.mulf %387, %382 : vector<1x256xf32>
    %389 = vector.broadcast %385 : f32 to vector<1x256xf32>
    %390 = arith.mulf %389, %383 : vector<1x256xf32>
    %391 = arith.addf %388, %390 : vector<1x256xf32>
    %392 = arith.mulf %386, %391 : vector<1x256xf32>
    %393 = arith.addf %381, %392 : vector<1x256xf32>
    %c24 = arith.constant 24 : index
    %394 = memref.load %arg1[%c24] : memref<98xf32, #tpu.memory_space<smem>>
    %c73 = arith.constant 73 : index
    %395 = memref.load %arg1[%c73] : memref<98xf32, #tpu.memory_space<smem>>
    %396 = arith.mulf %34, %83 : vector<1x256xf32>
    %397 = vector.broadcast %394 : f32 to vector<1x256xf32>
    %398 = arith.mulf %397, %4 : vector<1x256xf32>
    %399 = vector.broadcast %395 : f32 to vector<1x256xf32>
    %400 = arith.mulf %399, %2 : vector<1x256xf32>
    %401 = arith.addf %398, %400 : vector<1x256xf32>
    %402 = arith.mulf %396, %401 : vector<1x256xf32>
    %403 = arith.addf %393, %402 : vector<1x256xf32>
    %c255_i32 = arith.constant 255 : i32
    %404 = tpu.dynamic_rotate %4 by %c255_i32 dim 1 : vector<1x256xf32>, i32 -> vector<1x256xf32>
    %c255_i32_58 = arith.constant 255 : i32
    %405 = tpu.dynamic_rotate %2 by %c255_i32_58 dim 1 : vector<1x256xf32>, i32 -> vector<1x256xf32>
    %c25 = arith.constant 25 : index
    %406 = memref.load %arg1[%c25] : memref<98xf32, #tpu.memory_space<smem>>
    %c74 = arith.constant 74 : index
    %407 = memref.load %arg1[%c74] : memref<98xf32, #tpu.memory_space<smem>>
    %408 = arith.mulf %34, %90 : vector<1x256xf32>
    %409 = vector.broadcast %406 : f32 to vector<1x256xf32>
    %410 = arith.mulf %409, %404 : vector<1x256xf32>
    %411 = vector.broadcast %407 : f32 to vector<1x256xf32>
    %412 = arith.mulf %411, %405 : vector<1x256xf32>
    %413 = arith.addf %410, %412 : vector<1x256xf32>
    %414 = arith.mulf %408, %413 : vector<1x256xf32>
    %415 = arith.addf %403, %414 : vector<1x256xf32>
    %c254_i32 = arith.constant 254 : i32
    %416 = tpu.dynamic_rotate %4 by %c254_i32 dim 1 : vector<1x256xf32>, i32 -> vector<1x256xf32>
    %c254_i32_59 = arith.constant 254 : i32
    %417 = tpu.dynamic_rotate %2 by %c254_i32_59 dim 1 : vector<1x256xf32>, i32 -> vector<1x256xf32>
    %c26 = arith.constant 26 : index
    %418 = memref.load %arg1[%c26] : memref<98xf32, #tpu.memory_space<smem>>
    %c75 = arith.constant 75 : index
    %419 = memref.load %arg1[%c75] : memref<98xf32, #tpu.memory_space<smem>>
    %420 = arith.mulf %34, %97 : vector<1x256xf32>
    %421 = vector.broadcast %418 : f32 to vector<1x256xf32>
    %422 = arith.mulf %421, %416 : vector<1x256xf32>
    %423 = vector.broadcast %419 : f32 to vector<1x256xf32>
    %424 = arith.mulf %423, %417 : vector<1x256xf32>
    %425 = arith.addf %422, %424 : vector<1x256xf32>
    %426 = arith.mulf %420, %425 : vector<1x256xf32>
    %427 = arith.addf %415, %426 : vector<1x256xf32>
    %c253_i32 = arith.constant 253 : i32
    %428 = tpu.dynamic_rotate %4 by %c253_i32 dim 1 : vector<1x256xf32>, i32 -> vector<1x256xf32>
    %c253_i32_60 = arith.constant 253 : i32
    %429 = tpu.dynamic_rotate %2 by %c253_i32_60 dim 1 : vector<1x256xf32>, i32 -> vector<1x256xf32>
    %c27 = arith.constant 27 : index
    %430 = memref.load %arg1[%c27] : memref<98xf32, #tpu.memory_space<smem>>
    %c76 = arith.constant 76 : index
    %431 = memref.load %arg1[%c76] : memref<98xf32, #tpu.memory_space<smem>>
    %432 = arith.mulf %34, %104 : vector<1x256xf32>
    %433 = vector.broadcast %430 : f32 to vector<1x256xf32>
    %434 = arith.mulf %433, %428 : vector<1x256xf32>
    %435 = vector.broadcast %431 : f32 to vector<1x256xf32>
    %436 = arith.mulf %435, %429 : vector<1x256xf32>
    %437 = arith.addf %434, %436 : vector<1x256xf32>
    %438 = arith.mulf %432, %437 : vector<1x256xf32>
    %439 = arith.addf %427, %438 : vector<1x256xf32>
    %c243_i32 = arith.constant 243 : i32
    %440 = tpu.dynamic_rotate %4 by %c243_i32 dim 1 : vector<1x256xf32>, i32 -> vector<1x256xf32>
    %c243_i32_61 = arith.constant 243 : i32
    %441 = tpu.dynamic_rotate %2 by %c243_i32_61 dim 1 : vector<1x256xf32>, i32 -> vector<1x256xf32>
    %c28 = arith.constant 28 : index
    %442 = memref.load %arg1[%c28] : memref<98xf32, #tpu.memory_space<smem>>
    %c77 = arith.constant 77 : index
    %443 = memref.load %arg1[%c77] : memref<98xf32, #tpu.memory_space<smem>>
    %444 = arith.mulf %41, %62 : vector<1x256xf32>
    %445 = vector.broadcast %442 : f32 to vector<1x256xf32>
    %446 = arith.mulf %445, %440 : vector<1x256xf32>
    %447 = vector.broadcast %443 : f32 to vector<1x256xf32>
    %448 = arith.mulf %447, %441 : vector<1x256xf32>
    %449 = arith.addf %446, %448 : vector<1x256xf32>
    %450 = arith.mulf %444, %449 : vector<1x256xf32>
    %451 = arith.addf %439, %450 : vector<1x256xf32>
    %c242_i32 = arith.constant 242 : i32
    %452 = tpu.dynamic_rotate %4 by %c242_i32 dim 1 : vector<1x256xf32>, i32 -> vector<1x256xf32>
    %c242_i32_62 = arith.constant 242 : i32
    %453 = tpu.dynamic_rotate %2 by %c242_i32_62 dim 1 : vector<1x256xf32>, i32 -> vector<1x256xf32>
    %c29 = arith.constant 29 : index
    %454 = memref.load %arg1[%c29] : memref<98xf32, #tpu.memory_space<smem>>
    %c78 = arith.constant 78 : index
    %455 = memref.load %arg1[%c78] : memref<98xf32, #tpu.memory_space<smem>>
    %456 = arith.mulf %41, %69 : vector<1x256xf32>
    %457 = vector.broadcast %454 : f32 to vector<1x256xf32>
    %458 = arith.mulf %457, %452 : vector<1x256xf32>
    %459 = vector.broadcast %455 : f32 to vector<1x256xf32>
    %460 = arith.mulf %459, %453 : vector<1x256xf32>
    %461 = arith.addf %458, %460 : vector<1x256xf32>
    %462 = arith.mulf %456, %461 : vector<1x256xf32>
    %463 = arith.addf %451, %462 : vector<1x256xf32>
    %c241_i32 = arith.constant 241 : i32
    %464 = tpu.dynamic_rotate %4 by %c241_i32 dim 1 : vector<1x256xf32>, i32 -> vector<1x256xf32>
    %c241_i32_63 = arith.constant 241 : i32
    %465 = tpu.dynamic_rotate %2 by %c241_i32_63 dim 1 : vector<1x256xf32>, i32 -> vector<1x256xf32>
    %c30 = arith.constant 30 : index
    %466 = memref.load %arg1[%c30] : memref<98xf32, #tpu.memory_space<smem>>
    %c79 = arith.constant 79 : index
    %467 = memref.load %arg1[%c79] : memref<98xf32, #tpu.memory_space<smem>>
    %468 = arith.mulf %41, %76 : vector<1x256xf32>
    %469 = vector.broadcast %466 : f32 to vector<1x256xf32>
    %470 = arith.mulf %469, %464 : vector<1x256xf32>
    %471 = vector.broadcast %467 : f32 to vector<1x256xf32>
    %472 = arith.mulf %471, %465 : vector<1x256xf32>
    %473 = arith.addf %470, %472 : vector<1x256xf32>
    %474 = arith.mulf %468, %473 : vector<1x256xf32>
    %475 = arith.addf %463, %474 : vector<1x256xf32>
    %c240_i32 = arith.constant 240 : i32
    %476 = tpu.dynamic_rotate %4 by %c240_i32 dim 1 : vector<1x256xf32>, i32 -> vector<1x256xf32>
    %c240_i32_64 = arith.constant 240 : i32
    %477 = tpu.dynamic_rotate %2 by %c240_i32_64 dim 1 : vector<1x256xf32>, i32 -> vector<1x256xf32>
    %c31 = arith.constant 31 : index
    %478 = memref.load %arg1[%c31] : memref<98xf32, #tpu.memory_space<smem>>
    %c80 = arith.constant 80 : index
    %479 = memref.load %arg1[%c80] : memref<98xf32, #tpu.memory_space<smem>>
    %480 = arith.mulf %41, %83 : vector<1x256xf32>
    %481 = vector.broadcast %478 : f32 to vector<1x256xf32>
    %482 = arith.mulf %481, %476 : vector<1x256xf32>
    %483 = vector.broadcast %479 : f32 to vector<1x256xf32>
    %484 = arith.mulf %483, %477 : vector<1x256xf32>
    %485 = arith.addf %482, %484 : vector<1x256xf32>
    %486 = arith.mulf %480, %485 : vector<1x256xf32>
    %487 = arith.addf %475, %486 : vector<1x256xf32>
    %c239_i32 = arith.constant 239 : i32
    %488 = tpu.dynamic_rotate %4 by %c239_i32 dim 1 : vector<1x256xf32>, i32 -> vector<1x256xf32>
    %c239_i32_65 = arith.constant 239 : i32
    %489 = tpu.dynamic_rotate %2 by %c239_i32_65 dim 1 : vector<1x256xf32>, i32 -> vector<1x256xf32>
    %c32 = arith.constant 32 : index
    %490 = memref.load %arg1[%c32] : memref<98xf32, #tpu.memory_space<smem>>
    %c81 = arith.constant 81 : index
    %491 = memref.load %arg1[%c81] : memref<98xf32, #tpu.memory_space<smem>>
    %492 = arith.mulf %41, %90 : vector<1x256xf32>
    %493 = vector.broadcast %490 : f32 to vector<1x256xf32>
    %494 = arith.mulf %493, %488 : vector<1x256xf32>
    %495 = vector.broadcast %491 : f32 to vector<1x256xf32>
    %496 = arith.mulf %495, %489 : vector<1x256xf32>
    %497 = arith.addf %494, %496 : vector<1x256xf32>
    %498 = arith.mulf %492, %497 : vector<1x256xf32>
    %499 = arith.addf %487, %498 : vector<1x256xf32>
    %c238_i32 = arith.constant 238 : i32
    %500 = tpu.dynamic_rotate %4 by %c238_i32 dim 1 : vector<1x256xf32>, i32 -> vector<1x256xf32>
    %c238_i32_66 = arith.constant 238 : i32
    %501 = tpu.dynamic_rotate %2 by %c238_i32_66 dim 1 : vector<1x256xf32>, i32 -> vector<1x256xf32>
    %c33 = arith.constant 33 : index
    %502 = memref.load %arg1[%c33] : memref<98xf32, #tpu.memory_space<smem>>
    %c82 = arith.constant 82 : index
    %503 = memref.load %arg1[%c82] : memref<98xf32, #tpu.memory_space<smem>>
    %504 = arith.mulf %41, %97 : vector<1x256xf32>
    %505 = vector.broadcast %502 : f32 to vector<1x256xf32>
    %506 = arith.mulf %505, %500 : vector<1x256xf32>
    %507 = vector.broadcast %503 : f32 to vector<1x256xf32>
    %508 = arith.mulf %507, %501 : vector<1x256xf32>
    %509 = arith.addf %506, %508 : vector<1x256xf32>
    %510 = arith.mulf %504, %509 : vector<1x256xf32>
    %511 = arith.addf %499, %510 : vector<1x256xf32>
    %c237_i32 = arith.constant 237 : i32
    %512 = tpu.dynamic_rotate %4 by %c237_i32 dim 1 : vector<1x256xf32>, i32 -> vector<1x256xf32>
    %c237_i32_67 = arith.constant 237 : i32
    %513 = tpu.dynamic_rotate %2 by %c237_i32_67 dim 1 : vector<1x256xf32>, i32 -> vector<1x256xf32>
    %c34 = arith.constant 34 : index
    %514 = memref.load %arg1[%c34] : memref<98xf32, #tpu.memory_space<smem>>
    %c83 = arith.constant 83 : index
    %515 = memref.load %arg1[%c83] : memref<98xf32, #tpu.memory_space<smem>>
    %516 = arith.mulf %41, %104 : vector<1x256xf32>
    %517 = vector.broadcast %514 : f32 to vector<1x256xf32>
    %518 = arith.mulf %517, %512 : vector<1x256xf32>
    %519 = vector.broadcast %515 : f32 to vector<1x256xf32>
    %520 = arith.mulf %519, %513 : vector<1x256xf32>
    %521 = arith.addf %518, %520 : vector<1x256xf32>
    %522 = arith.mulf %516, %521 : vector<1x256xf32>
    %523 = arith.addf %511, %522 : vector<1x256xf32>
    %c227_i32 = arith.constant 227 : i32
    %524 = tpu.dynamic_rotate %4 by %c227_i32 dim 1 : vector<1x256xf32>, i32 -> vector<1x256xf32>
    %c227_i32_68 = arith.constant 227 : i32
    %525 = tpu.dynamic_rotate %2 by %c227_i32_68 dim 1 : vector<1x256xf32>, i32 -> vector<1x256xf32>
    %c35 = arith.constant 35 : index
    %526 = memref.load %arg1[%c35] : memref<98xf32, #tpu.memory_space<smem>>
    %c84 = arith.constant 84 : index
    %527 = memref.load %arg1[%c84] : memref<98xf32, #tpu.memory_space<smem>>
    %528 = arith.mulf %48, %62 : vector<1x256xf32>
    %529 = vector.broadcast %526 : f32 to vector<1x256xf32>
    %530 = arith.mulf %529, %524 : vector<1x256xf32>
    %531 = vector.broadcast %527 : f32 to vector<1x256xf32>
    %532 = arith.mulf %531, %525 : vector<1x256xf32>
    %533 = arith.addf %530, %532 : vector<1x256xf32>
    %534 = arith.mulf %528, %533 : vector<1x256xf32>
    %535 = arith.addf %523, %534 : vector<1x256xf32>
    %c226_i32 = arith.constant 226 : i32
    %536 = tpu.dynamic_rotate %4 by %c226_i32 dim 1 : vector<1x256xf32>, i32 -> vector<1x256xf32>
    %c226_i32_69 = arith.constant 226 : i32
    %537 = tpu.dynamic_rotate %2 by %c226_i32_69 dim 1 : vector<1x256xf32>, i32 -> vector<1x256xf32>
    %c36 = arith.constant 36 : index
    %538 = memref.load %arg1[%c36] : memref<98xf32, #tpu.memory_space<smem>>
    %c85 = arith.constant 85 : index
    %539 = memref.load %arg1[%c85] : memref<98xf32, #tpu.memory_space<smem>>
    %540 = arith.mulf %48, %69 : vector<1x256xf32>
    %541 = vector.broadcast %538 : f32 to vector<1x256xf32>
    %542 = arith.mulf %541, %536 : vector<1x256xf32>
    %543 = vector.broadcast %539 : f32 to vector<1x256xf32>
    %544 = arith.mulf %543, %537 : vector<1x256xf32>
    %545 = arith.addf %542, %544 : vector<1x256xf32>
    %546 = arith.mulf %540, %545 : vector<1x256xf32>
    %547 = arith.addf %535, %546 : vector<1x256xf32>
    %c225_i32 = arith.constant 225 : i32
    %548 = tpu.dynamic_rotate %4 by %c225_i32 dim 1 : vector<1x256xf32>, i32 -> vector<1x256xf32>
    %c225_i32_70 = arith.constant 225 : i32
    %549 = tpu.dynamic_rotate %2 by %c225_i32_70 dim 1 : vector<1x256xf32>, i32 -> vector<1x256xf32>
    %c37 = arith.constant 37 : index
    %550 = memref.load %arg1[%c37] : memref<98xf32, #tpu.memory_space<smem>>
    %c86 = arith.constant 86 : index
    %551 = memref.load %arg1[%c86] : memref<98xf32, #tpu.memory_space<smem>>
    %552 = arith.mulf %48, %76 : vector<1x256xf32>
    %553 = vector.broadcast %550 : f32 to vector<1x256xf32>
    %554 = arith.mulf %553, %548 : vector<1x256xf32>
    %555 = vector.broadcast %551 : f32 to vector<1x256xf32>
    %556 = arith.mulf %555, %549 : vector<1x256xf32>
    %557 = arith.addf %554, %556 : vector<1x256xf32>
    %558 = arith.mulf %552, %557 : vector<1x256xf32>
    %559 = arith.addf %547, %558 : vector<1x256xf32>
    %c224_i32 = arith.constant 224 : i32
    %560 = tpu.dynamic_rotate %4 by %c224_i32 dim 1 : vector<1x256xf32>, i32 -> vector<1x256xf32>
    %c224_i32_71 = arith.constant 224 : i32
    %561 = tpu.dynamic_rotate %2 by %c224_i32_71 dim 1 : vector<1x256xf32>, i32 -> vector<1x256xf32>
    %c38 = arith.constant 38 : index
    %562 = memref.load %arg1[%c38] : memref<98xf32, #tpu.memory_space<smem>>
    %c87 = arith.constant 87 : index
    %563 = memref.load %arg1[%c87] : memref<98xf32, #tpu.memory_space<smem>>
    %564 = arith.mulf %48, %83 : vector<1x256xf32>
    %565 = vector.broadcast %562 : f32 to vector<1x256xf32>
    %566 = arith.mulf %565, %560 : vector<1x256xf32>
    %567 = vector.broadcast %563 : f32 to vector<1x256xf32>
    %568 = arith.mulf %567, %561 : vector<1x256xf32>
    %569 = arith.addf %566, %568 : vector<1x256xf32>
    %570 = arith.mulf %564, %569 : vector<1x256xf32>
    %571 = arith.addf %559, %570 : vector<1x256xf32>
    %c223_i32 = arith.constant 223 : i32
    %572 = tpu.dynamic_rotate %4 by %c223_i32 dim 1 : vector<1x256xf32>, i32 -> vector<1x256xf32>
    %c223_i32_72 = arith.constant 223 : i32
    %573 = tpu.dynamic_rotate %2 by %c223_i32_72 dim 1 : vector<1x256xf32>, i32 -> vector<1x256xf32>
    %c39 = arith.constant 39 : index
    %574 = memref.load %arg1[%c39] : memref<98xf32, #tpu.memory_space<smem>>
    %c88 = arith.constant 88 : index
    %575 = memref.load %arg1[%c88] : memref<98xf32, #tpu.memory_space<smem>>
    %576 = arith.mulf %48, %90 : vector<1x256xf32>
    %577 = vector.broadcast %574 : f32 to vector<1x256xf32>
    %578 = arith.mulf %577, %572 : vector<1x256xf32>
    %579 = vector.broadcast %575 : f32 to vector<1x256xf32>
    %580 = arith.mulf %579, %573 : vector<1x256xf32>
    %581 = arith.addf %578, %580 : vector<1x256xf32>
    %582 = arith.mulf %576, %581 : vector<1x256xf32>
    %583 = arith.addf %571, %582 : vector<1x256xf32>
    %c222_i32 = arith.constant 222 : i32
    %584 = tpu.dynamic_rotate %4 by %c222_i32 dim 1 : vector<1x256xf32>, i32 -> vector<1x256xf32>
    %c222_i32_73 = arith.constant 222 : i32
    %585 = tpu.dynamic_rotate %2 by %c222_i32_73 dim 1 : vector<1x256xf32>, i32 -> vector<1x256xf32>
    %c40 = arith.constant 40 : index
    %586 = memref.load %arg1[%c40] : memref<98xf32, #tpu.memory_space<smem>>
    %c89 = arith.constant 89 : index
    %587 = memref.load %arg1[%c89] : memref<98xf32, #tpu.memory_space<smem>>
    %588 = arith.mulf %48, %97 : vector<1x256xf32>
    %589 = vector.broadcast %586 : f32 to vector<1x256xf32>
    %590 = arith.mulf %589, %584 : vector<1x256xf32>
    %591 = vector.broadcast %587 : f32 to vector<1x256xf32>
    %592 = arith.mulf %591, %585 : vector<1x256xf32>
    %593 = arith.addf %590, %592 : vector<1x256xf32>
    %594 = arith.mulf %588, %593 : vector<1x256xf32>
    %595 = arith.addf %583, %594 : vector<1x256xf32>
    %c221_i32 = arith.constant 221 : i32
    %596 = tpu.dynamic_rotate %4 by %c221_i32 dim 1 : vector<1x256xf32>, i32 -> vector<1x256xf32>
    %c221_i32_74 = arith.constant 221 : i32
    %597 = tpu.dynamic_rotate %2 by %c221_i32_74 dim 1 : vector<1x256xf32>, i32 -> vector<1x256xf32>
    %c41 = arith.constant 41 : index
    %598 = memref.load %arg1[%c41] : memref<98xf32, #tpu.memory_space<smem>>
    %c90 = arith.constant 90 : index
    %599 = memref.load %arg1[%c90] : memref<98xf32, #tpu.memory_space<smem>>
    %600 = arith.mulf %48, %104 : vector<1x256xf32>
    %601 = vector.broadcast %598 : f32 to vector<1x256xf32>
    %602 = arith.mulf %601, %596 : vector<1x256xf32>
    %603 = vector.broadcast %599 : f32 to vector<1x256xf32>
    %604 = arith.mulf %603, %597 : vector<1x256xf32>
    %605 = arith.addf %602, %604 : vector<1x256xf32>
    %606 = arith.mulf %600, %605 : vector<1x256xf32>
    %607 = arith.addf %595, %606 : vector<1x256xf32>
    %c211_i32 = arith.constant 211 : i32
    %608 = tpu.dynamic_rotate %4 by %c211_i32 dim 1 : vector<1x256xf32>, i32 -> vector<1x256xf32>
    %c211_i32_75 = arith.constant 211 : i32
    %609 = tpu.dynamic_rotate %2 by %c211_i32_75 dim 1 : vector<1x256xf32>, i32 -> vector<1x256xf32>
    %c42 = arith.constant 42 : index
    %610 = memref.load %arg1[%c42] : memref<98xf32, #tpu.memory_space<smem>>
    %c91 = arith.constant 91 : index
    %611 = memref.load %arg1[%c91] : memref<98xf32, #tpu.memory_space<smem>>
    %612 = arith.mulf %55, %62 : vector<1x256xf32>
    %613 = vector.broadcast %610 : f32 to vector<1x256xf32>
    %614 = arith.mulf %613, %608 : vector<1x256xf32>
    %615 = vector.broadcast %611 : f32 to vector<1x256xf32>
    %616 = arith.mulf %615, %609 : vector<1x256xf32>
    %617 = arith.addf %614, %616 : vector<1x256xf32>
    %618 = arith.mulf %612, %617 : vector<1x256xf32>
    %619 = arith.addf %607, %618 : vector<1x256xf32>
    %c210_i32 = arith.constant 210 : i32
    %620 = tpu.dynamic_rotate %4 by %c210_i32 dim 1 : vector<1x256xf32>, i32 -> vector<1x256xf32>
    %c210_i32_76 = arith.constant 210 : i32
    %621 = tpu.dynamic_rotate %2 by %c210_i32_76 dim 1 : vector<1x256xf32>, i32 -> vector<1x256xf32>
    %c43 = arith.constant 43 : index
    %622 = memref.load %arg1[%c43] : memref<98xf32, #tpu.memory_space<smem>>
    %c92 = arith.constant 92 : index
    %623 = memref.load %arg1[%c92] : memref<98xf32, #tpu.memory_space<smem>>
    %624 = arith.mulf %55, %69 : vector<1x256xf32>
    %625 = vector.broadcast %622 : f32 to vector<1x256xf32>
    %626 = arith.mulf %625, %620 : vector<1x256xf32>
    %627 = vector.broadcast %623 : f32 to vector<1x256xf32>
    %628 = arith.mulf %627, %621 : vector<1x256xf32>
    %629 = arith.addf %626, %628 : vector<1x256xf32>
    %630 = arith.mulf %624, %629 : vector<1x256xf32>
    %631 = arith.addf %619, %630 : vector<1x256xf32>
    %c209_i32 = arith.constant 209 : i32
    %632 = tpu.dynamic_rotate %4 by %c209_i32 dim 1 : vector<1x256xf32>, i32 -> vector<1x256xf32>
    %c209_i32_77 = arith.constant 209 : i32
    %633 = tpu.dynamic_rotate %2 by %c209_i32_77 dim 1 : vector<1x256xf32>, i32 -> vector<1x256xf32>
    %c44 = arith.constant 44 : index
    %634 = memref.load %arg1[%c44] : memref<98xf32, #tpu.memory_space<smem>>
    %c93 = arith.constant 93 : index
    %635 = memref.load %arg1[%c93] : memref<98xf32, #tpu.memory_space<smem>>
    %636 = arith.mulf %55, %76 : vector<1x256xf32>
    %637 = vector.broadcast %634 : f32 to vector<1x256xf32>
    %638 = arith.mulf %637, %632 : vector<1x256xf32>
    %639 = vector.broadcast %635 : f32 to vector<1x256xf32>
    %640 = arith.mulf %639, %633 : vector<1x256xf32>
    %641 = arith.addf %638, %640 : vector<1x256xf32>
    %642 = arith.mulf %636, %641 : vector<1x256xf32>
    %643 = arith.addf %631, %642 : vector<1x256xf32>
    %c208_i32 = arith.constant 208 : i32
    %644 = tpu.dynamic_rotate %4 by %c208_i32 dim 1 : vector<1x256xf32>, i32 -> vector<1x256xf32>
    %c208_i32_78 = arith.constant 208 : i32
    %645 = tpu.dynamic_rotate %2 by %c208_i32_78 dim 1 : vector<1x256xf32>, i32 -> vector<1x256xf32>
    %c45 = arith.constant 45 : index
    %646 = memref.load %arg1[%c45] : memref<98xf32, #tpu.memory_space<smem>>
    %c94 = arith.constant 94 : index
    %647 = memref.load %arg1[%c94] : memref<98xf32, #tpu.memory_space<smem>>
    %648 = arith.mulf %55, %83 : vector<1x256xf32>
    %649 = vector.broadcast %646 : f32 to vector<1x256xf32>
    %650 = arith.mulf %649, %644 : vector<1x256xf32>
    %651 = vector.broadcast %647 : f32 to vector<1x256xf32>
    %652 = arith.mulf %651, %645 : vector<1x256xf32>
    %653 = arith.addf %650, %652 : vector<1x256xf32>
    %654 = arith.mulf %648, %653 : vector<1x256xf32>
    %655 = arith.addf %643, %654 : vector<1x256xf32>
    %c207_i32 = arith.constant 207 : i32
    %656 = tpu.dynamic_rotate %4 by %c207_i32 dim 1 : vector<1x256xf32>, i32 -> vector<1x256xf32>
    %c207_i32_79 = arith.constant 207 : i32
    %657 = tpu.dynamic_rotate %2 by %c207_i32_79 dim 1 : vector<1x256xf32>, i32 -> vector<1x256xf32>
    %c46 = arith.constant 46 : index
    %658 = memref.load %arg1[%c46] : memref<98xf32, #tpu.memory_space<smem>>
    %c95 = arith.constant 95 : index
    %659 = memref.load %arg1[%c95] : memref<98xf32, #tpu.memory_space<smem>>
    %660 = arith.mulf %55, %90 : vector<1x256xf32>
    %661 = vector.broadcast %658 : f32 to vector<1x256xf32>
    %662 = arith.mulf %661, %656 : vector<1x256xf32>
    %663 = vector.broadcast %659 : f32 to vector<1x256xf32>
    %664 = arith.mulf %663, %657 : vector<1x256xf32>
    %665 = arith.addf %662, %664 : vector<1x256xf32>
    %666 = arith.mulf %660, %665 : vector<1x256xf32>
    %667 = arith.addf %655, %666 : vector<1x256xf32>
    %c206_i32 = arith.constant 206 : i32
    %668 = tpu.dynamic_rotate %4 by %c206_i32 dim 1 : vector<1x256xf32>, i32 -> vector<1x256xf32>
    %c206_i32_80 = arith.constant 206 : i32
    %669 = tpu.dynamic_rotate %2 by %c206_i32_80 dim 1 : vector<1x256xf32>, i32 -> vector<1x256xf32>
    %c47 = arith.constant 47 : index
    %670 = memref.load %arg1[%c47] : memref<98xf32, #tpu.memory_space<smem>>
    %c96 = arith.constant 96 : index
    %671 = memref.load %arg1[%c96] : memref<98xf32, #tpu.memory_space<smem>>
    %672 = arith.mulf %55, %97 : vector<1x256xf32>
    %673 = vector.broadcast %670 : f32 to vector<1x256xf32>
    %674 = arith.mulf %673, %668 : vector<1x256xf32>
    %675 = vector.broadcast %671 : f32 to vector<1x256xf32>
    %676 = arith.mulf %675, %669 : vector<1x256xf32>
    %677 = arith.addf %674, %676 : vector<1x256xf32>
    %678 = arith.mulf %672, %677 : vector<1x256xf32>
    %679 = arith.addf %667, %678 : vector<1x256xf32>
    %c205_i32 = arith.constant 205 : i32
    %680 = tpu.dynamic_rotate %4 by %c205_i32 dim 1 : vector<1x256xf32>, i32 -> vector<1x256xf32>
    %c205_i32_81 = arith.constant 205 : i32
    %681 = tpu.dynamic_rotate %2 by %c205_i32_81 dim 1 : vector<1x256xf32>, i32 -> vector<1x256xf32>
    %c48 = arith.constant 48 : index
    %682 = memref.load %arg1[%c48] : memref<98xf32, #tpu.memory_space<smem>>
    %c97 = arith.constant 97 : index
    %683 = memref.load %arg1[%c97] : memref<98xf32, #tpu.memory_space<smem>>
    %684 = arith.mulf %55, %104 : vector<1x256xf32>
    %685 = vector.broadcast %682 : f32 to vector<1x256xf32>
    %686 = arith.mulf %685, %680 : vector<1x256xf32>
    %687 = vector.broadcast %683 : f32 to vector<1x256xf32>
    %688 = arith.mulf %687, %681 : vector<1x256xf32>
    %689 = arith.addf %686, %688 : vector<1x256xf32>
    %690 = arith.mulf %684, %689 : vector<1x256xf32>
    %691 = arith.addf %679, %690 : vector<1x256xf32>
    %692 = arith.negf %691 : vector<1x256xf32>
    %693 = math.exp %692 : vector<1x256xf32>
    %cst_82 = arith.constant 1.000000e+00 : f32
    %694 = vector.broadcast %cst_82 : f32 to vector<1x256xf32>
    %695 = arith.addf %694, %693 : vector<1x256xf32>
    %696 = arith.divf %694, %695 : vector<1x256xf32>
    %697 = vector.shape_cast %696 : vector<1x256xf32> to vector<1x1x256xf32>
    %698 = vector.shape_cast %697 : vector<1x1x256xf32> to vector<1x1x256xf32>
    %699 = vector.broadcast %698 : vector<1x1x256xf32> to vector<1x4x256xf32>
    %c0_83 = arith.constant 0 : index
    %c0_84 = arith.constant 0 : index
    %c0_85 = arith.constant 0 : index
    %700 = vector.load %arg3[%c0_83, %c0_84, %c0_85] : memref<1x4x256xf32, #tpu.memory_space<vmem>>, vector<1x4x256xf32>
    %701 = arith.mulf %700, %699 : vector<1x4x256xf32>
    %c0_86 = arith.constant 0 : index
    %c0_87 = arith.constant 0 : index
    %c0_88 = arith.constant 0 : index
    %702 = vector.load %arg4[%c0_86, %c0_87, %c0_88] : memref<1x4x256xf32, #tpu.memory_space<vmem>>, vector<1x4x256xf32>
    tpu.vector_store %arg4[%c0_86, %c0_87, %c0_88], %701 {strides = array<i32>} : memref<1x4x256xf32, #tpu.memory_space<vmem>>, vector<1x4x256xf32>,
    return
  }
  func.func @transform_0(%arg0: i32) -> i32 {
    %c0_i32 = arith.constant 0 : i32
    %c0_i32_0 = arith.constant 0 : i32
    return %c0_i32 : i32
  }
  func.func @transform_1(%arg0: i32) -> (i32, i32) {
    %c0_i32 = arith.constant 0 : i32
    %c0_i32_0 = arith.constant 0 : i32
    %c0_i32_1 = arith.constant 0 : i32
    return %c0_i32, %c0_i32_0 : i32, i32
  }
  func.func @transform_2(%arg0: i32) -> (i32, i32, i32) {
    %c0_i32 = arith.constant 0 : i32
    %c0_i32_0 = arith.constant 0 : i32
    %c0_i32_1 = arith.constant 0 : i32
    return %arg0, %c0_i32, %c0_i32_0 : i32, i32, i32
  }
  func.func @transform_3(%arg0: i32) -> (i32, i32, i32) {
    %c0_i32 = arith.constant 0 : i32
    %c0_i32_0 = arith.constant 0 : i32
    %c0_i32_1 = arith.constant 0 : i32
    return %arg0, %c0_i32, %c0_i32_0 : i32, i32, i32
  }
}

</mosaic_0001>

<bundles_post_ra>
// kernel: tpu_custom_call.1
= control target key start
LH: loop header
LB: loop body
LE: loop exit
PB: predicated region body
PF: predicated region fallthrough
CT: control target
= control target key end

     0   :  { %8 = vsyncpa [#allocation5], 0  ;;  %s4195_s0 = inlined_call_operand.hbm [shape: f32[98], index: 0, kind: input, shape index: {}]   ;;  %s4196_s1 = inlined_call_operand.hbm [shape: s32[2,256], index: 1, kind: input, shape index: {}]   ;;  %s4197_s2 = inlined_call_operand.hbm [shape: f32[2,4,256], index: 2, kind: input, shape index: {}]   ;;  %s4198_s3 = inlined_call_operand.hbm [shape: f32[2,4,256], index: 3, kind: output, shape index: {}]  }
   0x1   :  { %9 = vsyncpa [#allocation3], 0 }
   0x2   :  { %10 = vsyncpa [#allocation8], 0 }
   0x3   :  { %12 = vsyncpa [#allocation8 + $0x1], 0 }
   0x4   :  { %13 = vsyncpa [#allocation4], 0 }
   0x5   :  { %15 = vsyncpa [#allocation4 + $0x1], 0  ;;  %s2457_s12 = smov 0   ;;  %s2459_s13 = smov 0  }
   0x6   :  { %s2461_s14 = smov 0   ;;  %s2463_s15 = smov 0  }
   0x7 LB: > { %s2478_s16 = sadd.s32 4294967295, %s2384_s15   ;;  %s1981_s17 = sadd.s32 4294967294, %s2384_s15   ;;  %s2384_s15 = sphi %s2463_s15, %s4215_s15   ;;  %s2380_s14 = sphi %s2461_s14, %s4214_s14   ;;  %s2376_s13 = sphi %s2459_s13, %s4213_s13   ;;  %s2372_s12 = sphi %s2457_s12, %s4212_s12  }
   0x8   : > { %p83_p0 = scmp.ne.s32.totalorder %s2376_s13, %s2372_s12  ;;  %p84_p1 = scmp.eq.s32.totalorder %s2478_s16, 0 }
   0x9   : > { %p107_p2 = scmp.eq.s32.totalorder %s2478_s16, 1  ;;  %p113_p3 = scmp.eq.s32.totalorder %s1981_s17, 1 }
   0xa   : > { %p2487_p4 = por %p84_p1, %p83_p0  ;;  %p1982_p5 = scmp.ge.s32.totalorder %s2384_s15, 1 }
   0xb   : > { %p2492_p6 = por %p113_p3, %p83_p0  ;;  %p120_p7 = scmp.lt.s32.totalorder %s2384_s15, 3 }
   0xc   : > { %s132_s22 = sshll.u32 %s4195_s0, 4  ;;  %s142_s26 = sshll.u32 %s4196_s1, 4  ;;  %s133_s22 = int_to_ptr.hbm [resolvable:$true] %s132_s22  ;;  %s143_s26 = int_to_ptr.hbm [resolvable:$true] %s142_s26 }
   0xd   : > { %p2500_p8 = pnand %p1982_p5, %p120_p7  ;;  %s2386_s27 = smov [#allocation6]  }
   0xe   : > { %s144_s28 = sshll.u32 %s2386_s27, 4  ;;  %s2387_s29 = smov [#allocation2]   ;;  %s145_s28 = int_to_ptr.vmem [resolvable:$true] %s144_s28 }
   0xf   : > { %p2125_p10 = pneg %p2500_p8  ;;  %s2513_s30 = sadd.s32 1, %s2384_s15  }
  0x10   : > { %s70_s4 = sadd.s32 1, %s2380_s14  ;;  %s67_s5 = ssub.s32 %s2384_s15, %s2513_s30 }
  0x11   : > { %p2126_p11 = pnand %p2125_p10, %p84_p1  ;;  %p77_p12 = scmp.ne.s32.totalorder %s2380_s14, %s2376_s13 }
  0x12   : > { %p68_p13 = scmp.eq.s32.totalorder %s67_s5, 0  ;;  %p78_p0 = scmp.eq.s32.totalorder %s2384_s15, 0 }
  0x13   : > { %2128 = dma.hbm_to_smem (!%p2126_p11), %s133_s22, 16, %s2387_s29, [#allocation5]  }
  0x14   : > { %2131 = dma.hbm_to_vmem [thread:$0]  (!%p2126_p11), %s143_s26, 64, %s145_s28, [#allocation3]  }
  0x15   : > { %p2523_p3 = por %p107_p2, %p77_p12  ;;  %p2142_p5 = scmp.lt.s32.totalorder %s2384_s15, 2 }
  0x16   : > { %s2529_s7 = scalar_select %p68_p13, %s2380_s14, %s70_s4  }
  0x17   : > { %p79_p7 = por %p78_p0, %p77_p12  ;;  %s155_s8 = sand.u32 1, %s2380_s14  }
  0x18   : > { %s1986_s9 = sshll.u32 %s155_s8, 3  ;;  %s2111_s10 = sshll.u32 %s2384_s15, 3 }
  0x19   : > { %s164_s20 = scalar_lea.hbm %s4197_s2, %s2111_s10  ;;  %s159_s21 = scalar_lea.vmem [#allocation7], %s1986_s9 }
  0x1a   : > { %s168_s22 = sshll.u32 %s159_s21, 4  ;;  %s166_s24 = sshll.u32 %s164_s20, 4  ;;  %s169_s22 = int_to_ptr.vmem [resolvable:$true] %s168_s22  ;;  %s167_s24 = int_to_ptr.hbm [resolvable:$true] %s166_s24 }
  0x1b   : > { %p2536_p2 = pnand %p2142_p5, %p79_p7  ;;  %s156_s26 = scalar_lea.sflag [#allocation8], %s155_s8 }
  0x1c   : > { %s2280_s27 = sshra.s32 %s167_s24, 4  ;;  %s2287_s5 = scalar_lea.hbm %s4197_s2, 16  ;;  %s2281_s27 = int_to_ptr.hbm [resolvable:$true] %s2280_s27 }
  0x1d   : > { %s2282_s28 = scalar_lea.hbm %s2281_s27, 8  ;;  %p2284_p11 = pneg %p2536_p2 }
  0x1e   : > { %p2283_p10 = scmp.ne.s32.totalorder %s2281_s27, %s2282_s28  ;;  %p2288_p0 = scmp.lt.s32.totalorder %s2281_s27, %s4197_s2 }
  0x1f   : > { %p2289_p5 = scmp.lt.s32.totalorder %s2287_s5, %s2282_s28 }
  0x20   : > { %p2285_p12 = pnand %p2284_p11, %p2283_p10 }
  0x21   : > { %p2290_p7 = por %p2289_p5, %p2288_p0 }
  0x22   : > { %p2286_p13 = pneg %p2285_p12 }
  0x24   : > { %p2291_p9 = pnand %p2290_p7, %p2286_p13 }
  0x26   : > { %2294 = shalt.err (!%p2291_p9)
}
  0x27   : > { %2135 = dma.hbm_to_vmem [thread:$0]  (!%p2536_p2), %s167_s24, 128, %s169_s22, %s156_s26  }
  0x28   : > { %177 = sbr.rel (%p2500_p8) target bundleno = 754 (0x2f2), region = 32 }
  0x2d   : > { %2355 = dma.done.wait (%p84_p1), [#allocation5], 16  }
  0x2e   : > { %2357 = vsyncadd (%p84_p1), [#allocation5], 4294967280 }
  0x2f   : > { %2359 = dma.done.wait (%p84_p1), [#allocation3], 64  }
  0x30   : > { %2361 = vsyncadd (%p84_p1), [#allocation3], 4294967232  ;;  %s2561_s8 = sand.u32 1, %s2376_s13  }
  0x31   : > { %s1992_s23 = sshll.u32 %s2561_s8, 3  ;;  %s190_s11 = scalar_lea.sflag [#allocation8], %s2561_s8 }
  0x32   : > { %s193_s17 = scalar_lea.vmem [#allocation7], %s1992_s23 }
  0x33   : > { %2363 = dma.done.wait (%p2487_p4), %s190_s11, 128  }
  0x34   : > { %2365 = vsyncadd (%p2487_p4), %s190_s11, 4294967168 }
  0x35   : > { %199 = sfence }
  0x36   : > { %v2571_v0 = vld [vmem:[%s193_s17] sm:$0xff]  ;;  %vm225_vm0 = vcmask 1043456   ;;  %s2388_s18 = smov 51   ;;  %s2389_s20 = smov 50   ;;  %vm363_vm15 = vcmask 1040384  }
  0x37   : > { %4207 = vst [vmem:[#allocation14_spill] sm:$0xff] %v2571_v0  ;;  %s2390_s21 = smov 49   ;;  %s2391_s22 = smov 48  }
  0x38   : > { %220 = vst [vmem:[#allocation1] ss:$2 sm:$0xff] %v2571_v0  ;;  %s2392_s24 = smov 47   ;;  %s2393_s25 = smov 46  }
  0x39   : > { %s2394_s26 = smov 45   ;;  %s2395_s27 = smov 35  }
  0x3a   : > { %s2396_s28 = smov 34   ;;  %s2397_s29 = smov 33  }
  0x3b   : > { %s2398_s4 = smov 32   ;;  %s2399_s5 = smov 31  }
  0x3c   : > { %s2400_s9 = smov 30   ;;  %s2401_s10 = smov 29  }
  0x3d   : > { %s2402_s11 = smov 19   ;;  %s2403_s17 = smov 18  }
  0x3f   : > { %v221_v1 = vld.sshfl [vmem:[#allocation1] sm:$0xff pattern:$0x75316420]  ;;  %v222_v2 = vld.sshfl [vmem:[#allocation1 + $0x8] sm:$0xff pattern:$0x75316420] }
  0x40   : > { %v226_v3 = vsel %vm225_vm0, %v221_v1, 0.0  ;;  %240 = vst [vmem:[#allocation1] ss:$2 sm:$0xff] %v2571_v0  ;;  %v233_v4 = vsel %vm225_vm0, %v222_v2, 0.0  ;;  %v338_v1 = vlaneseq }
  0x41   : > { %v227_v5 = vrot.slane %v226_v3, 4  ;;  %v234_v6 = vrot.slane %v233_v4, 4  ;;  %v2714_v2 = vld [vmem:[#allocation6] ss:$2 sm:$0x3] }
  0x42   : > { %vm264_vm1 = vcmp.ge.s32.totalorder %v2714_v2, 3  ;;  %vm265_vm2 = vcmp.lt.s32.totalorder %v2714_v2, 19 }
  0x43   : > { %v228_v7 = vadd.f32 %v227_v5, %v226_v3  ;;  %v235_v8 = vadd.f32 %v234_v6, %v233_v4  ;;  %v2716_v3 = vld [vmem:[#allocation6 + $0x1] ss:$2 sm:$0x3]  ;;  %v2731_v5 = vand.u32 127, %v338_v1  ;;  %vm266_vm5 = vmand %vm264_vm1, %vm265_vm2 }
  0x44   : > { %vm299_vm3 = vcmp.ge.s32.totalorder %v2716_v3, 3  ;;  %vm300_vm4 = vcmp.lt.s32.totalorder %v2716_v3, 19  ;;  %vm304_vm7 = vcmp.ge.s32.totalorder %v2716_v3, 2  ;;  %vm305_vm8 = vcmp.lt.s32.totalorder %v2716_v3, 18 }
  0x45   : > { %v229_v9 = vrot.slane %v228_v7, 2  ;;  %v236_v10 = vrot.slane %v235_v8, 2  ;;  %vm301_vm6 = vmand %vm299_vm3, %vm300_vm4  ;;  %vm372_vm9 = vcmp.lt.s32.totalorder %v2731_v5, 50  ;;  %vm340_vm10 = vcmp.lt.s32.totalorder %v2731_v5, 51 }
  0x46   : > { %vm309_vm11 = vcmp.ge.s32.totalorder %v2716_v3, 1  ;;  %vm310_vm12 = vcmp.lt.s32.totalorder %v2716_v3, 17  ;;  %vm306_vm13 = vmand %vm304_vm7, %vm305_vm8  ;;  %vm403_vm1 = vcmp.lt.s32.totalorder %v2731_v5, 49  ;;  %vm434_vm2 = vcmp.lt.s32.totalorder %v2731_v5, 48 }
  0x47   : > { %v230_v11 = vadd.f32 %v229_v9, %v228_v7  ;;  %v241_v12 = vld.sshfl [vmem:[#allocation1] sm:$0xff pattern:$0x75316420]  ;;  %v237_v13 = vadd.f32 %v236_v10, %v235_v8  ;;  %v242_v14 = vld.sshfl [vmem:[#allocation1 + $0x8] sm:$0xff pattern:$0x75316420]  ;;  %vm311_vm14 = vmand %vm309_vm11, %vm310_vm12 }
  0x48   : > { %v245_v15 = vsel %vm225_vm0, %v241_v12, -inf  ;;  %v252_v16 = vsel %vm225_vm0, %v242_v14, -inf  ;;  %v4199_v8 = vmov 0.0   ;;  %vm314_vm3 = vcmp.ge.s32.totalorder %v2716_v3, 0 }
  0x49   : > { %v231_v17 = vrot.slane %v230_v11, 1  ;;  %v246_v18 = vrot.slane %v245_v15, 4  ;;  %v253_v19 = vrot.slane %v252_v16, 4  ;;  %v238_v22 = vrot.slane %v237_v13, 1 }
  0x4a   : > { %v2756_v9 = vsel %vm266_vm5, 1.0, %v4199_v8  ;;  %v2759_v10 = vsel %vm301_vm6, 1.0, %v4199_v8  ;;  %vm315_vm4 = vcmp.lt.s32.totalorder %v2716_v3, 16  ;;  %vm319_vm5 = vcmp.ge.s32.totalorder %v2716_v3, 4294967295 }
  0x4b   : > { %v232_v20 = vadd.f32 %v231_v17, %v230_v11  ;;  %v247_v21 = vmax.f32 %v245_v15, %v246_v18  ;;  %v254_v23 = vmax.f32 %v252_v16, %v253_v19  ;;  %v239_v28 = vadd.f32 %v238_v22, %v237_v13  ;;  %vm316_vm8 = vmand %vm314_vm3, %vm315_vm4 }
  0x4c   : > { %v2796_v19 = vmul.f32 %v2759_v10, %v2756_v9  ;;  %vm320_vm6 = vcmp.lt.s32.totalorder %v2716_v3, 15  ;;  %vm465_vm7 = vcmp.lt.s32.totalorder %v2731_v5, 47  ;;  %vm325_vm11 = vcmp.lt.s32.totalorder %v2716_v3, 14 }
  0x4d   : > { %v2579_v24 = vmul.f32 0.25, %v232_v20  ;;  %v248_v25 = vrot.slane %v247_v21, 2  ;;  %v255_v26 = vrot.slane %v254_v23, 2  ;;  %v2585_v32 = vmul.f32 0.25, %v239_v28 }
  0x4e   : > { %vm496_vm12 = vcmp.lt.s32.totalorder %v2731_v5, 46  ;;  %vm270_vm3 = vcmp.lt.s32.totalorder %v2714_v2, 18 }
  0x4f   : > { %334 = vrot.lane.b32.xlu0 %v2579_v24, %s2388_s18  ;;  %v249_v27 = vmax.f32 %v247_v21, %v248_v25  ;;  %368 = vrot.lane.b32.xlu2 %v2579_v24, %s2389_s20  ;;  %v256_v30 = vmax.f32 %v254_v23, %v255_v26  ;;  %v2799_v21 = vsel %vm306_vm13, 1.0, %v4199_v8 }
  0x51   : > { %v250_v29 = vrot.slane %v249_v27, 1  ;;  %v257_v33 = vrot.slane %v256_v30, 1 }
  0x53   : > { %v2583_v31 = vmax.f32 %v249_v27, %v250_v29  ;;  %v2590_v34 = vmax.f32 %v256_v30, %v257_v33  ;;  %v2812_v29 = vsel %vm311_vm14, 1.0, %v4199_v8  ;;  %vm329_vm14 = vcmp.ge.s32.totalorder %v2716_v3, 4294967293 }
  0x55   : > { %343 = vrot.lane.b32.xlu1 %v2583_v31, %s2388_s18 }
  0x57   : > { %336 = vrot.lane.b32.xlu0 %v2585_v32, %s2388_s18  ;;  %370 = vrot.lane.b32.xlu2 %v2585_v32, %s2389_s20 }
  0x5d   : > { %345 = vrot.lane.b32.xlu1 %v2590_v34, %s2388_s18  ;;  %s2404_s18 = smov 17  }
  0x5f   : > { %401 = vrot.lane.b32.xlu0 %v2585_v32, %s2390_s21  ;;  %399 = vrot.lane.b32.xlu2 %v2579_v24, %s2390_s21 }
  0x65   : > { %377 = vrot.lane.b32.xlu1 %v2590_v34, %s2389_s20 }
  0x67   : > { %375 = vrot.lane.b32.xlu0 %v2583_v31, %s2389_s20  ;;  %408 = vrot.lane.b32.xlu2 %v2590_v34, %s2390_s21  ;;  %s2405_s20 = smov 16  }
  0x6d   : > { %406 = vrot.lane.b32.xlu1 %v2583_v31, %s2390_s21  ;;  %s2719_s21 = sld [smem:[#allocation2 + $0x31]] }
  0x6f   : > { %430 = vrot.lane.b32.xlu0 %v2579_v24, %s2391_s22  ;;  %437 = vrot.lane.b32.xlu2 %v2583_v31, %s2391_s22 }
  0x73   : > { %v355_v11 = vstv %s2719_s21  ;;  %s2971_s21 = sld [smem:[#allocation2 + $0x37]] }
  0x75   : > { %432 = vrot.lane.b32.xlu1 %v2585_v32, %s2391_s22 }
  0x77   : > { %439 = vrot.lane.b32.xlu0 %v2590_v34, %s2391_s22  ;;  %463 = vrot.lane.b32.xlu2 %v2585_v32, %s2392_s24  ;;  %s2721_s22 = sld [smem:[#allocation2 + $0x1]] }
  0x7d   : > { %461 = vrot.lane.b32.xlu1 %v2579_v24, %s2392_s24  ;;  %v384_v13 = vstv %s2721_s22  ;;  %s2978_s22 = sld [smem:[#allocation2 + $0x38]] }
  0x7f   : > { %468 = vrot.lane.b32.xlu0 %v2583_v31, %s2392_s24  ;;  %492 = vrot.lane.b32.xlu2 %v2579_v24, %s2393_s25 }
  0x85   : > { %470 = vrot.lane.b32.xlu1 %v2590_v34, %s2392_s24  ;;  %s2733_s24 = sld [smem:[#allocation2]] }
  0x87   : > { %494 = vrot.lane.b32.xlu0 %v2585_v32, %s2393_s25  ;;  %501 = vrot.lane.b32.xlu2 %v2590_v34, %s2393_s25 }
  0x8b   : > { %v352_v16 = vstv %s2733_s24  ;;  %s2980_s24 = sld [smem:[#allocation2 + $0x7]] }
  0x8d   : > { %499 = vrot.lane.b32.xlu1 %v2583_v31, %s2393_s25  ;;  %s2741_s25 = sld [smem:[#allocation2 + $0x32]] }
  0x8f   : > { %523 = vrot.lane.b32.xlu0 %v2579_v24, %s2394_s26  ;;  %530 = vrot.lane.b32.xlu2 %v2583_v31, %s2394_s26 }
  0x93   : > { %v387_v26 = vstv %s2741_s25  ;;  %s3001_s25 = sld [smem:[#allocation2 + $0x8]] }
  0x95   : > { %525 = vrot.lane.b32.xlu1 %v2585_v32, %s2394_s26 }
  0x97   : > { %532 = vrot.lane.b32.xlu0 %v2590_v34, %s2394_s26  ;;  %556 = vrot.lane.b32.xlu2 %v2585_v32, %s2395_s27  ;;  %s2745_s26 = sld [smem:[#allocation2 + $0x33]] }
  0x9d   : > { %554 = vrot.lane.b32.xlu1 %v2579_v24, %s2395_s27  ;;  %v418_v30 = vstv %s2745_s26  ;;  %s3020_s26 = sld [smem:[#allocation2 + $0x39]] }
  0x9f   : > { %561 = vrot.lane.b32.xlu0 %v2583_v31, %s2395_s27  ;;  %585 = vrot.lane.b32.xlu2 %v2579_v24, %s2396_s28 }
  0xa5   : > { %563 = vrot.lane.b32.xlu1 %v2590_v34, %s2395_s27  ;;  %s2748_s27 = sld [smem:[#allocation2 + $0x2]] }
  0xa7   : > { %587 = vrot.lane.b32.xlu0 %v2585_v32, %s2396_s28  ;;  %594 = vrot.lane.b32.xlu2 %v2590_v34, %s2396_s28 }
  0xa9   : > { %v2622_v35 = vpop.permute.xlu2 %368 }
  0xab   : > { %v415_v1 = vstv %s2748_s27  ;;  %s3036_s27 = sld [smem:[#allocation2 + $0x9]] }
  0xad   : > { %592 = vrot.lane.b32.xlu1 %v2583_v31, %s2396_s28  ;;  %s2771_s28 = sld [smem:[#allocation2 + $0x3]] }
  0xaf   : > { %616 = vrot.lane.b32.xlu0 %v2579_v24, %s2397_s29  ;;  %623 = vrot.lane.b32.xlu2 %v2583_v31, %s2397_s29 }
  0xb1   : > { %v2627_v36 = vpop.permute.xlu2 %370 }
  0xb2   : > { %v374_v14 = vsel %vm372_vm9, %v2627_v36, %v2622_v35  ;;  %v373_v18 = vsel %vm372_vm9, %v2622_v35, %v2627_v36 }
  0xb3   : > { %v385_v25 = vmul.f32 %v384_v13, %v374_v14  ;;  %v386_v35 = vmul.f32 %v384_v13, %v373_v18 }
  0xb5   : > { %618 = vrot.lane.b32.xlu1 %v2585_v32, %s2397_s29 }
  0xb7   : > { %625 = vrot.lane.b32.xlu0 %v2590_v34, %s2397_s29  ;;  %649 = vrot.lane.b32.xlu2 %v2585_v32, %s2398_s4  ;;  %s2407_s29 = smov 15  }
  0xb9   : > { %v2632_v37 = vpop.permute.xlu2 %399 }
  0xbd   : > { %647 = vrot.lane.b32.xlu1 %v2579_v24, %s2398_s4 }
  0xbf   : > { %654 = vrot.lane.b32.xlu0 %v2583_v31, %s2398_s4  ;;  %678 = vrot.lane.b32.xlu2 %v2579_v24, %s2399_s5 }
  0xc1   : > { %v2637_v38 = vpop.permute.xlu0 %334  ;;  %v2639_v39 = vpop.permute.xlu2 %408 }
  0xc5   : > { %656 = vrot.lane.b32.xlu1 %v2590_v34, %s2398_s4  ;;  %s2788_s4 = sld [smem:[#allocation2 + $0x34]] }
  0xc7   : > { %v2642_v40 = vpop.permute.xlu1 %343  ;;  %680 = vrot.lane.b32.xlu0 %v2585_v32, %s2399_s5  ;;  %687 = vrot.lane.b32.xlu2 %v2590_v34, %s2399_s5 }
  0xc9   : > { %v2646_v41 = vpop.permute.xlu0 %336  ;;  %v2648_v42 = vpop.permute.xlu2 %437 }
  0xca   : > { %v341_v17 = vsel %vm340_vm10, %v2637_v38, %v2646_v41  ;;  %v342_v14 = vsel %vm340_vm10, %v2646_v41, %v2637_v38 }
  0xcb   : > { %v354_v28 = vmul.f32 %v352_v16, %v341_v17 }
  0xcd   : > { %685 = vrot.lane.b32.xlu1 %v2583_v31, %s2399_s5  ;;  %s2819_s5 = sld [smem:[#allocation2 + $0x4]] }
  0xcf   : > { %v2651_v43 = vpop.permute.xlu1 %345  ;;  %709 = vrot.lane.b32.xlu0 %v2579_v24, %s2400_s9  ;;  %716 = vrot.lane.b32.xlu2 %v2583_v31, %s2400_s9 }
  0xd0   : > { %v347_v12 = vsel %vm340_vm10, %v2642_v40, %v2651_v43  ;;  %v348_v36 = vsel %vm340_vm10, %v2651_v43, %v2642_v40  ;;  %v2848_v43 = vmul.f32 %v2812_v29, %v2756_v9  ;;  %vm324_vm10 = vcmp.ge.s32.totalorder %v2716_v3, 4294967294 }
  0xd1   : > { %v2655_v44 = vpop.permute.xlu0 %401  ;;  %v2657_v45 = vpop.permute.xlu2 %463  ;;  %v357_v20 = vmul.f32 %v355_v11, %v347_v12  ;;  %v2828_v12 = vmul.f32 %v2799_v21, %v2756_v9  ;;  %v356_v41 = vmul.f32 %v355_v11, %v348_v36  ;;  %vm326_vm13 = vmand %vm324_vm10, %vm325_vm11  ;;  %vm651_vm10 = vcmp.lt.s32.totalorder %v2731_v5, 32 }
  0xd2   : > { %v404_v13 = vsel %vm403_vm1, %v2632_v37, %v2655_v44  ;;  %vm682_vm11 = vcmp.lt.s32.totalorder %v2731_v5, 31 }
  0xd3   : > { %v359_v17 = vadd.f32 %v357_v20, %v354_v28  ;;  %v417_v11 = vmul.f32 %v415_v1, %v404_v13  ;;  %v449_v28 = vstv %s2788_s4  ;;  %s3078_s4 = sld [smem:[#allocation2 + $0x3b]] }
  0xd5   : > { %711 = vrot.lane.b32.xlu1 %v2585_v32, %s2400_s9 }
  0xd7   : > { %v2660_v46 = vpop.permute.xlu1 %377  ;;  %718 = vrot.lane.b32.xlu0 %v2590_v34, %s2400_s9  ;;  %742 = vrot.lane.b32.xlu2 %v2585_v32, %s2401_s10  ;;  %s2830_s9 = sld [smem:[#allocation2 + $0x35]] }
  0xd9   : > { %v2664_v47 = vpop.permute.xlu0 %375  ;;  %v2666_v48 = vpop.permute.xlu2 %492 }
  0xda   : > { %v379_v27 = vsel %vm372_vm9, %v2664_v47, %v2660_v46  ;;  %v380_v40 = vsel %vm372_vm9, %v2660_v46, %v2664_v47  ;;  %v353_v46 = vmul.f32 %v352_v16, %v342_v14  ;;  %v405_v47 = vsel %vm403_vm1, %v2655_v44, %v2632_v37  ;;  %vm321_vm9 = vmand %vm319_vm5, %vm320_vm6 }
  0xdb   : > { %v389_v18 = vmul.f32 %v387_v26, %v379_v27  ;;  %v388_v36 = vmul.f32 %v387_v26, %v380_v40  ;;  %v416_v26 = vmul.f32 %v415_v1, %v405_v47  ;;  %vm527_vm5 = vcmp.lt.s32.totalorder %v2731_v5, 45 }
  0xdc   : > { %v358_v44 = vadd.f32 %v356_v41, %v353_v46 }
  0xdd   : > { %740 = vrot.lane.b32.xlu1 %v2579_v24, %s2401_s10  ;;  %v391_v8 = vadd.f32 %v389_v18, %v386_v35  ;;  %v477_v35 = vstv %s2819_s5  ;;  %v390_v18 = vadd.f32 %v388_v36, %v385_v25  ;;  %s3090_s5 = sld [smem:[#allocation2 + $0xa]] }
  0xdf   : > { %v2669_v49 = vpop.permute.xlu1 %406  ;;  %747 = vrot.lane.b32.xlu0 %v2583_v31, %s2401_s10  ;;  %771 = vrot.lane.b32.xlu2 %v2579_v24, %s2402_s11 }
  0xe0   : > { %v410_v33 = vsel %vm403_vm1, %v2669_v49, %v2639_v39  ;;  %v411_v20 = vsel %vm403_vm1, %v2639_v39, %v2669_v49  ;;  %vm330_vm1 = vcmp.lt.s32.totalorder %v2716_v3, 13 }
  0xe1   : > { %v2673_v50 = vpop.permute.xlu0 %430  ;;  %v2675_v51 = vpop.permute.xlu2 %501  ;;  %v420_v38 = vmul.f32 %v418_v30, %v410_v33  ;;  %v362_v33 = vrot.slane %v359_v17, 7  ;;  %v419_v39 = vmul.f32 %v418_v30, %v411_v20  ;;  %v480_v17 = vstv %s2830_s9  ;;  %vm331_vm4 = vmand %vm329_vm14, %vm330_vm1  ;;  %s3107_s9 = sld [smem:[#allocation2 + $0xb]] }
  0xe2   : > { %v394_v30 = vrot.slane %v391_v8, 7  ;;  %v4208_v8 = vstv %s2771_s28  ;;  %v4209_v20 = vmov 0.0   ;;  %s3049_s28 = sld [smem:[#allocation2 + $0x3a]]  ;;  %vm775_vm14 = vcmp.lt.s32.totalorder %v2731_v5, 19 }
  0xe3   : > { %v422_v0 = vadd.f32 %v420_v38, %v417_v11  ;;  %v364_v13 = vsel %vm363_vm15, %v358_v44, %v362_v33  ;;  %v2914_v46 = vsel %vm316_vm8, 1.0, %v4209_v20  ;;  %v421_v33 = vadd.f32 %v419_v39, %v416_v26 }
  0xe4   : > { %v2927_v36 = vsel %vm321_vm9, 1.0, %v4209_v20  ;;  %vm589_vm8 = vcmp.lt.s32.totalorder %v2731_v5, 34  ;;  %vm620_vm9 = vcmp.lt.s32.totalorder %v2731_v5, 33  ;;  %vm274_vm1 = vcmp.ge.s32.totalorder %v2714_v2, 1 }
  0xe5   : > { %749 = vrot.lane.b32.xlu1 %v2590_v34, %s2401_s10  ;;  %s2408_s10 = smov 14   ;;  %v425_v38 = vrot.slane %v422_v0, 7 }
  0xe7   : > { %v2678_v52 = vpop.permute.xlu1 %432  ;;  %773 = vrot.lane.b32.xlu0 %v2585_v32, %s2402_s11  ;;  %780 = vrot.lane.b32.xlu2 %v2590_v34, %s2402_s11 }
  0xe8   : > { %v435_v49 = vsel %vm434_vm2, %v2673_v50, %v2678_v52 }
  0xe9   : > { %v2682_v53 = vpop.permute.xlu0 %439  ;;  %v2684_v54 = vpop.permute.xlu2 %530  ;;  %v448_v25 = vmul.f32 %v4208_v8, %v435_v49 }
  0xea   : > { %v441_v37 = vsel %vm434_vm2, %v2648_v42, %v2682_v53  ;;  %v442_v47 = vsel %vm434_vm2, %v2682_v53, %v2648_v42  ;;  %v395_v42 = vsel %vm363_vm15, %v390_v18, %v394_v30  ;;  %v436_v53 = vsel %vm434_vm2, %v2678_v52, %v2673_v50 }
  0xeb   : > { %v451_v40 = vmul.f32 %v449_v28, %v441_v37  ;;  %v450_v18 = vmul.f32 %v449_v28, %v442_v47  ;;  %v366_v30 = vmul.f32 %v364_v13, %v2796_v19  ;;  %v397_v28 = vmul.f32 %v395_v42, %v2828_v12 }
  0xec   : > { %v2969_v19 = vsel %vm326_vm13, 1.0, %v4209_v20  ;;  %vm269_vm2 = vcmp.ge.s32.totalorder %v2714_v2, 2  ;;  %vm744_vm13 = vcmp.lt.s32.totalorder %v2731_v5, 29 }
  0xed   : > { %778 = vrot.lane.b32.xlu1 %v2583_v31, %s2402_s11  ;;  %s2865_s11 = sld [smem:[#allocation2 + $0x36]]  ;;  %v453_v44 = vadd.f32 %v451_v40, %v448_v25  ;;  %v398_v42 = vadd.f32 %v397_v28, %v366_v30  ;;  %vm271_vm6 = vmand %vm269_vm2, %vm270_vm3  ;;  %vm275_vm2 = vcmp.lt.s32.totalorder %v2714_v2, 17 }
  0xee   : > { %vm276_vm3 = vmand %vm274_vm1, %vm275_vm2  ;;  %vm1054_vm1 = vcmp.lt.s32.totalorder %v2731_v5, 1  ;;  %vm1103_vm2 = vcmp.lt.s32.totalorder %v2731_v5, 127 }
  0xef   : > { %v2687_v55 = vpop.permute.xlu1 %461  ;;  %802 = vrot.lane.b32.xlu0 %v2579_v24, %s2403_s17  ;;  %809 = vrot.lane.b32.xlu2 %v2583_v31, %s2403_s17 }
  0xf0   : > { %v466_v41 = vsel %vm465_vm7, %v2687_v55, %v2657_v45  ;;  %v467_v40 = vsel %vm465_vm7, %v2657_v45, %v2687_v55  ;;  %v456_v55 = vrot.slane %v453_v44, 7 }
  0xf1   : > { %v2691_v56 = vpop.permute.xlu0 %468  ;;  %v2693_v57 = vpop.permute.xlu2 %556  ;;  %v479_v49 = vmul.f32 %v477_v35, %v466_v41  ;;  %v478_v47 = vmul.f32 %v477_v35, %v467_v40  ;;  %v445_v35 = vmul.f32 %v2914_v46, %v2756_v9 }
  0xf3   : > { %v511_v37 = vstv %s2865_s11  ;;  %s2411_s11 = smov 2  }
  0xf5   : > { %804 = vrot.lane.b32.xlu1 %v2585_v32, %s2403_s17 }
  0xf7   : > { %v2696_v58 = vpop.permute.xlu1 %470  ;;  %811 = vrot.lane.b32.xlu0 %v2590_v34, %s2403_s17  ;;  %835 = vrot.lane.b32.xlu2 %v2585_v32, %s2404_s18  ;;  %s2883_s17 = sld [smem:[#allocation2 + $0x5]] }
  0xf8   : > { %v472_v1 = vsel %vm465_vm7, %v2691_v56, %v2696_v58  ;;  %v473_v50 = vsel %vm465_vm7, %v2696_v58, %v2691_v56  ;;  %v447_v56 = vmul.f32 %v4208_v8, %v436_v53  ;;  %vm558_vm7 = vcmp.lt.s32.totalorder %v2731_v5, 35 }
  0xf9   : > { %v2700_v59 = vpop.permute.xlu0 %494  ;;  %v2702_v60 = vpop.permute.xlu2 %585  ;;  %v482_v0 = vmul.f32 %v480_v17, %v472_v1  ;;  %v426_v1 = vsel %vm363_vm15, %v421_v33, %v425_v38  ;;  %v481_v13 = vmul.f32 %v480_v17, %v473_v50  ;;  %v507_v50 = vmul.f32 %v2969_v19, %v2756_v9 }
  0xfa   : > { %v497_v58 = vsel %vm496_vm12, %v2666_v48, %v2700_v59  ;;  %v428_v45 = vmul.f32 %v426_v1, %v2848_v43  ;;  %v452_v12 = vadd.f32 %v450_v18, %v447_v56 }
  0xfb   : > { %v484_v41 = vadd.f32 %v482_v0, %v479_v49  ;;  %v483_v44 = vadd.f32 %v481_v13, %v478_v47  ;;  %v570_v47 = vstv %s2980_s24  ;;  %s2413_s24 = smov 127  }
  0xfc   : > { %v457_v53 = vsel %vm363_vm15, %v452_v12, %v456_v55  ;;  %v429_v3 = vadd.f32 %v428_v45, %v398_v42  ;;  %v573_v55 = vstv %s2978_s22  ;;  %s2034_s22 = sld [smem:[#allocation2 + $0x3e]] }
  0xfd   : > { %833 = vrot.lane.b32.xlu1 %v2579_v24, %s2404_s18  ;;  %v508_v38 = vstv %s2883_s17  ;;  %v487_v0 = vrot.slane %v484_v41, 7  ;;  %v459_v41 = vmul.f32 %v457_v53, %v445_v35  ;;  %s3180_s17 = sld [smem:[#allocation2 + $0xc]] }
  0xfe   : > { %v510_v33 = vmul.f32 %v508_v38, %v497_v58  ;;  %v3034_v58 = vsel %vm271_vm6, 1.0, %v4209_v20  ;;  %vm868_vm6 = vcmp.lt.s32.totalorder %v2731_v5, 16 }
  0xff   : > { %v2705_v61 = vpop.permute.xlu1 %499  ;;  %840 = vrot.lane.b32.xlu0 %v2583_v31, %s2404_s18  ;;  %864 = vrot.lane.b32.xlu2 %v2579_v24, %s2405_s20 }
 0x100   : > { %v503_v52 = vsel %vm496_vm12, %v2705_v61, %v2675_v51  ;;  %v504_v17 = vsel %vm496_vm12, %v2675_v51, %v2705_v61  ;;  %v476_v51 = vmul.f32 %v2927_v36, %v2756_v9  ;;  %v498_v61 = vsel %vm496_vm12, %v2700_v59, %v2666_v48 }
 0x101   : > { %v2710_v62 = vpop.permute.xlu0 %523  ;;  %v2712_v63 = vpop.permute.xlu2 %594  ;;  %v513_v25 = vmul.f32 %v511_v37, %v503_v52  ;;  %v488_v52 = vsel %vm363_vm15, %v483_v44, %v487_v0  ;;  %v512_v30 = vmul.f32 %v511_v37, %v504_v17  ;;  %v3025_v48 = vsel %vm331_vm4, 1.0, %v4209_v20 }
 0x102   : > { %v542_v59 = vstv %s2971_s21  ;;  %v509_v8 = vmul.f32 %v508_v38, %v498_v61  ;;  %v490_v37 = vmul.f32 %v488_v52, %v476_v51  ;;  %v3072_v17 = vmul.f32 %v2759_v10, %v3034_v58  ;;  %s3242_s21 = sld [smem:[#allocation2 + $0xd]] }
 0x103   : > { %v515_v49 = vadd.f32 %v513_v25, %v510_v33  ;;  %v3053_v25 = vmul.f32 %v3025_v48, %v2756_v9  ;;  %v460_v33 = vadd.f32 %v459_v41, %v429_v3  ;;  %v601_v61 = vstv %s3001_s25  ;;  %s3258_s25 = sld [smem:[#allocation2 + $0xe]] }
 0x104   : > { %v514_v13 = vadd.f32 %v512_v30, %v509_v8  ;;  %v604_v3 = vstv %s3020_s26  ;;  %vm713_vm12 = vcmp.lt.s32.totalorder %v2731_v5, 30  ;;  %s3261_s26 = sld [smem:[#allocation2 + $0x3f]]  ;;  %vm806_vm4 = vcmp.lt.s32.totalorder %v2731_v5, 18 }
 0x105   : > { %842 = vrot.lane.b32.xlu1 %v2590_v34, %s2404_s18  ;;  %s2409_s18 = smov 13   ;;  %v518_v56 = vrot.slane %v515_v49, 7 }
 0x107   : > { %v2725_v4 = vpop.permute.xlu1 %525  ;;  %866 = vrot.lane.b32.xlu0 %v2585_v32, %s2405_s20  ;;  %873 = vrot.lane.b32.xlu2 %v2590_v34, %s2405_s20  ;;  %v519_v42 = vsel %vm363_vm15, %v514_v13, %v518_v56 }
 0x108   : > { %v528_v45 = vsel %vm527_vm5, %v2710_v62, %v2725_v4  ;;  %v529_v51 = vsel %vm527_vm5, %v2725_v4, %v2710_v62  ;;  %v3096_v8 = vmul.f32 %v519_v42, %v507_v50  ;;  %v3104_v4 = vmul.f32 %v2799_v21, %v3034_v58 }
 0x109   : > { %v2737_v6 = vpop.permute.xlu0 %532  ;;  %v2739_v7 = vpop.permute.xlu2 %623 }
 0x10a   : > { %v534_v28 = vsel %vm527_vm5, %v2684_v54, %v2737_v6  ;;  %v535_v9 = vsel %vm527_vm5, %v2737_v6, %v2684_v54  ;;  %v3082_v6 = vadd.f32 %v490_v37, %v460_v33  ;;  %v632_v37 = vstv %s3036_s27  ;;  %s2414_s27 = smov 126  }
 0x10b   : > { %v544_v12 = vmul.f32 %v542_v59, %v534_v28  ;;  %v543_v52 = vmul.f32 %v542_v59, %v535_v9  ;;  %vm837_vm5 = vcmp.lt.s32.totalorder %v2731_v5, 17 }
 0x10d   : > { %871 = vrot.lane.b32.xlu1 %v2583_v31, %s2405_s20  ;;  %s2959_s20 = sld [smem:[#allocation2 + $0x6]] }
 0x10f   : > { %v2773_v15 = vpop.permute.xlu1 %554  ;;  %895 = vrot.lane.b32.xlu0 %v2579_v24, %s2407_s29  ;;  %902 = vrot.lane.b32.xlu2 %v2583_v31, %s2407_s29 }
 0x110   : > { %v559_v35 = vsel %vm558_vm7, %v2773_v15, %v2693_v57  ;;  %v560_v50 = vsel %vm558_vm7, %v2693_v57, %v2773_v15  ;;  %v635_v57 = vstv %s3049_s28  ;;  %s3290_s28 = sld [smem:[#allocation2 + $0xf]] }
 0x111   : > { %v2801_v22 = vpop.permute.xlu0 %561  ;;  %v2803_v23 = vpop.permute.xlu2 %649  ;;  %v572_v41 = vmul.f32 %v570_v47, %v559_v35  ;;  %v666_v35 = vstv %s3078_s4  ;;  %s3303_s4 = sld [smem:[#allocation2 + $0x40]] }
 0x113   : > { %v539_v40 = vstv %s2959_s20  ;;  %s3193_s20 = sld [smem:[#allocation2 + $0x3d]] }
 0x114   : > { %v541_v53 = vmul.f32 %v539_v40, %v528_v45  ;;  %v540_v59 = vmul.f32 %v539_v40, %v529_v51 }
 0x115   : > { %897 = vrot.lane.b32.xlu1 %v2585_v32, %s2407_s29 }
 0x116   : > { %v546_v30 = vadd.f32 %v544_v12, %v541_v53  ;;  %v545_v15 = vadd.f32 %v543_v52, %v540_v59  ;;  %v571_v12 = vmul.f32 %v570_v47, %v560_v50  ;;  %v694_v59 = vstv %s3107_s9  ;;  %s2040_s9 = sld [smem:[#allocation2 + $0x41]] }
 0x117   : > { %v2854_v27 = vpop.permute.xlu1 %563  ;;  %904 = vrot.lane.b32.xlu0 %v2590_v34, %s2407_s29  ;;  %928 = vrot.lane.b32.xlu2 %v2585_v32, %s2408_s10  ;;  %s2410_s29 = smov 3  }
 0x118   : > { %v565_v38 = vsel %vm558_vm7, %v2801_v22, %v2854_v27  ;;  %v566_v62 = vsel %vm558_vm7, %v2854_v27, %v2801_v22  ;;  %v549_v45 = vrot.slane %v546_v30, 7  ;;  %vm899_vm7 = vcmp.lt.s32.totalorder %v2731_v5, 15 }
 0x119   : > { %v2871_v16 = vpop.permute.xlu0 %587  ;;  %v2873_v14 = vpop.permute.xlu2 %678  ;;  %v575_v44 = vmul.f32 %v573_v55, %v565_v38  ;;  %v574_v38 = vmul.f32 %v573_v55, %v566_v62 }
 0x11a   : > { %v590_v22 = vsel %vm589_vm8, %v2702_v60, %v2871_v16 }
 0x11b   : > { %v577_v56 = vadd.f32 %v575_v44, %v572_v41  ;;  %v576_v51 = vadd.f32 %v574_v38, %v571_v12  ;;  %v550_v41 = vsel %vm363_vm15, %v545_v15, %v549_v45 }
 0x11d   : > { %926 = vrot.lane.b32.xlu1 %v2579_v24, %s2408_s10  ;;  %v580_v33 = vrot.slane %v577_v56, 7 }
 0x11f   : > { %v2920_v11 = vpop.permute.xlu1 %592  ;;  %933 = vrot.lane.b32.xlu0 %v2583_v31, %s2408_s10  ;;  %957 = vrot.lane.b32.xlu2 %v2579_v24, %s2409_s18  ;;  %v581_v50 = vsel %vm363_vm15, %v576_v51, %v580_v33 }
 0x120   : > { %v596_v28 = vsel %vm589_vm8, %v2920_v11, %v2712_v63  ;;  %v597_v27 = vsel %vm589_vm8, %v2712_v63, %v2920_v11  ;;  %v591_v63 = vsel %vm589_vm8, %v2871_v16, %v2702_v60  ;;  %v603_v11 = vmul.f32 %v601_v61, %v590_v22 }
 0x121   : > { %v2940_v26 = vpop.permute.xlu0 %616  ;;  %v2942_v39 = vpop.permute.xlu2 %687  ;;  %v606_v40 = vmul.f32 %v604_v3, %v596_v28  ;;  %v605_v9 = vmul.f32 %v604_v3, %v597_v27  ;;  %v663_v16 = vstv %s3090_s5  ;;  %v602_v3 = vmul.f32 %v601_v61, %v591_v63  ;;  %s2039_s5 = sld [smem:[#allocation2 + $0x10]] }
 0x122   : > { %vm930_vm8 = vcmp.lt.s32.totalorder %v2731_v5, 14 }
 0x123   : > { %v608_v44 = vadd.f32 %v606_v40, %v603_v11  ;;  %v607_v56 = vadd.f32 %v605_v9, %v602_v3 }
 0x125   : > { %935 = vrot.lane.b32.xlu1 %v2590_v34, %s2408_s10  ;;  %s3119_s10 = sld [smem:[#allocation2 + $0x3c]]  ;;  %v611_v27 = vrot.slane %v608_v44, 7 }
 0x127   : > { %v2984_v43 = vpop.permute.xlu1 %618  ;;  %959 = vrot.lane.b32.xlu0 %v2585_v32, %s2409_s18  ;;  %966 = vrot.lane.b32.xlu2 %v2590_v34, %s2409_s18 }
 0x128   : > { %v621_v60 = vsel %vm620_vm9, %v2940_v26, %v2984_v43 }
 0x129   : > { %v3003_v1 = vpop.permute.xlu0 %625  ;;  %v3005_v18 = vpop.permute.xlu2 %716  ;;  %v634_v61 = vmul.f32 %v632_v37, %v621_v60 }
 0x12a   : > { %v627_v55 = vsel %vm620_vm9, %v2739_v7, %v3003_v1  ;;  %v628_v28 = vsel %vm620_vm9, %v3003_v1, %v2739_v7  ;;  %v622_v1 = vsel %vm620_vm9, %v2984_v43, %v2940_v26  ;;  %vm961_vm9 = vcmp.lt.s32.totalorder %v2731_v5, 13 }
 0x12b   : > { %v637_v52 = vmul.f32 %v635_v57, %v627_v55  ;;  %v697_v22 = vstv %s3119_s10  ;;  %v636_v45 = vmul.f32 %v635_v57, %v628_v28  ;;  %s2416_s10 = smov 115  }
 0x12d   : > { %964 = vrot.lane.b32.xlu1 %v2583_v31, %s2409_s18  ;;  %v639_v38 = vadd.f32 %v637_v52, %v634_v61  ;;  %s2412_s18 = smov 1   ;;  %v522_v52 = vadd.f32 %v3096_v8, %v3082_v6 }
 0x12f   : > { %v3056_v0 = vpop.permute.xlu1 %647  ;;  %988 = vrot.lane.b32.xlu0 %v2579_v24, %s2410_s29  ;;  %995 = vrot.lane.b32.xlu2 %v2583_v31, %s2410_s29  ;;  %v642_v44 = vrot.slane %v639_v38, 7 }
 0x130   : > { %v652_v30 = vsel %vm651_vm10, %v3056_v0, %v2803_v23 }
 0x131   : > { %v3076_v49 = vpop.permute.xlu0 %654  ;;  %v3080_v54 = vpop.permute.xlu2 %742  ;;  %v665_v40 = vmul.f32 %v663_v16, %v652_v30  ;;  %v583_v30 = vmul.f32 %v581_v50, %v3072_v17  ;;  %v662_v17 = vmul.f32 %v2914_v46, %v3034_v58 }
 0x135   : > { %990 = vrot.lane.b32.xlu1 %v2585_v32, %s2410_s29 }
 0x137   : > { %v657_v13 = vpop.permute.xlu1 %656  ;;  %997 = vrot.lane.b32.xlu0 %v2590_v34, %s2410_s29  ;;  %1021 = vrot.lane.b32.xlu2 %v2585_v32, %s2411_s11  ;;  %s2415_s29 = smov 125  }
 0x138   : > { %v658_v42 = vsel %vm651_vm10, %v3076_v49, %v657_v13 }
 0x139   : > { %v681_v47 = vpop.permute.xlu0 %680  ;;  %v3144_v53 = vpop.permute.xlu2 %771  ;;  %v668_v62 = vmul.f32 %v666_v35, %v658_v42 }
 0x13a   : > { %v683_v15 = vsel %vm682_vm11, %v2873_v14, %v681_v47  ;;  %v684_v7 = vsel %vm682_vm11, %v681_v47, %v2873_v14  ;;  %v659_v14 = vsel %vm651_vm10, %v657_v13, %v3076_v49  ;;  %v552_v49 = vmul.f32 %v550_v41, %v3053_v25 }
 0x13b   : > { %v670_v63 = vadd.f32 %v668_v62, %v665_v40  ;;  %v695_v57 = vmul.f32 %v694_v59, %v684_v7  ;;  %v696_v11 = vmul.f32 %v694_v59, %v683_v15  ;;  %v612_v13 = vsel %vm363_vm15, %v607_v56, %v611_v27 }
 0x13c   : > { %v633_v47 = vmul.f32 %v632_v37, %v622_v1  ;;  %v667_v60 = vmul.f32 %v666_v35, %v659_v14  ;;  %v631_v35 = vmul.f32 %v2812_v29, %v3034_v58  ;;  %v725_v59 = vstv %s3180_s17  ;;  %s3342_s17 = sld [smem:[#allocation2 + $0x42]] }
 0x13d   : > { %1019 = vrot.lane.b32.xlu1 %v2579_v24, %s2411_s11  ;;  %v673_v37 = vrot.slane %v670_v63, 7  ;;  %v728_v56 = vstv %s3193_s20  ;;  %v693_v7 = vmul.f32 %v2927_v36, %v3034_v58  ;;  %s3369_s20 = sld [smem:[#allocation2 + $0x12]] }
 0x13e   : > { %v638_v25 = vadd.f32 %v636_v45, %v633_v47 }
 0x13f   : > { %v686_v12 = vpop.permute.xlu1 %685  ;;  %1026 = vrot.lane.b32.xlu0 %v2583_v31, %s2411_s11  ;;  %1050 = vrot.lane.b32.xlu2 %v2579_v24, %s2412_s18 }
 0x140   : > { %v689_v26 = vsel %vm682_vm11, %v686_v12, %v2942_v39  ;;  %v690_v43 = vsel %vm682_vm11, %v2942_v39, %v686_v12  ;;  %v653_v39 = vsel %vm651_vm10, %v2803_v23, %v3056_v0  ;;  %v553_v23 = vadd.f32 %v552_v49, %v522_v52 }
 0x141   : > { %v698_v55 = vmul.f32 %v697_v22, %v690_v43  ;;  %v699_v33 = vmul.f32 %v697_v22, %v689_v26  ;;  %v710_v9 = vpop.permute.xlu0 %709  ;;  %v3195_v42 = vpop.permute.xlu2 %780  ;;  %v664_v41 = vmul.f32 %v663_v16, %v653_v39  ;;  %v614_v0 = vmul.f32 %v612_v13, %v3104_v4 }
 0x142   : > { %v643_v6 = vsel %vm363_vm15, %v638_v25, %v642_v44  ;;  %v584_v61 = vadd.f32 %v583_v30, %v553_v23  ;;  %v756_v25 = vstv %s3242_s21  ;;  %s2418_s21 = smov 113  }
 0x143   : > { %v700_v51 = vadd.f32 %v698_v55, %v695_v57  ;;  %v701_v3 = vadd.f32 %v699_v33, %v696_v11  ;;  %v669_v8 = vadd.f32 %v667_v60, %v664_v41  ;;  %v645_v15 = vmul.f32 %v643_v6, %v631_v35 }
 0x144   : > { %v615_v26 = vadd.f32 %v614_v0, %v584_v61  ;;  %v759_v41 = vstv %s2034_s22  ;;  %v787_v61 = vstv %s3258_s25  ;;  %s3379_s22 = sld [smem:[#allocation2 + $0x43]] }
 0x145   : > { %v704_v28 = vrot.slane %v701_v3, 7  ;;  %1028 = vrot.lane.b32.xlu1 %v2590_v34, %s2411_s11  ;;  %v674_v22 = vsel %vm363_vm15, %v669_v8, %v673_v37  ;;  %s3340_s11 = sld [smem:[#allocation2 + $0x11]] }
 0x146   : > { %v676_v43 = vmul.f32 %v674_v22, %v662_v17  ;;  %v646_v55 = vadd.f32 %v645_v15, %v615_v26  ;;  %v790_v22 = vstv %s3261_s26  ;;  %s2046_s25 = sld [smem:[#allocation2 + $0x44]]  ;;  %s2419_s26 = smov 112  }
 0x147   : > { %v705_v16 = vsel %vm363_vm15, %v700_v51, %v704_v28  ;;  %v712_v62 = vpop.permute.xlu1 %711  ;;  %1052 = vrot.lane.b32.xlu0 %v2585_v32, %s2412_s18  ;;  %1059 = vrot.lane.b32.xlu2 %v2590_v34, %s2412_s18 }
 0x148   : > { %v714_v4 = vsel %vm713_vm12, %v710_v9, %v712_v62  ;;  %v715_v50 = vsel %vm713_vm12, %v712_v62, %v710_v9  ;;  %v707_v33 = vmul.f32 %v705_v16, %v693_v7  ;;  %v677_v13 = vadd.f32 %v676_v43, %v646_v55 }
 0x149   : > { %v719_v27 = vpop.permute.xlu0 %718  ;;  %v3229_v40 = vpop.permute.xlu2 %809  ;;  %v726_v38 = vmul.f32 %v725_v59, %v715_v50  ;;  %v727_v12 = vmul.f32 %v725_v59, %v714_v4  ;;  %v755_v50 = vmul.f32 %v3025_v48, %v3034_v58 }
 0x14a   : > { %v720_v1 = vsel %vm713_vm12, %v3005_v18, %v719_v27  ;;  %v721_v45 = vsel %vm713_vm12, %v719_v27, %v3005_v18  ;;  %v724_v18 = vmul.f32 %v2969_v19, %v3034_v58  ;;  %v708_v3 = vadd.f32 %v707_v33, %v677_v13 }
 0x14b   : > { %v729_v14 = vmul.f32 %v728_v56, %v721_v45  ;;  %v730_v63 = vmul.f32 %v728_v56, %v720_v1  ;;  %v3295_v58 = vsel %vm276_vm3, 1.0, %v4209_v20  ;;  %v818_v33 = vstv %s3290_s28  ;;  %s3418_s28 = sld [smem:[#allocation2 + $0x45]] }
 0x14c   : > { %vm992_vm12 = vcmp.lt.s32.totalorder %v2731_v5, 3  ;;  %vm1134_vm3 = vcmp.lt.s32.totalorder %v2731_v5, 126 }
 0x14d   : > { %v731_v57 = vadd.f32 %v729_v14, %v726_v38  ;;  %v732_v11 = vadd.f32 %v730_v63, %v727_v12  ;;  %1057 = vrot.lane.b32.xlu1 %v2583_v31, %s2412_s18  ;;  %s2417_s18 = smov 114  }
 0x14f   : > { %v735_v9 = vrot.slane %v732_v11, 7  ;;  %v741_v49 = vpop.permute.xlu1 %740  ;;  %1099 = vrot.lane.b32.xlu0 %v2579_v24, %s2413_s24  ;;  %1106 = vrot.lane.b32.xlu2 %v2583_v31, %s2413_s24  ;;  %v786_v11 = vmul.f32 %v2759_v10, %v3295_v58 }
 0x150   : > { %v745_v47 = vsel %vm744_vm13, %v741_v49, %v3080_v54  ;;  %v746_v39 = vsel %vm744_vm13, %v3080_v54, %v741_v49 }
 0x151   : > { %v736_v44 = vsel %vm363_vm15, %v731_v57, %v735_v9  ;;  %v748_v60 = vpop.permute.xlu0 %747  ;;  %v3255_v51 = vpop.permute.xlu2 %835  ;;  %v757_v23 = vmul.f32 %v756_v25, %v746_v39  ;;  %v758_v0 = vmul.f32 %v756_v25, %v745_v47  ;;  %v821_v47 = vstv %s3303_s4  ;;  %s3445_s4 = sld [smem:[#allocation2 + $0x15]] }
 0x152   : > { %v738_v52 = vmul.f32 %v736_v44, %v724_v18 }
 0x154   : > { %v739_v30 = vadd.f32 %v738_v52, %v708_v3 }
 0x155   : > { %1101 = vrot.lane.b32.xlu1 %v2585_v32, %s2413_s24 }
 0x157   : > { %v750_v37 = vpop.permute.xlu1 %749  ;;  %1108 = vrot.lane.b32.xlu0 %v2590_v34, %s2413_s24  ;;  %1132 = vrot.lane.b32.xlu2 %v2585_v32, %s2414_s27  ;;  %s2045_s24 = sld [smem:[#allocation2 + $0x13]] }
 0x158   : > { %v751_v54 = vsel %vm744_vm13, %v748_v60, %v750_v37  ;;  %v752_v28 = vsel %vm744_vm13, %v750_v37, %v748_v60 }
 0x159   : > { %v760_v35 = vmul.f32 %v759_v41, %v752_v28  ;;  %v761_v17 = vmul.f32 %v759_v41, %v751_v54  ;;  %v774_v6 = vpop.permute.xlu0 %773  ;;  %v3271_v8 = vpop.permute.xlu2 %864 }
 0x15a   : > { %v776_v16 = vsel %vm775_vm14, %v3144_v53, %v774_v6  ;;  %v777_v62 = vsel %vm775_vm14, %v774_v6, %v3144_v53 }
 0x15b   : > { %v762_v59 = vadd.f32 %v760_v35, %v757_v23  ;;  %v763_v4 = vadd.f32 %v761_v17, %v758_v0  ;;  %v788_v1 = vmul.f32 %v787_v61, %v777_v62  ;;  %v789_v45 = vmul.f32 %v787_v61, %v776_v16 }
 0x15c   : > { %v817_v23 = vmul.f32 %v2799_v21, %v3295_v58 }
 0x15d   : > { %v766_v56 = vrot.slane %v763_v4, 7  ;;  %1130 = vrot.lane.b32.xlu1 %v2579_v24, %s2414_s27 }
 0x15f   : > { %v767_v27 = vsel %vm363_vm15, %v762_v59, %v766_v56  ;;  %v779_v15 = vpop.permute.xlu1 %778  ;;  %1137 = vrot.lane.b32.xlu0 %v2583_v31, %s2414_s27  ;;  %1161 = vrot.lane.b32.xlu2 %v2579_v24, %s2415_s29  ;;  %v852_v56 = vstv %s2040_s9  ;;  %s3455_s9 = sld [smem:[#allocation2 + $0x46]] }
 0x160   : > { %v769_v2 = vmul.f32 %v767_v27, %v755_v50  ;;  %v782_v53 = vsel %vm775_vm14, %v779_v15, %v3195_v42  ;;  %v783_v7 = vsel %vm775_vm14, %v3195_v42, %v779_v15  ;;  %v849_v50 = vstv %s2039_s5  ;;  %s2421_s5 = smov 110  }
 0x161   : > { %v791_v38 = vmul.f32 %v790_v22, %v783_v7  ;;  %v792_v12 = vmul.f32 %v790_v22, %v782_v53  ;;  %v803_v14 = vpop.permute.xlu0 %802  ;;  %v3305_v63 = vpop.permute.xlu2 %873  ;;  %vm1023_vm14 = vcmp.lt.s32.totalorder %v2731_v5, 2 }
 0x162   : > { %v770_v26 = vadd.f32 %v769_v2, %v739_v30 }
 0x163   : > { %v793_v43 = vadd.f32 %v791_v38, %v788_v1  ;;  %v794_v57 = vadd.f32 %v792_v12, %v789_v45 }
 0x165   : > { %v797_v55 = vrot.slane %v794_v57, 7  ;;  %1139 = vrot.lane.b32.xlu1 %v2590_v34, %s2414_s27  ;;  %v880_v57 = vstv %s3340_s11  ;;  %s3416_s27 = sld [smem:[#allocation2 + $0x14]] }
 0x166   : > { %s2052_s11 = sld [smem:[#allocation2 + $0x47]] }
 0x167   : > { %v798_v42 = vsel %vm363_vm15, %v793_v43, %v797_v55  ;;  %v805_v18 = vpop.permute.xlu1 %804  ;;  %1163 = vrot.lane.b32.xlu0 %v2585_v32, %s2415_s29  ;;  %1170 = vrot.lane.b32.xlu2 %v2590_v34, %s2415_s29 }
 0x168   : > { %v800_v9 = vmul.f32 %v798_v42, %v786_v11  ;;  %v807_v49 = vsel %vm806_vm4, %v803_v14, %v805_v18  ;;  %v808_v13 = vsel %vm806_vm4, %v805_v18, %v803_v14  ;;  %v883_v11 = vstv %s3342_s17  ;;  %s2422_s17 = smov 109  }
 0x169   : > { %v812_v39 = vpop.permute.xlu0 %811  ;;  %v3319_v44 = vpop.permute.xlu2 %902  ;;  %v819_v30 = vmul.f32 %v818_v33, %v808_v13  ;;  %v820_v25 = vmul.f32 %v818_v33, %v807_v49 }
 0x16a   : > { %v801_v60 = vadd.f32 %v800_v9, %v770_v26  ;;  %v813_v3 = vsel %vm806_vm4, %v3229_v40, %v812_v39  ;;  %v814_v52 = vsel %vm806_vm4, %v812_v39, %v3229_v40  ;;  %v848_v26 = vmul.f32 %v2812_v29, %v3295_v58 }
 0x16b   : > { %v822_v41 = vmul.f32 %v821_v47, %v814_v52  ;;  %v823_v37 = vmul.f32 %v821_v47, %v813_v3  ;;  %vm1165_vm4 = vcmp.lt.s32.totalorder %v2731_v5, 125 }
 0x16d   : > { %v824_v54 = vadd.f32 %v822_v41, %v819_v30  ;;  %v825_v28 = vadd.f32 %v823_v37, %v820_v25  ;;  %1168 = vrot.lane.b32.xlu1 %v2583_v31, %s2415_s29  ;;  %v879_v25 = vmul.f32 %v2914_v46, %v3295_v58  ;;  %v911_v37 = vstv %s3369_s20  ;;  %s2420_s29 = smov 111   ;;  %s3508_s20 = sld [smem:[#allocation2 + $0x49]] }
 0x16f   : > { %v828_v0 = vrot.slane %v825_v28, 7  ;;  %v834_v35 = vpop.permute.xlu1 %833  ;;  %1192 = vrot.lane.b32.xlu0 %v2579_v24, %s2416_s10  ;;  %1199 = vrot.lane.b32.xlu2 %v2583_v31, %s2416_s10 }
 0x170   : > { %v838_v40 = vsel %vm837_vm5, %v834_v35, %v3255_v51  ;;  %v839_v17 = vsel %vm837_vm5, %v3255_v51, %v834_v35  ;;  %v914_v35 = vstv %s3379_s22  ;;  %s3513_s22 = sld [smem:[#allocation2 + $0x48]] }
 0x171   : > { %v829_v6 = vsel %vm363_vm15, %v824_v54, %v828_v0  ;;  %v841_v16 = vpop.permute.xlu0 %840  ;;  %v3337_v62 = vpop.permute.xlu2 %928  ;;  %v850_v27 = vmul.f32 %v849_v50, %v839_v17  ;;  %v851_v15 = vmul.f32 %v849_v50, %v838_v40 }
 0x172   : > { %v831_v59 = vmul.f32 %v829_v6, %v817_v23 }
 0x174   : > { %v832_v4 = vadd.f32 %v831_v59, %v801_v60 }
 0x175   : > { %1194 = vrot.lane.b32.xlu1 %v2585_v32, %s2416_s10 }
 0x177   : > { %v843_v61 = vpop.permute.xlu1 %842  ;;  %1201 = vrot.lane.b32.xlu0 %v2590_v34, %s2416_s10  ;;  %1225 = vrot.lane.b32.xlu2 %v2585_v32, %s2417_s18  ;;  %s2051_s10 = sld [smem:[#allocation2 + $0x16]] }
 0x178   : > { %v844_v51 = vsel %vm837_vm5, %v841_v16, %v843_v61  ;;  %v845_v22 = vsel %vm837_vm5, %v843_v61, %v841_v16 }
 0x179   : > { %v853_v2 = vmul.f32 %v852_v56, %v845_v22  ;;  %v854_v53 = vmul.f32 %v852_v56, %v844_v51  ;;  %v867_v7 = vpop.permute.xlu0 %866  ;;  %v3352_v1 = vpop.permute.xlu2 %957 }
 0x17a   : > { %v869_v45 = vsel %vm868_vm6, %v3271_v8, %v867_v7  ;;  %v870_v38 = vsel %vm868_vm6, %v867_v7, %v3271_v8 }
 0x17b   : > { %v855_v12 = vadd.f32 %v853_v2, %v850_v27  ;;  %v856_v14 = vadd.f32 %v854_v53, %v851_v15  ;;  %v881_v9 = vmul.f32 %v880_v57, %v870_v38  ;;  %v882_v49 = vmul.f32 %v880_v57, %v869_v45 }
 0x17c   : > { %v910_v27 = vmul.f32 %v2927_v36, %v3295_v58 }
 0x17d   : > { %v859_v43 = vrot.slane %v856_v14, 7  ;;  %1223 = vrot.lane.b32.xlu1 %v2579_v24, %s2417_s18 }
 0x17f   : > { %v860_v55 = vsel %vm363_vm15, %v855_v12, %v859_v43  ;;  %v872_v42 = vpop.permute.xlu1 %871  ;;  %1230 = vrot.lane.b32.xlu0 %v2583_v31, %s2417_s18  ;;  %1254 = vrot.lane.b32.xlu2 %v2579_v24, %s2418_s21  ;;  %v945_v43 = vstv %s2046_s25  ;;  %s3544_s25 = sld [smem:[#allocation2 + $0x19]] }
 0x180   : > { %v862_v8 = vmul.f32 %v860_v55, %v848_v26  ;;  %v875_v33 = vsel %vm868_vm6, %v872_v42, %v3305_v63  ;;  %v876_v18 = vsel %vm868_vm6, %v3305_v63, %v872_v42  ;;  %v942_v26 = vstv %s2045_s24  ;;  %s2423_s24 = smov 99  }
 0x181   : > { %v884_v13 = vmul.f32 %v883_v11, %v876_v18  ;;  %v885_v47 = vmul.f32 %v883_v11, %v875_v33  ;;  %v896_v39 = vpop.permute.xlu0 %895  ;;  %v3381_v60 = vpop.permute.xlu2 %966 }
 0x182   : > { %v863_v3 = vadd.f32 %v862_v8, %v832_v4 }
 0x183   : > { %v886_v52 = vadd.f32 %v884_v13, %v881_v9  ;;  %v887_v30 = vadd.f32 %v885_v47, %v882_v49 }
 0x185   : > { %v890_v41 = vrot.slane %v887_v30, 7  ;;  %1232 = vrot.lane.b32.xlu1 %v2590_v34, %s2417_s18  ;;  %v973_v30 = vstv %s3416_s27  ;;  %s3506_s18 = sld [smem:[#allocation2 + $0x18]] }
 0x186   : > { %s3554_s27 = sld [smem:[#allocation2 + $0x4a]] }
 0x187   : > { %v891_v63 = vsel %vm363_vm15, %v886_v52, %v890_v41  ;;  %v898_v54 = vpop.permute.xlu1 %897  ;;  %1256 = vrot.lane.b32.xlu0 %v2585_v32, %s2418_s21  ;;  %1263 = vrot.lane.b32.xlu2 %v2590_v34, %s2418_s21 }
 0x188   : > { %v893_v28 = vmul.f32 %v891_v63, %v879_v25  ;;  %v900_v23 = vsel %vm899_vm7, %v896_v39, %v898_v54  ;;  %v901_v0 = vsel %vm899_vm7, %v898_v54, %v896_v39  ;;  %v976_v25 = vstv %s3418_s28  ;;  %s2059_s28 = sld [smem:[#allocation2 + $0x1a]] }
 0x189   : > { %v905_v40 = vpop.permute.xlu0 %904  ;;  %v3395_v17 = vpop.permute.xlu2 %995  ;;  %v912_v4 = vmul.f32 %v911_v37, %v901_v0  ;;  %v913_v50 = vmul.f32 %v911_v37, %v900_v23 }
 0x18a   : > { %v894_v6 = vadd.f32 %v893_v28, %v863_v3  ;;  %v906_v16 = vsel %vm899_vm7, %v3319_v44, %v905_v40  ;;  %v907_v59 = vsel %vm899_vm7, %v905_v40, %v3319_v44  ;;  %v941_v3 = vmul.f32 %v2969_v19, %v3295_v58 }
 0x18b   : > { %v915_v56 = vmul.f32 %v914_v35, %v907_v59  ;;  %v916_v61 = vmul.f32 %v914_v35, %v906_v16  ;;  %vm1196_vm7 = vcmp.lt.s32.totalorder %v2731_v5, 115 }
 0x18d   : > { %v917_v51 = vadd.f32 %v915_v56, %v912_v4  ;;  %v918_v22 = vadd.f32 %v916_v61, %v913_v50  ;;  %1261 = vrot.lane.b32.xlu1 %v2583_v31, %s2418_s21  ;;  %v972_v50 = vmul.f32 %v3025_v48, %v3295_v58  ;;  %v3461_v56 = vld [vmem:[#allocation6] ss:$2 sm:$0x3]  ;;  %s3511_s21 = sld [smem:[#allocation2 + $0x17]] }
 0x18e   : > { %vm279_vm10 = vcmp.ge.s32.totalorder %v3461_v56, 0  ;;  %vm280_vm11 = vcmp.lt.s32.totalorder %v3461_v56, 16  ;;  %vm284_vm5 = vcmp.ge.s32.totalorder %v3461_v56, 4294967295  ;;  %vm285_vm6 = vcmp.lt.s32.totalorder %v3461_v56, 15 }
 0x18f   : > { %v921_v15 = vrot.slane %v918_v22, 7  ;;  %v927_v2 = vpop.permute.xlu1 %926  ;;  %1285 = vrot.lane.b32.xlu0 %v2579_v24, %s2419_s26  ;;  %1292 = vrot.lane.b32.xlu2 %v2583_v31, %s2419_s26  ;;  %vm281_vm13 = vmand %vm279_vm10, %vm280_vm11  ;;  %vm1258_vm10 = vcmp.lt.s32.totalorder %v2731_v5, 113  ;;  %vm1289_vm11 = vcmp.lt.s32.totalorder %v2731_v5, 112 }
 0x190   : > { %v931_v44 = vsel %vm930_vm8, %v927_v2, %v3337_v62  ;;  %v932_v53 = vsel %vm930_vm8, %v3337_v62, %v927_v2  ;;  %v1007_v2 = vstv %s3455_s9  ;;  %s3606_s9 = sld [smem:[#allocation2 + $0x4c]] }
 0x191   : > { %v922_v7 = vsel %vm363_vm15, %v917_v51, %v921_v15  ;;  %v934_v45 = vpop.permute.xlu0 %933  ;;  %v3413_v38 = vpop.permute.xlu2 %1021  ;;  %v943_v55 = vmul.f32 %v942_v26, %v932_v53  ;;  %v944_v42 = vmul.f32 %v942_v26, %v931_v44  ;;  %v1004_v51 = vstv %s3445_s4  ;;  %s2425_s4 = smov 97  }
 0x192   : > { %v924_v12 = vmul.f32 %v922_v7, %v910_v27 }
 0x194   : > { %v925_v14 = vadd.f32 %v924_v12, %v894_v6 }
 0x195   : > { %1287 = vrot.lane.b32.xlu1 %v2585_v32, %s2419_s26 }
 0x197   : > { %v936_v57 = vpop.permute.xlu1 %935  ;;  %1294 = vrot.lane.b32.xlu0 %v2590_v34, %s2419_s26  ;;  %1318 = vrot.lane.b32.xlu2 %v2585_v32, %s2420_s29  ;;  %s2424_s26 = smov 98  }
 0x198   : > { %v937_v62 = vsel %vm930_vm8, %v934_v45, %v936_v57  ;;  %v938_v11 = vsel %vm930_vm8, %v936_v57, %v934_v45  ;;  %v3482_v45 = vsel %vm281_vm13, 1.0, %v4209_v20  ;;  %vm286_vm8 = vmand %vm284_vm5, %vm285_vm6  ;;  %vm1351_vm13 = vcmp.lt.s32.totalorder %v2731_v5, 110 }
 0x199   : > { %v946_v8 = vmul.f32 %v945_v43, %v938_v11  ;;  %v947_v33 = vmul.f32 %v945_v43, %v937_v62  ;;  %v960_v18 = vpop.permute.xlu0 %959  ;;  %v3428_v9 = vpop.permute.xlu2 %1050  ;;  %vm1444_vm5 = vcmp.lt.s32.totalorder %v2731_v5, 98  ;;  %vm1475_vm6 = vcmp.lt.s32.totalorder %v2731_v5, 97 }
 0x19a   : > { %v962_v49 = vsel %vm961_vm9, %v3352_v1, %v960_v18  ;;  %v963_v13 = vsel %vm961_vm9, %v960_v18, %v3352_v1 }
 0x19b   : > { %v948_v47 = vadd.f32 %v946_v8, %v943_v55  ;;  %v949_v39 = vadd.f32 %v947_v33, %v944_v42  ;;  %v974_v28 = vmul.f32 %v973_v30, %v963_v13  ;;  %v975_v23 = vmul.f32 %v973_v30, %v962_v49 }
 0x19c   : > { %v1003_v42 = vmul.f32 %v2759_v10, %v3482_v45  ;;  %v1038_v30 = vstv %s2052_s11  ;;  %s3633_s11 = sld [smem:[#allocation2 + $0x1c]] }
 0x19d   : > { %v952_v52 = vrot.slane %v949_v39, 7  ;;  %1316 = vrot.lane.b32.xlu1 %v2579_v24, %s2420_s29 }
 0x19f   : > { %v953_v41 = vsel %vm363_vm15, %v948_v47, %v952_v52  ;;  %v965_v63 = vpop.permute.xlu1 %964  ;;  %1323 = vrot.lane.b32.xlu0 %v2583_v31, %s2420_s29  ;;  %1347 = vrot.lane.b32.xlu2 %v2579_v24, %s2421_s5  ;;  %v1035_v52 = vstv %s2051_s10  ;;  %s2426_s10 = smov 96  }
 0x1a0   : > { %v955_v1 = vmul.f32 %v953_v41, %v941_v3  ;;  %v968_v37 = vsel %vm961_vm9, %v965_v63, %v3381_v60  ;;  %v969_v54 = vsel %vm961_vm9, %v3381_v60, %v965_v63  ;;  %vm1227_vm9 = vcmp.lt.s32.totalorder %v2731_v5, 114 }
 0x1a1   : > { %v977_v0 = vmul.f32 %v976_v25, %v969_v54  ;;  %v978_v35 = vmul.f32 %v976_v25, %v968_v37  ;;  %v989_v40 = vpop.permute.xlu0 %988  ;;  %v3457_v6 = vpop.permute.xlu2 %1059 }
 0x1a2   : > { %v956_v16 = vadd.f32 %v955_v1, %v925_v14 }
 0x1a3   : > { %v979_v59 = vadd.f32 %v977_v0, %v974_v28  ;;  %v980_v4 = vadd.f32 %v978_v35, %v975_v23 }
 0x1a5   : > { %v983_v60 = vrot.slane %v980_v4, 7  ;;  %1325 = vrot.lane.b32.xlu1 %v2590_v34, %s2420_s29  ;;  %v1087_v4 = vstv %s3508_s20  ;;  %s2060_s29 = sld [smem:[#allocation2 + $0x4b]] }
 0x1a6   : > { %s2065_s20 = sld [smem:[#allocation2 + $0x1d]] }
 0x1a7   : > { %v984_v61 = vsel %vm363_vm15, %v979_v59, %v983_v60  ;;  %v991_v22 = vpop.permute.xlu1 %990  ;;  %1349 = vrot.lane.b32.xlu0 %v2585_v32, %s2421_s5  ;;  %1356 = vrot.lane.b32.xlu2 %v2590_v34, %s2421_s5  ;;  %v1084_v59 = vstv %s3506_s18  ;;  %s3643_s18 = sld [smem:[#allocation2 + $0x4d]] }
 0x1a8   : > { %v986_v58 = vmul.f32 %v984_v61, %v972_v50  ;;  %v993_v27 = vsel %vm992_vm12, %v989_v40, %v991_v22  ;;  %v994_v15 = vsel %vm992_vm12, %v991_v22, %v989_v40  ;;  %v1034_v50 = vmul.f32 %v2799_v21, %v3482_v45 }
 0x1a9   : > { %v998_v44 = vpop.permute.xlu0 %997  ;;  %v3479_v53 = vpop.permute.xlu2 %1106  ;;  %v1005_v26 = vmul.f32 %v1004_v51, %v994_v15  ;;  %v1006_v43 = vmul.f32 %v1004_v51, %v993_v27  ;;  %v1066_v61 = vstv %s3511_s21  ;;  %v1069_v51 = vstv %s3513_s22  ;;  %s2066_s21 = sld [smem:[#allocation2 + $0x4e]]  ;;  %s2428_s22 = smov 94  }
 0x1aa   : > { %v987_v7 = vadd.f32 %v986_v58, %v956_v16  ;;  %v999_v12 = vsel %vm992_vm12, %v3395_v17, %v998_v44  ;;  %v1000_v14 = vsel %vm992_vm12, %v998_v44, %v3395_v17  ;;  %v1086_v22 = vmul.f32 %v1084_v59, %v2585_v32 }
 0x1ab   : > { %v1008_v57 = vmul.f32 %v1007_v2, %v1000_v14  ;;  %v1009_v62 = vmul.f32 %v1007_v2, %v999_v12  ;;  %v1089_v58 = vmul.f32 %v1087_v4, %v2590_v34  ;;  %vm1320_vm12 = vcmp.lt.s32.totalorder %v2731_v5, 111 }
 0x1ad   : > { %v1010_v11 = vadd.f32 %v1008_v57, %v1005_v26  ;;  %v1011_v55 = vadd.f32 %v1009_v62, %v1006_v43  ;;  %1354 = vrot.lane.b32.xlu1 %v2583_v31, %s2421_s5  ;;  %s3604_s5 = sld [smem:[#allocation2 + $0x1b]] }
 0x1af   : > { %v1014_v8 = vrot.slane %v1011_v55, 7  ;;  %v1020_v33 = vpop.permute.xlu1 %1019  ;;  %1378 = vrot.lane.b32.xlu0 %v2579_v24, %s2422_s17  ;;  %1385 = vrot.lane.b32.xlu2 %v2583_v31, %s2422_s17  ;;  %v1091_v55 = vadd.f32 %v1089_v58, %v1086_v22 }
 0x1b0   : > { %v1024_v17 = vsel %vm1023_vm14, %v1020_v33, %v3413_v38  ;;  %v1025_v18 = vsel %vm1023_vm14, %v3413_v38, %v1020_v33 }
 0x1b1   : > { %v1015_v49 = vsel %vm363_vm15, %v1010_v11, %v1014_v8  ;;  %v1027_v13 = vpop.permute.xlu0 %1026  ;;  %v3504_v47 = vpop.permute.xlu2 %1132  ;;  %v1036_v63 = vmul.f32 %v1035_v52, %v1025_v18  ;;  %v1037_v1 = vmul.f32 %v1035_v52, %v1024_v17  ;;  %v1088_v11 = vmul.f32 %v1087_v4, %v2583_v31 }
 0x1b2   : > { %v1017_v39 = vmul.f32 %v1015_v49, %v1003_v42  ;;  %v1085_v42 = vmul.f32 %v1084_v59, %v2579_v24  ;;  %v1094_v18 = vrot.slane %v1091_v55, 7 }
 0x1b4   : > { %v1018_v3 = vadd.f32 %v1017_v39, %v987_v7  ;;  %v1090_v49 = vadd.f32 %v1088_v11, %v1085_v42  ;;  %v1115_v39 = vstv %s3544_s25  ;;  %s3695_s25 = sld [smem:[#allocation2 + $0x4f]] }
 0x1b5   : > { %1380 = vrot.lane.b32.xlu1 %v2585_v32, %s2422_s17 }
 0x1b7   : > { %v1029_v38 = vpop.permute.xlu1 %1028  ;;  %1387 = vrot.lane.b32.xlu0 %v2590_v34, %s2422_s17  ;;  %1411 = vrot.lane.b32.xlu2 %v2585_v32, %s2423_s24  ;;  %s2427_s17 = smov 95  }
 0x1b8   : > { %v1030_v25 = vsel %vm1023_vm14, %v1027_v13, %v1029_v38  ;;  %v1031_v41 = vsel %vm1023_vm14, %v1029_v38, %v1027_v13  ;;  %vm1382_vm14 = vcmp.lt.s32.totalorder %v2731_v5, 109 }
 0x1b9   : > { %v1039_v37 = vmul.f32 %v1038_v30, %v1031_v41  ;;  %v1040_v54 = vmul.f32 %v1038_v30, %v1030_v25  ;;  %v1053_v28 = vpop.permute.xlu0 %1052  ;;  %v3523_v23 = vpop.permute.xlu2 %1161  ;;  %v1118_v25 = vstv %s3554_s27  ;;  %v1083_v41 = vmul.f32 %v2914_v46, %v3482_v45  ;;  %s3722_s27 = sld [smem:[#allocation2 + $0x1f]] }
 0x1ba   : > { %v1055_v0 = vsel %vm1054_vm1, %v3428_v9, %v1053_v28  ;;  %v1056_v35 = vsel %vm1054_vm1, %v1053_v28, %v3428_v9 }
 0x1bb   : > { %v1041_v40 = vadd.f32 %v1039_v37, %v1036_v63  ;;  %v1042_v16 = vadd.f32 %v1040_v54, %v1037_v1  ;;  %v1067_v7 = vmul.f32 %v1066_v61, %v1056_v35  ;;  %v1068_v12 = vmul.f32 %v1066_v61, %v1055_v0 }
 0x1bc   : > { %v1095_v54 = vsel %vm363_vm15, %v1090_v49, %v1094_v18 }
 0x1bd   : > { %v1045_v60 = vrot.slane %v1042_v16, 7  ;;  %1409 = vrot.lane.b32.xlu1 %v2579_v24, %s2423_s24  ;;  %v1097_v61 = vmul.f32 %v1095_v54, %v1083_v41 }
 0x1bf   : > { %v1046_v27 = vsel %vm363_vm15, %v1041_v40, %v1045_v60  ;;  %v1058_v9 = vpop.permute.xlu1 %1057  ;;  %1416 = vrot.lane.b32.xlu0 %v2583_v31, %s2423_s24  ;;  %1440 = vrot.lane.b32.xlu2 %v2579_v24, %s2424_s26  ;;  %v1114_v60 = vmul.f32 %v2927_v36, %v3482_v45 }
 0x1c0   : > { %v1048_v15 = vmul.f32 %v1046_v27, %v1034_v50  ;;  %v1061_v2 = vsel %vm1054_vm1, %v1058_v9, %v3457_v6  ;;  %v1062_v44 = vsel %vm1054_vm1, %v3457_v6, %v1058_v9  ;;  %v1065_v6 = vmul.f32 %v2812_v29, %v3482_v45 }
 0x1c1   : > { %v1070_v14 = vmul.f32 %v1069_v51, %v1062_v44  ;;  %v1071_v26 = vmul.f32 %v1069_v51, %v1061_v2  ;;  %v1100_v43 = vpop.permute.xlu0 %1099  ;;  %v3556_v57 = vpop.permute.xlu2 %1170  ;;  %vm1413_vm1 = vcmp.lt.s32.totalorder %v2731_v5, 99 }
 0x1c2   : > { %v1049_v62 = vadd.f32 %v1048_v15, %v1018_v3 }
 0x1c3   : > { %v1072_v8 = vadd.f32 %v1070_v14, %v1067_v7  ;;  %v1073_v33 = vadd.f32 %v1071_v26, %v1068_v12  ;;  %v1146_v12 = vstv %s2059_s28  ;;  %v1149_v14 = vstv %s2060_s29  ;;  %s2430_s28 = smov 83   ;;  %s3732_s29 = sld [smem:[#allocation2 + $0x50]] }
 0x1c5   : > { %v1076_v17 = vrot.slane %v1073_v33, 7  ;;  %1418 = vrot.lane.b32.xlu1 %v2590_v34, %s2423_s24  ;;  %s3693_s24 = sld [smem:[#allocation2 + $0x1e]] }
 0x1c7   : > { %v1077_v13 = vsel %vm363_vm15, %v1072_v8, %v1076_v17  ;;  %v1102_v3 = vpop.permute.xlu1 %1101  ;;  %1442 = vrot.lane.b32.xlu0 %v2585_v32, %s2424_s26  ;;  %1449 = vrot.lane.b32.xlu2 %v2590_v34, %s2424_s26 }
 0x1c8   : > { %v1079_v52 = vmul.f32 %v1077_v13, %v1065_v6  ;;  %v1104_v30 = vsel %vm1103_vm2, %v1100_v43, %v1102_v3  ;;  %v1105_v38 = vsel %vm1103_vm2, %v1102_v3, %v1100_v43  ;;  %v1145_v13 = vmul.f32 %v2969_v19, %v3482_v45 }
 0x1c9   : > { %v1109_v63 = vpop.permute.xlu0 %1108  ;;  %v3578_v1 = vpop.permute.xlu2 %1199  ;;  %v1116_v35 = vmul.f32 %v1115_v39, %v1104_v30  ;;  %v1117_v40 = vmul.f32 %v1115_v39, %v1105_v38  ;;  %v1177_v3 = vstv %s3604_s5  ;;  %s2072_s5 = sld [smem:[#allocation2 + $0x51]] }
 0x1ca   : > { %v1080_v37 = vadd.f32 %v1079_v52, %v1049_v62  ;;  %v1110_v28 = vsel %vm1103_vm2, %v3479_v53, %v1109_v63  ;;  %v1111_v0 = vsel %vm1103_vm2, %v1109_v63, %v3479_v53  ;;  %v1180_v52 = vstv %s3606_s9  ;;  %s2431_s9 = smov 82  }
 0x1cb   : > { %v1119_v16 = vmul.f32 %v1118_v25, %v1110_v28  ;;  %v1120_v59 = vmul.f32 %v1118_v25, %v1111_v0  ;;  %vm289_vm2 = vcmp.ge.s32.totalorder %v3461_v56, 4294967294 }
 0x1cc   : > { %v1098_v2 = vadd.f32 %v1097_v61, %v1080_v37 }
 0x1cd   : > { %v1121_v4 = vadd.f32 %v1119_v16, %v1116_v35  ;;  %v1122_v50 = vadd.f32 %v1120_v59, %v1117_v40  ;;  %1447 = vrot.lane.b32.xlu1 %v2583_v31, %s2424_s26  ;;  %s2429_s26 = smov 93  }
 0x1cf   : > { %v1125_v51 = vrot.slane %v1122_v50, 7  ;;  %v1131_v22 = vpop.permute.xlu1 %1130  ;;  %1471 = vrot.lane.b32.xlu0 %v2579_v24, %s2425_s4  ;;  %1478 = vrot.lane.b32.xlu2 %v2583_v31, %s2425_s4 }
 0x1d0   : > { %v1135_v53 = vsel %vm1134_vm3, %v1131_v22, %v3504_v47  ;;  %v1136_v58 = vsel %vm1134_vm3, %v3504_v47, %v1131_v22 }
 0x1d1   : > { %v1126_v27 = vsel %vm363_vm15, %v1121_v4, %v1125_v51  ;;  %v1138_v9 = vpop.permute.xlu0 %1137  ;;  %v3601_v15 = vpop.permute.xlu2 %1225  ;;  %v1147_v62 = vmul.f32 %v1146_v12, %v1135_v53  ;;  %v1148_v11 = vmul.f32 %v1146_v12, %v1136_v58  ;;  %v1176_v4 = vmul.f32 %v3025_v48, %v3482_v45 }
 0x1d2   : > { %v1128_v44 = vmul.f32 %v1126_v27, %v1114_v60  ;;  %v1208_v60 = vstv %s3633_s11  ;;  %v1211_v53 = vstv %s3643_s18  ;;  %s3771_s11 = sld [smem:[#allocation2 + $0x52]] }
 0x1d3   : > { %s3798_s18 = sld [smem:[#allocation2 + $0x22]] }
 0x1d4   : > { %v1129_v7 = vadd.f32 %v1128_v44, %v1098_v2  ;;  %v3668_v2 = vsel %vm286_vm8, 1.0, %v4209_v20  ;;  %vm1537_vm8 = vcmp.lt.s32.totalorder %v2731_v5, 95 }
 0x1d5   : > { %1473 = vrot.lane.b32.xlu1 %v2585_v32, %s2425_s4 }
 0x1d7   : > { %v1140_v26 = vpop.permute.xlu1 %1139  ;;  %1480 = vrot.lane.b32.xlu0 %v2590_v34, %s2425_s4  ;;  %1504 = vrot.lane.b32.xlu2 %v2585_v32, %s2426_s10  ;;  %s2071_s4 = sld [smem:[#allocation2 + $0x20]] }
 0x1d8   : > { %v1141_v47 = vsel %vm1134_vm3, %v1138_v9, %v1140_v26  ;;  %v1142_v43 = vsel %vm1134_vm3, %v1140_v26, %v1138_v9  ;;  %vm290_vm3 = vcmp.lt.s32.totalorder %v3461_v56, 14 }
 0x1d9   : > { %v1150_v55 = vmul.f32 %v1149_v14, %v1141_v47  ;;  %v1151_v42 = vmul.f32 %v1149_v14, %v1142_v43  ;;  %v1164_v8 = vpop.permute.xlu0 %1163  ;;  %v3616_v33 = vpop.permute.xlu2 %1254 }
 0x1da   : > { %v1166_v6 = vsel %vm1165_vm4, %v3523_v23, %v1164_v8  ;;  %v1167_v17 = vsel %vm1165_vm4, %v1164_v8, %v3523_v23 }
 0x1db   : > { %v1152_v18 = vadd.f32 %v1150_v55, %v1147_v62  ;;  %v1153_v49 = vadd.f32 %v1151_v42, %v1148_v11  ;;  %v1178_v63 = vmul.f32 %v1177_v3, %v1166_v6  ;;  %v1179_v37 = vmul.f32 %v1177_v3, %v1167_v17 }
 0x1dc   : > { %v1207_v11 = vmul.f32 %v2759_v10, %v3668_v2  ;;  %v1242_v3 = vstv %s2066_s21  ;;  %s3808_s21 = sld [smem:[#allocation2 + $0x53]] }
 0x1dd   : > { %v1156_v39 = vrot.slane %v1153_v49, 7  ;;  %1502 = vrot.lane.b32.xlu1 %v2579_v24, %s2426_s10 }
 0x1df   : > { %v1157_v30 = vsel %vm363_vm15, %v1152_v18, %v1156_v39  ;;  %v1169_v38 = vpop.permute.xlu1 %1168  ;;  %1509 = vrot.lane.b32.xlu0 %v2583_v31, %s2426_s10  ;;  %1533 = vrot.lane.b32.xlu2 %v2579_v24, %s2427_s17  ;;  %v1239_v39 = vstv %s2065_s20  ;;  %s2433_s20 = smov 80  }
 0x1e0   : > { %v1159_v23 = vmul.f32 %v1157_v30, %v1145_v13  ;;  %v1172_v25 = vsel %vm1165_vm4, %v1169_v38, %v3556_v57  ;;  %v1173_v41 = vsel %vm1165_vm4, %v3556_v57, %v1169_v38  ;;  %vm291_vm4 = vmand %vm289_vm2, %vm290_vm3  ;;  %vm1692_vm2 = vcmp.lt.s32.totalorder %v2731_v5, 81 }
 0x1e1   : > { %v1181_v54 = vmul.f32 %v1180_v52, %v1172_v25  ;;  %v1182_v28 = vmul.f32 %v1180_v52, %v1173_v41  ;;  %v1193_v0 = vpop.permute.xlu0 %1192  ;;  %v3645_v35 = vpop.permute.xlu2 %1263  ;;  %v3862_v56 = vsel %vm291_vm4, 1.0, %v4209_v20  ;;  %vm1723_vm3 = vcmp.lt.s32.totalorder %v2731_v5, 80 }
 0x1e2   : > { %v1160_v40 = vadd.f32 %v1159_v23, %v1129_v7  ;;  %vm1754_vm4 = vcmp.lt.s32.totalorder %v2731_v5, 79 }
 0x1e3   : > { %v1183_v16 = vadd.f32 %v1181_v54, %v1178_v63  ;;  %v1184_v59 = vadd.f32 %v1182_v28, %v1179_v37 }
 0x1e5   : > { %v1187_v57 = vrot.slane %v1184_v59, 7  ;;  %1511 = vrot.lane.b32.xlu1 %v2590_v34, %s2426_s10  ;;  %s3769_s10 = sld [smem:[#allocation2 + $0x21]] }
 0x1e7   : > { %v1188_v50 = vsel %vm363_vm15, %v1183_v16, %v1187_v57  ;;  %v1195_v61 = vpop.permute.xlu1 %1194  ;;  %1535 = vrot.lane.b32.xlu0 %v2585_v32, %s2427_s17  ;;  %1542 = vrot.lane.b32.xlu2 %v2590_v34, %s2427_s17  ;;  %v1238_v16 = vmul.f32 %v2799_v21, %v3668_v2  ;;  %v1273_v57 = vstv %s3695_s25  ;;  %s2434_s25 = smov 79  }
 0x1e8   : > { %v1190_v45 = vmul.f32 %v1188_v50, %v1176_v4  ;;  %v1197_v51 = vsel %vm1196_vm7, %v1193_v0, %v1195_v61  ;;  %v1198_v22 = vsel %vm1196_vm7, %v1195_v61, %v1193_v0  ;;  %v1270_v4 = vstv %s3693_s24  ;;  %s3835_s24 = sld [smem:[#allocation2 + $0x54]] }
 0x1e9   : > { %v1202_v58 = vpop.permute.xlu0 %1201  ;;  %v3665_v27 = vpop.permute.xlu2 %1292  ;;  %v1209_v12 = vmul.f32 %v1208_v60, %v1197_v51  ;;  %v1210_v14 = vmul.f32 %v1208_v60, %v1198_v22 }
 0x1ea   : > { %v1191_v9 = vadd.f32 %v1190_v45, %v1160_v40  ;;  %v1203_v44 = vsel %vm1196_vm7, %v3578_v1, %v1202_v58  ;;  %v1204_v7 = vsel %vm1196_vm7, %v1202_v58, %v3578_v1  ;;  %vm1506_vm7 = vcmp.lt.s32.totalorder %v2731_v5, 96 }
 0x1eb   : > { %v1212_v26 = vmul.f32 %v1211_v53, %v1203_v44  ;;  %v1213_v47 = vmul.f32 %v1211_v53, %v1204_v7 }
 0x1ed   : > { %v1214_v43 = vadd.f32 %v1212_v26, %v1209_v12  ;;  %v1215_v62 = vadd.f32 %v1213_v47, %v1210_v14  ;;  %1540 = vrot.lane.b32.xlu1 %v2583_v31, %s2427_s17  ;;  %v1269_v26 = vmul.f32 %v2812_v29, %v3668_v2  ;;  %s2432_s17 = smov 81  }
 0x1ef   : > { %v1218_v55 = vrot.slane %v1215_v62, 7  ;;  %v1224_v42 = vpop.permute.xlu1 %1223  ;;  %1564 = vrot.lane.b32.xlu0 %v2579_v24, %s2428_s22  ;;  %1571 = vrot.lane.b32.xlu2 %v2583_v31, %s2428_s22 }
 0x1f0   : > { %v1228_v1 = vsel %vm1227_vm9, %v1224_v42, %v3601_v15  ;;  %v1229_v8 = vsel %vm1227_vm9, %v3601_v15, %v1224_v42 }
 0x1f1   : > { %v1219_v6 = vsel %vm363_vm15, %v1214_v43, %v1218_v55  ;;  %v1231_v17 = vpop.permute.xlu0 %1230  ;;  %v3690_v18 = vpop.permute.xlu2 %1318  ;;  %v1240_v38 = vmul.f32 %v1239_v39, %v1228_v1  ;;  %v1241_v23 = vmul.f32 %v1239_v39, %v1229_v8  ;;  %v1301_v43 = vstv %s3722_s27  ;;  %s3855_s27 = sld [smem:[#allocation2 + $0x55]] }
 0x1f2   : > { %v1221_v49 = vmul.f32 %v1219_v6, %v1207_v11  ;;  %v1304_v1 = vstv %s3732_s29  ;;  %s3885_s29 = sld [smem:[#allocation2 + $0x25]] }
 0x1f4   : > { %v1222_v13 = vadd.f32 %v1221_v49, %v1191_v9 }
 0x1f5   : > { %1566 = vrot.lane.b32.xlu1 %v2585_v32, %s2428_s22 }
 0x1f7   : > { %v1233_v52 = vpop.permute.xlu1 %1232  ;;  %1573 = vrot.lane.b32.xlu0 %v2590_v34, %s2428_s22  ;;  %1597 = vrot.lane.b32.xlu2 %v2585_v32, %s2429_s26  ;;  %s3831_s22 = sld [smem:[#allocation2 + $0x23]] }
 0x1f8   : > { %v1234_v15 = vsel %vm1227_vm9, %v1231_v17, %v1233_v52  ;;  %v1235_v30 = vsel %vm1227_vm9, %v1233_v52, %v1231_v17  ;;  %vm1568_vm9 = vcmp.lt.s32.totalorder %v2731_v5, 94 }
 0x1f9   : > { %v1243_v25 = vmul.f32 %v1242_v3, %v1234_v15  ;;  %v1244_v41 = vmul.f32 %v1242_v3, %v1235_v30  ;;  %v1257_v63 = vpop.permute.xlu0 %1256  ;;  %v3705_v37 = vpop.permute.xlu2 %1347 }
 0x1fa   : > { %v1259_v54 = vsel %vm1258_vm10, %v3616_v33, %v1257_v63  ;;  %v1260_v28 = vsel %vm1258_vm10, %v1257_v63, %v3616_v33 }
 0x1fb   : > { %v1245_v0 = vadd.f32 %v1243_v25, %v1240_v38  ;;  %v1246_v40 = vadd.f32 %v1244_v41, %v1241_v23  ;;  %v1271_v51 = vmul.f32 %v1270_v4, %v1259_v54  ;;  %v1272_v22 = vmul.f32 %v1270_v4, %v1260_v28 }
 0x1fc   : > { %v1300_v23 = vmul.f32 %v2914_v46, %v3668_v2  ;;  %v1335_v4 = vstv %s2072_s5  ;;  %s2082_s5 = sld [smem:[#allocation2 + $0x56]] }
 0x1fd   : > { %v1249_v59 = vrot.slane %v1246_v40, 7  ;;  %1595 = vrot.lane.b32.xlu1 %v2579_v24, %s2429_s26 }
 0x1ff   : > { %v1250_v50 = vsel %vm363_vm15, %v1245_v0, %v1249_v59  ;;  %v1262_v60 = vpop.permute.xlu1 %1261  ;;  %1602 = vrot.lane.b32.xlu0 %v2583_v31, %s2429_s26  ;;  %1626 = vrot.lane.b32.xlu2 %v2579_v24, %s2430_s28  ;;  %v1332_v59 = vstv %s2071_s4  ;;  %s2436_s4 = smov 77  }
 0x200   : > { %v1252_v33 = vmul.f32 %v1250_v50, %v1238_v16  ;;  %v1265_v61 = vsel %vm1258_vm10, %v1262_v60, %v3645_v35  ;;  %v1266_v45 = vsel %vm1258_vm10, %v3645_v35, %v1262_v60  ;;  %vm1599_vm10 = vcmp.lt.s32.totalorder %v2731_v5, 93 }
 0x201   : > { %v1274_v53 = vmul.f32 %v1273_v57, %v1265_v61  ;;  %v1275_v58 = vmul.f32 %v1273_v57, %v1266_v45  ;;  %v1286_v9 = vpop.permute.xlu0 %1285  ;;  %v3734_v44 = vpop.permute.xlu2 %1356 }
 0x202   : > { %v1253_v7 = vadd.f32 %v1252_v33, %v1222_v13 }
 0x203   : > { %v1276_v12 = vadd.f32 %v1274_v53, %v1271_v51  ;;  %v1277_v14 = vadd.f32 %v1275_v58, %v1272_v22 }
 0x205   : > { %v1280_v47 = vrot.slane %v1277_v14, 7  ;;  %1604 = vrot.lane.b32.xlu1 %v2590_v34, %s2429_s26  ;;  %s3851_s26 = sld [smem:[#allocation2 + $0x24]] }
 0x207   : > { %v1281_v35 = vsel %vm363_vm15, %v1276_v12, %v1280_v47  ;;  %v1288_v62 = vpop.permute.xlu1 %1287  ;;  %1628 = vrot.lane.b32.xlu0 %v2585_v32, %s2430_s28  ;;  %1635 = vrot.lane.b32.xlu2 %v2590_v34, %s2430_s28  ;;  %v1331_v12 = vmul.f32 %v2927_v36, %v3668_v2  ;;  %v1366_v47 = vstv %s3771_s11  ;;  %s2085_s11 = sld [smem:[#allocation2 + $0x27]] }
 0x208   : > { %v1283_v11 = vmul.f32 %v1281_v35, %v1269_v26  ;;  %v1290_v55 = vsel %vm1289_vm11, %v1286_v9, %v1288_v62  ;;  %v1291_v42 = vsel %vm1289_vm11, %v1288_v62, %v1286_v9  ;;  %v1363_v26 = vstv %s3769_s10  ;;  %s2084_s10 = sld [smem:[#allocation2 + $0x57]] }
 0x209   : > { %v1295_v8 = vpop.permute.xlu0 %1294  ;;  %v3748_v6 = vpop.permute.xlu2 %1385  ;;  %v1302_v39 = vmul.f32 %v1301_v43, %v1290_v55  ;;  %v1303_v3 = vmul.f32 %v1301_v43, %v1291_v42 }
 0x20a   : > { %v1284_v17 = vadd.f32 %v1283_v11, %v1253_v7  ;;  %v1296_v49 = vsel %vm1289_vm11, %v3665_v27, %v1295_v8  ;;  %v1297_v13 = vsel %vm1289_vm11, %v1295_v8, %v3665_v27 }
 0x20b   : > { %v1305_v52 = vmul.f32 %v1304_v1, %v1296_v49  ;;  %v1306_v15 = vmul.f32 %v1304_v1, %v1297_v13 }
 0x20d   : > { %v1307_v30 = vadd.f32 %v1305_v52, %v1302_v39  ;;  %v1308_v38 = vadd.f32 %v1306_v15, %v1303_v3  ;;  %1633 = vrot.lane.b32.xlu1 %v2583_v31, %s2430_s28  ;;  %v1362_v52 = vmul.f32 %v2969_v19, %v3668_v2  ;;  %s2435_s28 = smov 78  }
 0x20f   : > { %v1311_v25 = vrot.slane %v1308_v38, 7  ;;  %v1317_v41 = vpop.permute.xlu1 %1316  ;;  %1657 = vrot.lane.b32.xlu0 %v2579_v24, %s2431_s9  ;;  %1664 = vrot.lane.b32.xlu2 %v2583_v31, %s2431_s9 }
 0x210   : > { %v1321_v27 = vsel %vm1320_vm12, %v1317_v41, %v3690_v18  ;;  %v1322_v63 = vsel %vm1320_vm12, %v3690_v18, %v1317_v41 }
 0x211   : > { %v1312_v54 = vsel %vm363_vm15, %v1307_v30, %v1311_v25  ;;  %v1324_v28 = vpop.permute.xlu0 %1323  ;;  %v3766_v0 = vpop.permute.xlu2 %1411  ;;  %v1333_v60 = vmul.f32 %v1332_v59, %v1321_v27  ;;  %v1334_v33 = vmul.f32 %v1332_v59, %v1322_v63  ;;  %v1394_v30 = vstv %s3798_s18  ;;  %s2087_s18 = sld [smem:[#allocation2 + $0x28]] }
 0x212   : > { %v1314_v40 = vmul.f32 %v1312_v54, %v1300_v23  ;;  %v1397_v27 = vstv %s3808_s21  ;;  %s2089_s21 = sld [smem:[#allocation2 + $0x29]] }
 0x214   : > { %v1315_v16 = vadd.f32 %v1314_v40, %v1284_v17 }
 0x215   : > { %1659 = vrot.lane.b32.xlu1 %v2585_v32, %s2431_s9 }
 0x217   : > { %v1326_v57 = vpop.permute.xlu1 %1325  ;;  %1666 = vrot.lane.b32.xlu0 %v2590_v34, %s2431_s9  ;;  %1690 = vrot.lane.b32.xlu2 %v2585_v32, %s2432_s17  ;;  %s2083_s9 = sld [smem:[#allocation2 + $0x26]] }
 0x218   : > { %v1327_v18 = vsel %vm1320_vm12, %v1324_v28, %v1326_v57  ;;  %v1328_v50 = vsel %vm1320_vm12, %v1326_v57, %v1324_v28 }
 0x219   : > { %v1336_v61 = vmul.f32 %v1335_v4, %v1327_v18  ;;  %v1337_v45 = vmul.f32 %v1335_v4, %v1328_v50  ;;  %v1350_v51 = vpop.permute.xlu0 %1349  ;;  %v3781_v22 = vpop.permute.xlu2 %1440 }
 0x21a   : > { %v1352_v53 = vsel %vm1351_vm13, %v3705_v37, %v1350_v51  ;;  %v1353_v58 = vsel %vm1351_vm13, %v1350_v51, %v3705_v37 }
 0x21b   : > { %v1338_v9 = vadd.f32 %v1336_v61, %v1333_v60  ;;  %v1339_v7 = vadd.f32 %v1337_v45, %v1334_v33  ;;  %v1364_v55 = vmul.f32 %v1363_v26, %v1352_v53  ;;  %v1365_v42 = vmul.f32 %v1363_v26, %v1353_v58 }
 0x21c   : > { %v1393_v33 = vmul.f32 %v3025_v48, %v3668_v2 }
 0x21d   : > { %v1342_v14 = vrot.slane %v1339_v7, 7  ;;  %1688 = vrot.lane.b32.xlu1 %v2579_v24, %s2432_s17 }
 0x21f   : > { %v1343_v35 = vsel %vm363_vm15, %v1338_v9, %v1342_v14  ;;  %v1355_v43 = vpop.permute.xlu1 %1354  ;;  %1695 = vrot.lane.b32.xlu0 %v2583_v31, %s2432_s17  ;;  %1719 = vrot.lane.b32.xlu2 %v2579_v24, %s2433_s20  ;;  %v1428_v14 = vstv %s3835_s24  ;;  %s3979_s24 = sld [smem:[#allocation2 + $0x5b]] }
 0x220   : > { %v1345_v37 = vmul.f32 %v1343_v35, %v1331_v12  ;;  %v1358_v62 = vsel %vm1351_vm13, %v1355_v43, %v3734_v44  ;;  %v1359_v11 = vsel %vm1351_vm13, %v3734_v44, %v1355_v43  ;;  %v1425_v12 = vstv %s3831_s22  ;;  %s2090_s22 = sld [smem:[#allocation2 + $0x5a]] }
 0x221   : > { %v1367_v1 = vmul.f32 %v1366_v47, %v1358_v62  ;;  %v1368_v8 = vmul.f32 %v1366_v47, %v1359_v11  ;;  %v1379_v17 = vpop.permute.xlu0 %1378  ;;  %v3810_v49 = vpop.permute.xlu2 %1449  ;;  %vm1630_vm13 = vcmp.lt.s32.totalorder %v2731_v5, 83 }
 0x222   : > { %v1346_v13 = vadd.f32 %v1345_v37, %v1315_v16 }
 0x223   : > { %v1369_v39 = vadd.f32 %v1367_v1, %v1364_v55  ;;  %v1370_v3 = vadd.f32 %v1368_v8, %v1365_v42 }
 0x225   : > { %v1373_v15 = vrot.slane %v1370_v3, 7  ;;  %1697 = vrot.lane.b32.xlu1 %v2590_v34, %s2432_s17  ;;  %v1456_v3 = vstv %s3851_s26  ;;  %s2086_s17 = sld [smem:[#allocation2 + $0x58]] }
 0x226   : > { %s3983_s26 = sld [smem:[#allocation2 + $0x2a]] }
 0x227   : > { %v1374_v44 = vsel %vm363_vm15, %v1369_v39, %v1373_v15  ;;  %v1381_v38 = vpop.permute.xlu1 %1380  ;;  %1721 = vrot.lane.b32.xlu0 %v2585_v32, %s2433_s20  ;;  %1728 = vrot.lane.b32.xlu2 %v2590_v34, %s2433_s20 }
 0x228   : > { %v1376_v23 = vmul.f32 %v1374_v44, %v1362_v52  ;;  %v1383_v25 = vsel %vm1382_vm14, %v1379_v17, %v1381_v38  ;;  %v1384_v41 = vsel %vm1382_vm14, %v1381_v38, %v1379_v17  ;;  %v1459_v52 = vstv %s3855_s27  ;;  %s3985_s27 = sld [smem:[#allocation2 + $0x2b]] }
 0x229   : > { %v1388_v63 = vpop.permute.xlu0 %1387  ;;  %v3824_v54 = vpop.permute.xlu2 %1478  ;;  %v1395_v59 = vmul.f32 %v1394_v30, %v1383_v25  ;;  %v1396_v4 = vmul.f32 %v1394_v30, %v1384_v41 }
 0x22a   : > { %v1377_v28 = vadd.f32 %v1376_v23, %v1346_v13  ;;  %v1389_v40 = vsel %vm1382_vm14, %v3748_v6, %v1388_v63  ;;  %v1390_v16 = vsel %vm1382_vm14, %v1388_v63, %v3748_v6  ;;  %v1424_v13 = vmul.f32 %v2759_v10, %v3862_v56 }
 0x22b   : > { %v1398_v57 = vmul.f32 %v1397_v27, %v1389_v40  ;;  %v1399_v18 = vmul.f32 %v1397_v27, %v1390_v16 }
 0x22d   : > { %v1400_v50 = vadd.f32 %v1398_v57, %v1395_v59  ;;  %v1401_v60 = vadd.f32 %v1399_v18, %v1396_v4  ;;  %1726 = vrot.lane.b32.xlu1 %v2583_v31, %s2433_s20  ;;  %v1487_v57 = vstv %s3885_s29  ;;  %s2088_s20 = sld [smem:[#allocation2 + $0x59]] }
 0x22e   : > { %s4001_s29 = sld [smem:[#allocation2 + $0x5d]] }
 0x22f   : > { %v1404_v61 = vrot.slane %v1401_v60, 7  ;;  %v1410_v6 = vpop.permute.xlu1 %1409  ;;  %1750 = vrot.lane.b32.xlu0 %v2579_v24, %s2434_s25  ;;  %1757 = vrot.lane.b32.xlu2 %v2583_v31, %s2434_s25 }
 0x230   : > { %v1414_v45 = vsel %vm1413_vm1, %v1410_v6, %v3766_v0  ;;  %v1415_v51 = vsel %vm1413_vm1, %v3766_v0, %v1410_v6 }
 0x231   : > { %v1405_v2 = vsel %vm363_vm15, %v1400_v50, %v1404_v61  ;;  %v1417_v53 = vpop.permute.xlu0 %1416  ;;  %v3846_v58 = vpop.permute.xlu2 %1504  ;;  %v1426_v35 = vmul.f32 %v1425_v12, %v1414_v45  ;;  %v1427_v43 = vmul.f32 %v1425_v12, %v1415_v51  ;;  %v1490_v61 = vstv %s2082_s5  ;;  %s4013_s5 = sld [smem:[#allocation2 + $0x5e]] }
 0x232   : > { %v1407_v9 = vmul.f32 %v1405_v2, %v1393_v33 }
 0x234   : > { %v1408_v7 = vadd.f32 %v1407_v9, %v1377_v28 }
 0x235   : > { %1752 = vrot.lane.b32.xlu1 %v2585_v32, %s2434_s25 }
 0x237   : > { %v1419_v0 = vpop.permute.xlu1 %1418  ;;  %1759 = vrot.lane.b32.xlu0 %v2590_v34, %s2434_s25  ;;  %1783 = vrot.lane.b32.xlu2 %v2585_v32, %s2435_s28  ;;  %s3981_s25 = sld [smem:[#allocation2 + $0x5c]] }
 0x238   : > { %v1420_v26 = vsel %vm1413_vm1, %v1417_v53, %v1419_v0  ;;  %v1421_v47 = vsel %vm1413_vm1, %v1419_v0, %v1417_v53  ;;  %vm1661_vm1 = vcmp.lt.s32.totalorder %v2731_v5, 82 }
 0x239   : > { %v1429_v37 = vmul.f32 %v1428_v14, %v1420_v26  ;;  %v1430_v62 = vmul.f32 %v1428_v14, %v1421_v47  ;;  %v1443_v11 = vpop.permute.xlu0 %1442  ;;  %v3874_v17 = vpop.permute.xlu2 %1533 }
 0x23a   : > { %v1445_v55 = vsel %vm1444_vm5, %v3781_v22, %v1443_v11  ;;  %v1446_v42 = vsel %vm1444_vm5, %v1443_v11, %v3781_v22  ;;  %v1518_v11 = vstv %s2083_s9  ;;  %s4023_s9 = sld [smem:[#allocation2 + $0x5f]] }
 0x23b   : > { %v1431_v1 = vadd.f32 %v1429_v37, %v1426_v35  ;;  %v1432_v8 = vadd.f32 %v1430_v62, %v1427_v43  ;;  %v1457_v23 = vmul.f32 %v1456_v3, %v1445_v55  ;;  %v1458_v25 = vmul.f32 %v1456_v3, %v1446_v42 }
 0x23c   : > { %v1521_v55 = vstv %s2084_s10  ;;  %s4034_s10 = sld [smem:[#allocation2 + $0x2e]] }
 0x23d   : > { %v1435_v39 = vrot.slane %v1432_v8, 7  ;;  %1781 = vrot.lane.b32.xlu1 %v2579_v24, %s2435_s28 }
 0x23f   : > { %v1436_v15 = vsel %vm363_vm15, %v1431_v1, %v1435_v39  ;;  %v1448_v44 = vpop.permute.xlu1 %1447  ;;  %1788 = vrot.lane.b32.xlu0 %v2583_v31, %s2435_s28  ;;  %1812 = vrot.lane.b32.xlu2 %v2579_v24, %s2436_s4  ;;  %v1455_v24 = vmul.f32 %v2799_v21, %v3862_v56 }
 0x240   : > { %v1438_v22 = vmul.f32 %v1436_v15, %v1424_v13  ;;  %v1451_v30 = vsel %vm1444_vm5, %v1448_v44, %v3810_v49  ;;  %v1452_v38 = vsel %vm1444_vm5, %v3810_v49, %v1448_v44  ;;  %vm1785_vm5 = vcmp.lt.s32.totalorder %v2731_v5, 78 }
 0x241   : > { %v1460_v41 = vmul.f32 %v1459_v52, %v1451_v30  ;;  %v1461_v27 = vmul.f32 %v1459_v52, %v1452_v38  ;;  %v1472_v63 = vpop.permute.xlu0 %1471  ;;  %v1543_v49 = vpop.permute.xlu2 %1542 }
 0x242   : > { %v1439_v28 = vadd.f32 %v1438_v22, %v1408_v7 }
 0x243   : > { %v1462_v40 = vadd.f32 %v1460_v41, %v1457_v23  ;;  %v1463_v16 = vadd.f32 %v1461_v27, %v1458_v25  ;;  %v1517_v23 = vmul.f32 %v2914_v46, %v3862_v56  ;;  %v1549_v41 = vstv %s2085_s11  ;;  %s4061_s11 = sld [smem:[#allocation2 + $0x2f]] }
 0x244   : > { %v1552_v27 = vstv %s2086_s17  ;;  %s4068_s17 = sld [smem:[#allocation2 + $0x60]] }
 0x245   : > { %v1466_v59 = vrot.slane %v1463_v16, 7  ;;  %1790 = vrot.lane.b32.xlu1 %v2590_v34, %s2435_s28  ;;  %s3994_s28 = sld [smem:[#allocation2 + $0x2c]] }
 0x247   : > { %v1467_v4 = vsel %vm363_vm15, %v1462_v40, %v1466_v59  ;;  %v1474_v18 = vpop.permute.xlu1 %1473  ;;  %1814 = vrot.lane.b32.xlu0 %v2585_v32, %s2436_s4  ;;  %1821 = vrot.lane.b32.xlu2 %v2590_v34, %s2436_s4  ;;  %v1486_v32 = vmul.f32 %v2812_v29, %v3862_v56 }
 0x248   : > { %v1469_v50 = vmul.f32 %v1467_v4, %v1455_v24  ;;  %v1476_v60 = vsel %vm1475_vm6, %v1472_v63, %v1474_v18  ;;  %v1477_v33 = vsel %vm1475_vm6, %v1474_v18, %v1472_v63 }
 0x249   : > { %v1481_v6 = vpop.permute.xlu0 %1480  ;;  %v1488_v53 = vmul.f32 %v1487_v57, %v1476_v60  ;;  %v1489_v9 = vmul.f32 %v1487_v57, %v1477_v33  ;;  %v1572_v47 = vpop.permute.xlu2 %1571 }
 0x24a   : > { %v1470_v45 = vadd.f32 %v1469_v50, %v1439_v28  ;;  %v1482_v51 = vsel %vm1475_vm6, %v3824_v54, %v1481_v6  ;;  %v1483_v2 = vsel %vm1475_vm6, %v1481_v6, %v3824_v54  ;;  %v1548_v6 = vmul.f32 %v2927_v36, %v3862_v56 }
 0x24b   : > { %v1491_v7 = vmul.f32 %v1490_v61, %v1482_v51  ;;  %v1492_v12 = vmul.f32 %v1490_v61, %v1483_v2  ;;  %vm1816_vm6 = vcmp.lt.s32.totalorder %v2731_v5, 77 }
 0x24d   : > { %v1493_v14 = vadd.f32 %v1491_v7, %v1488_v53  ;;  %v1494_v0 = vadd.f32 %v1492_v12, %v1489_v9  ;;  %1819 = vrot.lane.b32.xlu1 %v2583_v31, %s2436_s4  ;;  %v1583_v12 = vstv %s2088_s20  ;;  %s4007_s4 = sld [smem:[#allocation2 + $0x2d]] }
 0x24e   : > { %s4117_s20 = sld [smem:[#allocation2 + $0x61]] }
 0x24f   : > { %v1497_v34 = vrot.slane %v1494_v0, 7  ;;  %v1503_v26 = vpop.permute.xlu1 %1502 }
 0x250   : > { %v1507_v54 = vsel %vm1506_vm7, %v1503_v26, %v3846_v58  ;;  %v1508_v35 = vsel %vm1506_vm7, %v3846_v58, %v1503_v26 }
 0x251   : > { %v1498_v31 = vsel %vm363_vm15, %v1493_v14, %v1497_v34  ;;  %v1510_v43 = vpop.permute.xlu0 %1509  ;;  %v1519_v13 = vmul.f32 %v1518_v11, %v1507_v54  ;;  %v1520_v58 = vmul.f32 %v1518_v11, %v1508_v35  ;;  %v1598_v15 = vpop.permute.xlu2 %1597  ;;  %v1579_v11 = vmul.f32 %v2969_v19, %v3862_v56 }
 0x252   : > { %v1500_v37 = vmul.f32 %v1498_v31, %v1486_v32 }
 0x254   : > { %v1501_v62 = vadd.f32 %v1500_v37, %v1470_v45 }
 0x257   : > { %v1512_v42 = vpop.permute.xlu1 %1511 }
 0x258   : > { %v1513_v1 = vsel %vm1506_vm7, %v1510_v43, %v1512_v42  ;;  %v1514_v8 = vsel %vm1506_vm7, %v1512_v42, %v1510_v43 }
 0x259   : > { %v1522_v39 = vmul.f32 %v1521_v55, %v1513_v1  ;;  %v1523_v3 = vmul.f32 %v1521_v55, %v1514_v8  ;;  %v1536_v52 = vpop.permute.xlu0 %1535  ;;  %v3938_v61 = vpop.permute.xlu2 %1626 }
 0x25a   : > { %v1538_v44 = vsel %vm1537_vm8, %v3874_v17, %v1536_v52  ;;  %v1539_v22 = vsel %vm1537_vm8, %v1536_v52, %v3874_v17  ;;  %v1614_v52 = vstv %s2090_s22 }
 0x25b   : > { %v1524_v30 = vadd.f32 %v1522_v39, %v1519_v13  ;;  %v1525_v38 = vadd.f32 %v1523_v3, %v1520_v58  ;;  %v1550_v17 = vmul.f32 %v1549_v41, %v1538_v44  ;;  %v1551_v59 = vmul.f32 %v1549_v41, %v1539_v22 }
 0x25c   : > { %v1611_v3 = vstv %s2089_s21  ;;  %s2112_s21 = sshll.u32 %s2478_s16, 3  ;;  %s1871_s16 = scalar_lea.sflag [#allocation4], %s2561_s8 }
 0x25d   : > { %v1528_v25 = vrot.slane %v1525_v38, 7 }
 0x25f   : > { %v1529_v63 = vsel %vm363_vm15, %v1524_v30, %v1528_v25  ;;  %v1541_v28 = vpop.permute.xlu1 %1540 }
 0x260   : > { %v1531_v40 = vmul.f32 %v1529_v63, %v1517_v23  ;;  %v1544_v16 = vsel %vm1537_vm8, %v1541_v28, %v1543_v49  ;;  %v1545_v24 = vsel %vm1537_vm8, %v1543_v49, %v1541_v28  ;;  %v1580_v49 = vstv %s2087_s18  ;;  %s4109_s18 = sld [smem:[#allocation2 + $0x30]] }
 0x261   : > { %v1553_v4 = vmul.f32 %v1552_v27, %v1544_v16  ;;  %v1554_v57 = vmul.f32 %v1552_v27, %v1545_v24  ;;  %v1565_v18 = vpop.permute.xlu0 %1564  ;;  %v1610_v28 = vmul.f32 %v3025_v48, %v3862_v56 }
 0x262   : > { %v1532_v50 = vadd.f32 %v1531_v40, %v1501_v62  ;;  %v3945_v62 = vpop.permute.xlu2 %1635 }
 0x263   : > { %v1555_v60 = vadd.f32 %v1553_v4, %v1550_v17  ;;  %v1556_v33 = vadd.f32 %v1554_v57, %v1551_v59 }
 0x265   : > { %v1559_v45 = vrot.slane %v1556_v33, 7 }
 0x267   : > { %v1560_v51 = vsel %vm363_vm15, %v1555_v60, %v1559_v45  ;;  %v1567_v2 = vpop.permute.xlu1 %1566 }
 0x268   : > { %v1562_v53 = vmul.f32 %v1560_v51, %v1548_v6  ;;  %v1569_v9 = vsel %vm1568_vm9, %v1565_v18, %v1567_v2  ;;  %v1570_v7 = vsel %vm1568_vm9, %v1567_v2, %v1565_v18 }
 0x269   : > { %v1574_v14 = vpop.permute.xlu0 %1573  ;;  %v1581_v26 = vmul.f32 %v1580_v49, %v1569_v9  ;;  %v1582_v54 = vmul.f32 %v1580_v49, %v1570_v7  ;;  %v2234_v9 = vld [vmem:[#allocation6] ss:$2 sm:$0x3] }
 0x26a   : > { %v1563_v0 = vadd.f32 %v1562_v53, %v1532_v50  ;;  %v1575_v32 = vsel %vm1568_vm9, %v1572_v47, %v1574_v14  ;;  %v1576_v34 = vsel %vm1568_vm9, %v1574_v14, %v1572_v47  ;;  %v3954_v22 = vpop.permute.xlu2 %1664  ;;  %vm294_vm11 = vcmp.ge.s32.totalorder %v2234_v9, 4294967293 }
 0x26b   : > { %v1584_v35 = vmul.f32 %v1583_v12, %v1575_v32  ;;  %v1585_v31 = vmul.f32 %v1583_v12, %v1576_v34  ;;  %vm295_vm12 = vcmp.lt.s32.totalorder %v2234_v9, 13  ;;  %v1645_v12 = vstv %s3979_s24 }
 0x26c   : > { %vm296_vm14 = vmand %vm294_vm11, %vm295_vm12  ;;  %v1642_v34 = vstv %s3983_s26  ;;  %s217_s26 = scalar_lea.vmem [#allocation9], %s1992_s23  ;;  %s2330_s23 = scalar_lea.hbm %s4198_s3, 16 }
 0x26d   : > { %v1586_v43 = vadd.f32 %v1584_v35, %v1581_v26  ;;  %v1587_v37 = vadd.f32 %v1585_v31, %v1582_v54  ;;  %v4016_v54 = vsel %vm296_vm14, 1.0, %v4209_v20  ;;  %v1673_v31 = vstv %s3985_s27  ;;  %s1884_s27 = sshll.u32 %s217_s26, 4  ;;  %s1885_s27 = int_to_ptr.vmem [resolvable:$true] %s1884_s27 }
 0x26e   : > { %v4031_v20 = vmul.f32 %v2799_v21, %v4016_v54  ;;  %v1704_v21 = vstv %s3994_s28 }
 0x26f   : > { %v1590_v55 = vrot.slane %v1587_v37, 7  ;;  %v1596_v42 = vpop.permute.xlu1 %1595 }
 0x270   : > { %v1600_v47 = vsel %vm1599_vm10, %v1596_v42, %v1598_v15  ;;  %v1601_v1 = vsel %vm1599_vm10, %v1598_v15, %v1596_v42  ;;  %v4027_v42 = vmul.f32 %v2759_v10, %v4016_v54 }
 0x271   : > { %v1591_v8 = vsel %vm363_vm15, %v1586_v43, %v1590_v55  ;;  %v1603_v13 = vpop.permute.xlu0 %1602  ;;  %v1613_v23 = vmul.f32 %v1611_v3, %v1601_v1  ;;  %v1612_v27 = vmul.f32 %v1611_v3, %v1600_v47 }
 0x272   : > { %v1593_v58 = vmul.f32 %v1591_v8, %v1579_v11  ;;  %v3963_v57 = vpop.permute.xlu2 %1690 }
 0x274   : > { %v1594_v39 = vadd.f32 %v1593_v58, %v1563_v0  ;;  %v1676_v0 = vstv %s3981_s25  ;;  %s1882_s25 = scalar_lea.hbm %s4198_s3, %s2112_s21 }
 0x275   : > { %s1886_s28 = sshll.u32 %s1882_s25, 4  ;;  %s1887_s28 = int_to_ptr.hbm [resolvable:$true] %s1886_s28 }
 0x277   : > { %v1605_v44 = vpop.permute.xlu1 %1604 }
 0x278   : > { %v1606_v30 = vsel %vm1599_vm10, %v1603_v13, %v1605_v44  ;;  %v1607_v38 = vsel %vm1599_vm10, %v1605_v44, %v1603_v13 }
 0x279   : > { %v1615_v25 = vmul.f32 %v1614_v52, %v1606_v30  ;;  %v1616_v41 = vmul.f32 %v1614_v52, %v1607_v38  ;;  %v1629_v15 = vpop.permute.xlu0 %1628  ;;  %v1707_v52 = vstv %s4001_s29  ;;  %v4057_v30 = vmul.f32 %v2812_v29, %v4016_v54  ;;  %s2324_s29 = sshra.s32 %s1887_s28, 4  ;;  %s2325_s29 = int_to_ptr.hbm [resolvable:$true] %s2324_s29 }
 0x27a   : > { %v3967_v33 = vpop.permute.xlu2 %1719  ;;  %v1632_v26 = vsel %vm1630_vm13, %v1629_v15, %v3938_v61  ;;  %v1631_v13 = vsel %vm1630_vm13, %v3938_v61, %v1629_v15  ;;  %p2331_p9 = scmp.lt.s32.totalorder %s2325_s29, %s4198_s3 }
 0x27b   : > { %v1618_v63 = vadd.f32 %v1616_v41, %v1613_v23  ;;  %v1617_v40 = vadd.f32 %v1615_v25, %v1612_v27  ;;  %v1644_v55 = vmul.f32 %v1642_v34, %v1632_v26  ;;  %v1738_v25 = vstv %s4013_s5 }
 0x27d   : > { %v1621_v16 = vrot.slane %v1618_v63, 7 }
 0x27f   : > { %v1622_v24 = vsel %vm363_vm15, %v1617_v40, %v1621_v16  ;;  %v1634_v17 = vpop.permute.xlu1 %1633  ;;  %v1769_v40 = vstv %s4023_s9 }
 0x280   : > { %v1624_v59 = vmul.f32 %v1622_v24, %v1610_v28  ;;  %v1638_v14 = vsel %vm1630_vm13, %v3945_v62, %v1634_v17  ;;  %v1637_v10 = vsel %vm1630_vm13, %v1634_v17, %v3945_v62  ;;  %v1735_v62 = vstv %s4007_s4  ;;  %s2326_s4 = scalar_lea.hbm %s2325_s29, 8 }
 0x281   : > { %v1658_v4 = vpop.permute.xlu0 %1657  ;;  %v1647_v35 = vmul.f32 %v1645_v12, %v1638_v14  ;;  %v1646_v38 = vmul.f32 %v1645_v12, %v1637_v10  ;;  %v1766_v12 = vstv %s4034_s10  ;;  %v1800_v10 = vstv %s4068_s17  ;;  %p2327_p1 = scmp.ne.s32.totalorder %s2325_s29, %s2326_s4  ;;  %p2332_p2 = scmp.lt.s32.totalorder %s2330_s23, %s2326_s4 }
 0x282   : > { %v3965_v18 = vadd.f32 %v1624_v59, %v1594_v39  ;;  %v3973_v56 = vpop.permute.xlu2 %1728 }
 0x283   : > { %v1649_v58 = vadd.f32 %v1647_v35, %v1644_v55  ;;  %p2328_p4 = pnand %p2327_p1, %p2523_p3  ;;  %p2333_p10 = por %p2332_p2, %p2331_p9 }
 0x285   : > { %v1652_v41 = vrot.slane %v1649_v58, 7  ;;  %p2329_p8 = pneg %p2328_p4 }
 0x287   : > { %v1660_v50 = vpop.permute.xlu1 %1659  ;;  %p2334_p11 = pnand %p2333_p10, %p2329_p8 }
 0x288   : > { %v1663_v43 = vsel %vm1661_vm1, %v1660_v50, %v1658_v4  ;;  %v1662_v61 = vsel %vm1661_vm1, %v1658_v4, %v1660_v50 }
 0x289   : > { %v1667_v60 = vpop.permute.xlu0 %1666  ;;  %v1675_v47 = vmul.f32 %v1673_v31, %v1663_v43  ;;  %v1674_v63 = vmul.f32 %v1673_v31, %v1662_v61 }
 0x28a   : > { %v3989_v53 = vpop.permute.xlu2 %1757  ;;  %v1669_v32 = vsel %vm1661_vm1, %v1667_v60, %v3954_v22  ;;  %v1668_v39 = vsel %vm1661_vm1, %v3954_v22, %v1667_v60  ;;  %v1643_v22 = vmul.f32 %v1642_v34, %v1631_v13 }
 0x28b   : > { %v1678_v37 = vmul.f32 %v1676_v0, %v1669_v32  ;;  %v1677_v29 = vmul.f32 %v1676_v0, %v1668_v39 }
 0x28c   : > { %v1648_v50 = vadd.f32 %v1646_v38, %v1643_v22 }
 0x28d   : > { %v1680_v3 = vadd.f32 %v1678_v37, %v1675_v47  ;;  %v1797_v37 = vstv %s4061_s11 }
 0x28e   : > { %v1653_v35 = vsel %vm363_vm15, %v1648_v50, %v1652_v41 }
 0x28f   : > { %v3969_v6 = vpop.permute.xlu1 %1688  ;;  %v1683_v28 = vrot.slane %v1680_v3, 7  ;;  %v1655_v39 = vmul.f32 %v1653_v35, %v4027_v42 }
 0x290   : > { %v1694_v23 = vsel %vm1692_vm2, %v3963_v57, %v3969_v6  ;;  %v1693_v60 = vsel %vm1692_vm2, %v3969_v6, %v3963_v57 }
 0x291   : > { %v3971_v45 = vpop.permute.xlu0 %1695  ;;  %v1706_v24 = vmul.f32 %v1704_v21, %v1694_v23  ;;  %v1705_v43 = vmul.f32 %v1704_v21, %v1693_v60  ;;  %v1831_v60 = vstv %s4117_s20 }
 0x292   : > { %v4036_v8 = vpop.permute.xlu2 %1783 }
 0x297   : > { %v3975_v51 = vpop.permute.xlu1 %1697 }
 0x298   : > { %v1700_v44 = vsel %vm1692_vm2, %v3975_v51, %v3971_v45  ;;  %v1699_v17 = vsel %vm1692_vm2, %v3971_v45, %v3975_v51  ;;  %v1679_v45 = vadd.f32 %v1677_v29, %v1674_v63  ;;  %v1734_v63 = vmul.f32 %v2914_v46, %v4016_v54 }
 0x299   : > { %v3977_v49 = vpop.permute.xlu0 %1721  ;;  %v1709_v15 = vmul.f32 %v1707_v52, %v1700_v44  ;;  %v1708_v32 = vmul.f32 %v1707_v52, %v1699_v17  ;;  %v1796_v46 = vmul.f32 %v2969_v19, %v4016_v54 }
 0x29a   : > { %v1725_v59 = vsel %vm1723_vm3, %v3977_v49, %v3967_v33  ;;  %v1813_v26 = vpop.permute.xlu2 %1812  ;;  %v1684_v31 = vsel %vm363_vm15, %v1679_v45, %v1683_v28  ;;  %v1724_v55 = vsel %vm1723_vm3, %v3967_v33, %v3977_v49  ;;  %v1765_v28 = vmul.f32 %v2927_v36, %v4016_v54 }
 0x29b   : > { %v1711_v51 = vadd.f32 %v1709_v15, %v1706_v24  ;;  %v1737_v34 = vmul.f32 %v1735_v62, %v1725_v59  ;;  %v1686_v33 = vmul.f32 %v1684_v31, %v4031_v20  ;;  %v1710_v49 = vadd.f32 %v1708_v32, %v1705_v43 }
 0x29c   : > { %v1736_v44 = vmul.f32 %v1735_v62, %v1724_v55 }
 0x29d   : > { %v1714_v58 = vrot.slane %v1711_v51, 7 }
 0x29f   : > { %v3987_v2 = vpop.permute.xlu1 %1726  ;;  %v1715_v20 = vsel %vm363_vm15, %v1710_v49, %v1714_v58 }
 0x2a0   : > { %v1731_v27 = vsel %vm1723_vm3, %v3973_v56, %v3987_v2  ;;  %v1730_v57 = vsel %vm1723_vm3, %v3987_v2, %v3973_v56  ;;  %v1717_v59 = vmul.f32 %v1715_v20, %v4057_v30  ;;  %v4210_v20 = vld [vmem:[#allocation14_spill] sm:$0xff] }
 0x2a1   : > { %v3991_v7 = vpop.permute.xlu0 %1750  ;;  %v1740_v9 = vmul.f32 %v1738_v25, %v1731_v27  ;;  %v1739_v56 = vmul.f32 %v1738_v25, %v1730_v57  ;;  %v1656_v27 = vadd.f32 %v1655_v39, %v3965_v18 }
 0x2a2   : > { %v1822_v17 = vpop.permute.xlu2 %1821 }
 0x2a3   : > { %v1742_v47 = vadd.f32 %v1740_v9, %v1737_v34  ;;  %v1741_v25 = vadd.f32 %v1739_v56, %v1736_v44  ;;  %v1687_v18 = vadd.f32 %v1686_v33, %v1656_v27 }
 0x2a5   : > { %v1745_v22 = vrot.slane %v1742_v47, 7 }
 0x2a7   : > { %v4021_v11 = vpop.permute.xlu1 %1752 }
 0x2a8   : > { %v1756_v0 = vsel %vm1754_vm4, %v4021_v11, %v3991_v7  ;;  %v1755_v61 = vsel %vm1754_vm4, %v3991_v7, %v4021_v11 }
 0x2a9   : > { %v1760_v1 = vpop.permute.xlu0 %1759  ;;  %v1768_v13 = vmul.f32 %v1766_v12, %v1756_v0  ;;  %v1767_v7 = vmul.f32 %v1766_v12, %v1755_v61 }
 0x2aa   : > { %v1762_v4 = vsel %vm1754_vm4, %v1760_v1, %v3989_v53  ;;  %v1761_v2 = vsel %vm1754_vm4, %v3989_v53, %v1760_v1 }
 0x2ab   : > { %v1771_v6 = vmul.f32 %v1769_v40, %v1762_v4  ;;  %v1770_v38 = vmul.f32 %v1769_v40, %v1761_v2  ;;  %v1746_v40 = vsel %vm363_vm15, %v1741_v25, %v1745_v22  ;;  %v1828_v4 = vstv %s4109_s18 }
 0x2ad   : > { %v1773_v3 = vadd.f32 %v1771_v6, %v1768_v13  ;;  %v1718_v6 = vadd.f32 %v1717_v59, %v1687_v18 }
 0x2af   : > { %v1782_v16 = vpop.permute.xlu1 %1781  ;;  %v1776_v11 = vrot.slane %v1773_v3, 7 }
 0x2b0   : > { %v1787_v21 = vsel %vm1785_vm5, %v4036_v8, %v1782_v16  ;;  %v1786_v62 = vsel %vm1785_vm5, %v1782_v16, %v4036_v8  ;;  %v1772_v8 = vadd.f32 %v1770_v38, %v1767_v7 }
 0x2b1   : > { %v1789_v14 = vpop.permute.xlu0 %1788  ;;  %v1799_v42 = vmul.f32 %v1797_v37, %v1787_v21  ;;  %v1798_v16 = vmul.f32 %v1797_v37, %v1786_v62 }
 0x2b2   : > { %v1777_v9 = vsel %vm363_vm15, %v1772_v8, %v1776_v11 }
 0x2b3   : > { %v1779_v35 = vmul.f32 %v1777_v9, %v1765_v28 }
 0x2b7   : > { %v1791_v52 = vpop.permute.xlu1 %1790 }
 0x2b8   : > { %v1792_v53 = vsel %vm1785_vm5, %v1789_v14, %v1791_v52  ;;  %v1793_v1 = vsel %vm1785_vm5, %v1791_v52, %v1789_v14  ;;  %v1748_v14 = vmul.f32 %v1746_v40, %v1734_v63 }
 0x2b9   : > { %v1802_v23 = vmul.f32 %v1800_v10, %v1793_v1  ;;  %v1801_v41 = vmul.f32 %v1800_v10, %v1792_v53  ;;  %v1815_v15 = vpop.permute.xlu0 %1814 }
 0x2ba   : > { %v1818_v50 = vsel %vm1816_vm6, %v1815_v15, %v1813_v26  ;;  %v1817_v45 = vsel %vm1816_vm6, %v1813_v26, %v1815_v15  ;;  %v1749_v43 = vadd.f32 %v1748_v14, %v1718_v6  ;;  %v1827_v26 = vmul.f32 %v3025_v48, %v4016_v54 }
 0x2bb   : > { %v1804_v29 = vadd.f32 %v1802_v23, %v1799_v42  ;;  %v1803_v36 = vadd.f32 %v1801_v41, %v1798_v16  ;;  %v1830_v32 = vmul.f32 %v1828_v4, %v1818_v50  ;;  %v1829_v19 = vmul.f32 %v1828_v4, %v1817_v45 }
 0x2bc   : > { %v1780_v13 = vadd.f32 %v1779_v35, %v1749_v43 }
 0x2bd   : > { %v1807_v24 = vrot.slane %v1804_v29, 7 }
 0x2bf   : > { %v1820_v12 = vpop.permute.xlu1 %1819  ;;  %v1808_v0 = vsel %vm363_vm15, %v1803_v36, %v1807_v24 }
 0x2c0   : > { %v1823_v30 = vsel %vm1816_vm6, %v1820_v12, %v1822_v17  ;;  %v1824_v51 = vsel %vm1816_vm6, %v1822_v17, %v1820_v12  ;;  %v1810_v37 = vmul.f32 %v1808_v0, %v1796_v46 }
 0x2c1   : > { %v1832_v34 = vmul.f32 %v1831_v60, %v1823_v30  ;;  %v1833_v57 = vmul.f32 %v1831_v60, %v1824_v51 }
 0x2c2   : > { %v1811_v10 = vadd.f32 %v1810_v37, %v1780_v13 }
 0x2c3   : > { %v1835_v31 = vadd.f32 %v1833_v57, %v1830_v32  ;;  %v1834_v55 = vadd.f32 %v1832_v34, %v1829_v19 }
 0x2c5   : > { %v1838_v47 = vrot.slane %v1835_v31, 7 }
 0x2c7   : > { %v1839_v5 = vsel %vm363_vm15, %v1834_v55, %v1838_v47 }
 0x2c8   : > { %v1841_v58 = vmul.f32 %v1839_v5, %v1827_v26 }
 0x2ca   : > { %v1842_v56 = vadd.f32 %v1841_v58, %v1811_v10 }
 0x2cc   : > { %v2105_v2 = vmul.f32 -1.442695, %v1842_v56 }
 0x2ce   : > { %2229 = vpow2.f32 %v2105_v2 }
 0x2d4   : > { %v2230_v21 = vpop.eup %2229 }
 0x2d5   : > { %v1846_v39 = vadd.f32 1.0, %v2230_v21 }
 0x2d7   : > { %2231 = vrcp.f32 %v1846_v39  ;;  %v1858_v52 = vand.u32 2147483648, %v1846_v39  ;;  %v1856_v54 = vand.u32 2147483647, %v1846_v39  ;;  %vm1852_vm8 = vweird.f32 %v1846_v39 }
 0x2d9   : > { %v1859_v61 = vor.u32 1.1754944e-38, %v1858_v52  ;;  %vm1857_vm9 = vcmp.eq.f32.partialorder %v1856_v54, 8.507059e+37 }
 0x2dd   : > { %v2232_v33 = vpop.eup %2231 }
 0x2de   : > { %v1848_v49 = vmul.f32 %v2232_v33, %v1846_v39  ;;  %vm1853_vm7 = vweird.f32 %v2232_v33 }
 0x2df   : > { %vm1854_vm15 = vmor %vm1852_vm8, %vm1853_vm7 }
 0x2e0   : > { %v1849_v3 = vsub.f32 1.0, %v1848_v49 }
 0x2e2   : > { %v1850_v48 = vmul.f32 %v2232_v33, %v1849_v3 }
 0x2e4   : > { %v1851_v44 = vadd.f32 %v2232_v33, %v1850_v48 }
 0x2e6   : > { %v1855_v53 = vsel %vm1854_vm15, %v2232_v33, %v1851_v44 }
 0x2e7   : > { %v1860_v1 = vsel %vm1857_vm9, %v1859_v61, %v1855_v53 }
 0x2e8   : > { %v1864_v22 = vperm.slane %v1860_v1, 1  ;;  %v1863_v38 = vperm.slane %v1860_v1, 0 }
 0x2ea   : > { %v1865_v42 = vrot.slane %v1864_v22, 4 }
 0x2ec   : > { %v1866_v23 = vsel %vm225_vm0, %v1863_v38, %v1865_v42 }
 0x2ed   : > { %v1868_v25 = vmul.f32 %v1866_v23, %v4210_v20 }
 0x2ef   : > { %1869 = vst [vmem:[%s217_s26] sm:$0xff] %v1868_v25 }
 0x2f0   : > { %2337 = shalt.err (!%p2334_p11)
}
 0x2f1   : > { %2123 = dma.vmem_to_hbm [thread:$0]  (%p2523_p3), %s1885_s27, 128, %s1887_s28, %s1871_s16  }
 0x2f2 PF: > { %s1898_s8 = sand.u32 1, %s2372_s12   ;;  %p4211_p12 = scmp.ge.s32.totalorder %s2384_s15, 2 }
 0x2f3   : > { %s1899_s17 = scalar_lea.sflag [#allocation4], %s1898_s8 }
 0x2f4   : > { %p2137_p13 = pnand %p4211_p12, %p2492_p6 }
 0x2f6   : > { %p2138_p0 = pneg %p2137_p13 }
 0x2f8   : > { %2367 = dma.done.wait (%p2138_p0), %s1899_s17, 128  }
 0x2f9   : > { %2369 = vsyncadd (%p2138_p0), %s1899_s17, 4294967168  ;;  %p18_p5 = scmp.ge.s32.totalorder %s2513_s30, 4   ;;  %s4212_s12 = smov %s2376_s13 }
 0x2fa   : > { %s4213_s13 = smov %s2380_s14  ;;  %s4214_s14 = smov %s2529_s7 }
 0x2fb   : > { %s4215_s15 = smov %s2513_s30  ;;  %20 = sbr.rel (!%p18_p5) target bundleno = 7 (0x7), region = 88 }
 0x300   :  { %1905 = vsyncpa [#allocation3], 1 }
 0x301   :  { %1907 = vsyncpa [#allocation3 + $0x1], 1 }
 0x302   :  { %1908 = vsyncpa [#allocation8], 1 }
 0x303   :  { %1910 = vsyncpa [#allocation8 + $0x1], 1 }
 0x304   :  { %1911 = vsyncpa [#allocation4], 1 }
 0x305   :  { %1913 = vsyncpa [#allocation4 + $0x1], 1 }
 0x306   :  { %1914 = vsyncpa [#allocation5], 1 }
 0x307   :  { %1916 = vsyncpa [#allocation5 + $0x1], 1 }

</bundles_post_ra>
